<compile_context>
chip_gen: v7x
topology: tpu7x:2x2x1
jax: 0.10.0
libtpu: 0.0.40
codegen_flags: <defaults>
</compile_context>

<pallas_src>
import functools

import numpy as np

import jax
import jax.numpy as jnp
from jax.experimental import pallas as pl
from jax.experimental.pallas import tpu as pltpu


# 3x3 tap offsets, row-major (kh, kw) == (dh+1, dw+1) order.
_CONV3_TAPS = tuple((dh, dw) for dh in (-1, 0, 1) for dw in (-1, 0, 1))


@functools.lru_cache(maxsize=None)
def _vmem_limit_bytes():
    """Generation-aware VMEM limit: ~3/4 of physical, capped at 100 MiB."""
    cap = None
    try:
        info = pltpu.get_tpu_info()
        for name in ("vmem_capacity_bytes", "vmem_size_bytes", "vmem_bytes"):
            cap = getattr(info, name, None)
            if cap:
                break
    except Exception:
        cap = None
    if not cap:
        cap = 64 * 1024 * 1024  # conservative: v7x physical VMEM per TensorCore
    return int(min(cap * 3 // 4, 100 * 1024 * 1024))


def _compiler_params(semantics):
    return pltpu.CompilerParams(dimension_semantics=semantics,
                                vmem_limit_bytes=_vmem_limit_bytes())


def _itemsize(dt):
    return np.dtype(dt).itemsize


def _pick_block_n(n, max_bn):
    bn = min(n, max_bn)
    while n % bn != 0:
        bn -= 1
    return bn


# ----------------------------------------------------------------------------
# Shared epilogue: EvoNorm-S0 + ReLU on an f32 (C, M) tile (M = H*W of one
# sample).  Single pass over the tile (lane reductions for per-channel sum /
# sum-of-squares); the per-group combine only touches tiny (C, 1) vectors.
# ----------------------------------------------------------------------------
def _evonorm_s0_relu(y, gamma, beta, v, *, groups, eps):
    C, M = y.shape
    cg = C // groups
    cnt = float(cg * M)
    rsum = jnp.sum(y, axis=1, keepdims=True)       # (C, 1) per-channel sums
    rsq = jnp.sum(y * y, axis=1, keepdims=True)    # (C, 1) per-channel sum of squares
    ch = jax.lax.broadcasted_iota(jnp.int32, (C, 1), 0)
    inv_std = jnp.zeros((C, 1), jnp.float32)
    for g in range(groups):  # static loop over tiny (C,1) vectors only
        m = ((ch >= g * cg) & (ch < (g + 1) * cg)).astype(jnp.float32)
        gsum = jnp.sum(rsum * m)                   # scalar group sum
        gsq = jnp.sum(rsq * m)                     # scalar group sum of squares
        mean = gsum / cnt
        var = (gsq - gsum * mean) / (cnt - 1.0)    # unbiased (torch.var default)
        inv_std = inv_std + m * jax.lax.rsqrt(var + eps)
    scale = inv_std * gamma                        # (C, 1)
    out = y * jax.nn.sigmoid(v * y) * scale + beta
    return jnp.maximum(out, 0.0)


# ----------------------------------------------------------------------------
# Kernel 1 (fused): conv1(1x1)+EvoNorm+ReLU -> conv2(3x3)+EvoNorm+ReLU ->
# conv3(1x1) + BatchNorm PARTIAL statistics (per block).  block_n samples per
# grid step; intermediates never leave VMEM.
# ----------------------------------------------------------------------------
def _bottleneck_fused_kernel(x_ref, w1_ref, w2_ref, w3_ref, mask_ref,
                             ev1_ref, ev2_ref,
                             y_ref, sum_ref, sq_ref, xs_ref,
                             *, W, groups, eps, compute_dtype):
    block_n = x_ref.shape[0]
    HW = x_ref.shape[2]
    Cmid = w1_ref.shape[0]
    C4 = w3_ref.shape[0]

    g1, b1, v1 = ev1_ref[:, 0:1], ev1_ref[:, 1:2], ev1_ref[:, 2:3]
    g2, b2, v2 = ev2_ref[:, 0:1], ev2_ref[:, 1:2], ev2_ref[:, 2:3]

    psum = jnp.zeros((C4, 1), jnp.float32)
    psq = jnp.zeros((C4, 1), jnp.float32)

    for b in range(block_n):                          # static unrolled sample loop
        xb = x_ref[b].astype(compute_dtype)           # cast in-kernel: x kept once in HBM

        # ---- conv1 (1x1) + EvoNorm-S0 + ReLU ------------------------------
        y1 = jnp.dot(w1_ref[...], xb, preferred_element_type=jnp.float32)
        y1 = _evonorm_s0_relu(y1, g1, b1, v1, groups=groups, eps=eps)
        y1 = y1.astype(compute_dtype)

        # ---- conv2 (3x3, pad=1): stack 9 masked lane-rolled taps -----------
        # into one K = 9*Cmid MXU matmul (mask applied on the cheap input).
        for t, (dh, dw) in enumerate(_CONV3_TAPS):
            s = dh * W + dw
            shifted = y1 if s == 0 else pltpu.roll(y1, (-s) % HW, 1)
            xs_ref[pl.ds(t * Cmid, Cmid), :] = shifted * mask_ref[t]
        y2 = jnp.dot(w2_ref[...], xs_ref[...], preferred_element_type=jnp.float32)
        y2 = _evonorm_s0_relu(y2, g2, b2, v2, groups=groups, eps=eps)
        y2 = y2.astype(compute_dtype)

        # ---- conv3 (1x1, Cmid -> 4*Cmid) + BN partial stats ----------------
        y3 = jnp.dot(w3_ref[...], y2, preferred_element_type=jnp.float32)
        y_ref[b] = y3.astype(y_ref.dtype)
        psum = psum + jnp.sum(y3, axis=1, keepdims=True)
        psq = psq + jnp.sum(y3 * y3, axis=1, keepdims=True)

    sum_ref[0] = psum                                  # per-block partials, finalized in XLA
    sq_ref[0] = psq


def bottleneck_fused(x_flat, w1, w2s, w3, mask, ev1, ev2, *, W, groups, eps,
                     compute_dtype, block_n):
    N, Cin, HW = x_flat.shape
    Cmid = w1.shape[0]
    C4 = w3.shape[0]
    nblk = N // block_n

    kern = functools.partial(_bottleneck_fused_kernel, W=W, groups=groups,
                             eps=eps, compute_dtype=compute_dtype)

    cd_sz = _itemsize(compute_dtype)
    flops = (2 * N * HW * (Cmid * Cin + 9 * Cmid * Cmid + C4 * Cmid)
             + 14 * N * HW * Cmid + 4 * N * HW * C4)
    trans = 2 * N * HW * Cmid + 2 * N * groups
    bytes_ = (x_flat.size * x_flat.dtype.itemsize
              + N * C4 * HW * cd_sz
              + 2 * nblk * C4 * 4
              + (w1.size + w2s.size + w3.size + mask.size) * cd_sz
              + (ev1.size + ev2.size) * 4)

    return pl.pallas_call(
        kern,
        out_shape=(
            jax.ShapeDtypeStruct((N, C4, HW), compute_dtype),   # conv3 output
            jax.ShapeDtypeStruct((nblk, C4, 1), jnp.float32),   # partial sum
            jax.ShapeDtypeStruct((nblk, C4, 1), jnp.float32),   # partial sum of squares
        ),
        grid=(nblk,),
        in_specs=[
            pl.BlockSpec((block_n, Cin, HW), lambda n: (n, 0, 0)),
            pl.BlockSpec((Cmid, Cin), lambda n: (0, 0)),
            pl.BlockSpec((Cmid, 9 * Cmid), lambda n: (0, 0)),
            pl.BlockSpec((C4, Cmid), lambda n: (0, 0)),
            pl.BlockSpec((9, 1, HW), lambda n: (0, 0, 0)),
            pl.BlockSpec((Cmid, 3), lambda n: (0, 0)),
            pl.BlockSpec((Cmid, 3), lambda n: (0, 0)),
        ],
        out_specs=(
            pl.BlockSpec((block_n, C4, HW), lambda n: (n, 0, 0)),
            pl.BlockSpec((1, C4, 1), lambda n: (n, 0, 0)),
            pl.BlockSpec((1, C4, 1), lambda n: (n, 0, 0)),
        ),
        scratch_shapes=[pltpu.VMEM((9 * Cmid, HW), compute_dtype)],  # stacked conv2 operand
        compiler_params=_compiler_params(("parallel",)),
        cost_estimate=pl.CostEstimate(flops=int(flops), transcendentals=int(trans),
                                      bytes_accessed=int(bytes_)),
    )(x_flat, w1, w2s, w3, mask, ev1, ev2)


# ----------------------------------------------------------------------------
# Kernel 2: BatchNorm apply (precomputed scale/shift) + identity residual +
# ReLU.  Elementwise, "parallel" over sample blocks; residual read directly
# from the original x (no extra cast copy), output dtype configurable.
# ----------------------------------------------------------------------------
def _bn_apply_add_relu_kernel(y_ref, ss_ref, res_ref, o_ref):
    scale = ss_ref[:, 0:1][None]          # (1, C4, 1)
    shift = ss_ref[:, 1:2][None]
    out = jnp.maximum(y_ref[...].astype(jnp.float32) * scale + shift
                      + res_ref[...].astype(jnp.float32), 0.0)
    o_ref[...] = out.astype(o_ref.dtype)


def bn_apply_add_relu(y, ss, residual, *, block_n, out_dtype):
    N, C4, HW = y.shape
    nblk = N // block_n
    bytes_ = (y.size * y.dtype.itemsize + residual.size * residual.dtype.itemsize
              + N * C4 * HW * _itemsize(out_dtype) + ss.size * 4)
    blk = lambda n: (n, 0, 0)
    return pl.pallas_call(
        _bn_apply_add_relu_kernel,
        out_shape=jax.ShapeDtypeStruct((N, C4, HW), out_dtype),
        grid=(nblk,),
        in_specs=[
            pl.BlockSpec((block_n, C4, HW), blk),
            pl.BlockSpec((C4, 2), lambda n: (0, 0)),
            pl.BlockSpec((block_n, C4, HW), blk),
        ],
        out_specs=pl.BlockSpec((block_n, C4, HW), blk),
        compiler_params=_compiler_params(("parallel",)),
        cost_estimate=pl.CostEstimate(flops=int(4 * N * C4 * HW), transcendentals=0,
                                      bytes_accessed=int(bytes_)),
    )(y, ss, residual)


# ----------------------------------------------------------------------------
# Bottleneck forward (wrapper is layout glue only: reshapes + weight packing)
# ----------------------------------------------------------------------------
def bottleneck_forward(x_nchw, params, *, stride=1, groups=4, eps=1e-5,
                       compute_dtype=jnp.bfloat16, out_dtype=None, max_block_n=8):
    if stride != 1:
        raise NotImplementedError(
            "TODO(synk): stride>1 / user-supplied downsample residual path")
    N, Cin, H, W = x_nchw.shape
    HW = H * W
    out_dtype = compute_dtype if out_dtype is None else out_dtype

    w1 = params["conv1_w"][:, :, 0, 0].astype(compute_dtype)            # (Cmid, Cin)
    Cmid = w1.shape[0]
    # (Cout, Cin, 3, 3) -> (Cout, 9*Cin) with column index = (kh*3+kw)*Cin + i
    w2s = jnp.transpose(params["conv2_w"], (0, 2, 3, 1)).reshape(Cmid, 9 * Cmid)
    w2s = w2s.astype(compute_dtype)
    w3 = params["conv3_w"][:, :, 0, 0].astype(compute_dtype)            # (C4, Cmid)
    C4 = w3.shape[0]
    if C4 != Cin:
        raise NotImplementedError(
            "TODO(synk): downsample path (identity residual needs in_planes == 4*out_planes)")

    # Per-tap validity masks (implements the zero "pad=1" boundary); applied
    # to the rolled compute-dtype input inside the kernel.
    hh = jnp.arange(H)[:, None]
    ww = jnp.arange(W)[None, :]
    mask = jnp.stack(
        [((hh + dh >= 0) & (hh + dh < H) & (ww + dw >= 0) & (ww + dw < W)).reshape(1, HW)
         for dh, dw in _CONV3_TAPS], axis=0).astype(compute_dtype)       # (9, 1, HW)

    # Packed EvoNorm params: one (C, 3) tensor per norm -> single DMA each.
    ev1 = jnp.stack([params["bn1_gamma"], params["bn1_beta"], params["bn1_v"]],
                    axis=1).astype(jnp.float32)
    ev2 = jnp.stack([params["bn2_gamma"], params["bn2_beta"], params["bn2_v"]],
                    axis=1).astype(jnp.float32)

    block_n = _pick_block_n(N, max_block_n)
    x_flat = x_nchw.reshape(N, Cin, HW)     # single HBM copy: conv1 input AND residual

    y3, psum, psq = bottleneck_fused(x_flat, w1, w2s, w3, mask, ev1, ev2,
                                     W=W, groups=groups, eps=eps,
                                     compute_dtype=compute_dtype, block_n=block_n)

    # BatchNorm finalize (tiny, plain XLA): exact batch stats from per-block
    # partials; keeps the heavy fused pass fully "parallel" (both v7x TCs busy).
    count = float(N * HW)
    mean = jnp.sum(psum[:, :, 0], axis=0) / count
    var = jnp.maximum(jnp.sum(psq[:, :, 0], axis=0) / count - mean * mean, 0.0)
    scale = params["bn3_w"].astype(jnp.float32) * jax.lax.rsqrt(var + eps)
    shift = params["bn3_b"].astype(jnp.float32) - mean * scale
    ss = jnp.stack([scale, shift], axis=1)                               # (C4, 2)

    out = bn_apply_add_relu(y3, ss, x_flat, block_n=block_n, out_dtype=out_dtype)
    return out.reshape(N, C4, H, W)                                      # pure reshape


# ----------------------------------------------------------------------------
# Pure-JAX reference (verification only)
# ----------------------------------------------------------------------------
def _ref_forward(x, params, *, stride=1, groups=4, eps=1e-5):
    x = x.astype(jnp.float32)

    def conv(inp, w, s, pad):
        return jax.lax.conv_general_dilated(
            inp, w, (s, s), ((pad, pad), (pad, pad)),
            dimension_numbers=("NCHW", "OIHW", "NCHW"))

    def evonorm_relu(z, gamma, beta, v):
        N, C, H, W = z.shape
        cg = C // groups
        z5 = z.reshape(N, groups, cg, H, W)
        mean = jnp.mean(z5, axis=(2, 3, 4), keepdims=True)
        var = jnp.sum((z5 - mean) ** 2, axis=(2, 3, 4), keepdims=True) / (cg * H * W - 1)
        std = jnp.broadcast_to(jnp.sqrt(var + eps), z5.shape).reshape(N, C, H, W)
        num = z * jax.nn.sigmoid(v.reshape(1, C, 1, 1) * z)
        return jnp.maximum(num / std * gamma.reshape(1, C, 1, 1) + beta.reshape(1, C, 1, 1), 0.0)

    def bn(z, w, b):
        mean = jnp.mean(z, axis=(0, 2, 3), keepdims=True)
        var = jnp.mean((z - mean) ** 2, axis=(0, 2, 3), keepdims=True)
        C = z.shape[1]
        return (z - mean) / jnp.sqrt(var + eps) * w.reshape(1, C, 1, 1) + b.reshape(1, C, 1, 1)

    y = conv(x, params["conv1_w"], 1, 0)
    y = evonorm_relu(y, params["bn1_gamma"], params["bn1_beta"], params["bn1_v"])
    y = conv(y, params["conv2_w"], stride, 1)
    y = evonorm_relu(y, params["bn2_gamma"], params["bn2_beta"], params["bn2_v"])
    y = conv(y, params["conv3_w"], 1, 0)
    y = bn(y, params["bn3_w"], params["bn3_b"])
    return jnp.maximum(y + x, 0.0)


# ----------------------------------------------------------------------------
def make_params(key, in_planes, out_planes):
    ks = jax.random.split(key, 12)
    c4 = out_planes * 4
    return {
        "conv1_w": 0.1 * jax.random.normal(ks[0], (out_planes, in_planes, 1, 1), jnp.float32),
        "conv2_w": 0.1 * jax.random.normal(ks[1], (out_planes, out_planes, 3, 3), jnp.float32),
        "conv3_w": 0.1 * jax.random.normal(ks[2], (c4, out_planes, 1, 1), jnp.float32),
        "bn1_gamma": 1.0 + 0.1 * jax.random.normal(ks[3], (out_planes,), jnp.float32),
        "bn1_beta": 0.1 * jax.random.normal(ks[4], (out_planes,), jnp.float32),
        "bn1_v": 1.0 + 0.1 * jax.random.normal(ks[5], (out_planes,), jnp.float32),
        "bn2_gamma": 1.0 + 0.1 * jax.random.normal(ks[6], (out_planes,), jnp.float32),
        "bn2_beta": 0.1 * jax.random.normal(ks[7], (out_planes,), jnp.float32),
        "bn2_v": 1.0 + 0.1 * jax.random.normal(ks[8], (out_planes,), jnp.float32),
        "bn3_w": 1.0 + 0.1 * jax.random.normal(ks[9], (c4,), jnp.float32),
        "bn3_b": 0.1 * jax.random.normal(ks[10], (c4,), jnp.float32),
    }


if __name__ == "__main__":
    key = jax.random.PRNGKey(0)
    k_x, k_p = jax.random.split(key)

    # in_planes = out_planes*4 so the identity residual path (downsample=None) is valid.
    # H=W=16 -> HW=256 keeps the flattened spatial (lane) axis a multiple of 128.
    N, out_planes, H, W = 2, 8, 16, 16
    in_planes = out_planes * 4
    x = jax.random.normal(k_x, (N, in_planes, H, W), jnp.float32)   # NCHW, PyTorch-style
    params = make_params(k_p, in_planes, out_planes)

    ref = _ref_forward(x, params, stride=1, groups=4, eps=1e-5)

    # f32 path: tight correctness check of the fused kernel structure.
    fwd32 = jax.jit(functools.partial(bottleneck_forward, stride=1, groups=4, eps=1e-5,
                                      compute_dtype=jnp.float32))
    out32 = fwd32(x, params)
    jax.block_until_ready(out32)
    assert out32.shape == (N, out_planes * 4, H, W), out32.shape
    assert jnp.allclose(out32, ref, rtol=1e-4, atol=1e-4), \
        float(jnp.max(jnp.abs(out32 - ref)))

    # bf16 MXU fast path (default): looser tolerance vs the f32 reference.
    fwd16 = jax.jit(functools.partial(bottleneck_forward, stride=1, groups=4, eps=1e-5,
                                      compute_dtype=jnp.bfloat16))
    out16 = fwd16(x, params)
    jax.block_until_ready(out16)
    assert out16.shape == (N, out_planes * 4, H, W), out16.shape
    assert jnp.allclose(out16.astype(jnp.float32), ref, rtol=1e-1, atol=1e-1), \
        float(jnp.max(jnp.abs(out16.astype(jnp.float32) - ref)))

    print("KERNEL_OK")
</pallas_src>

<mosaic_0001>
module attributes {stable_mosaic.version = 11 : i64} {
  func.func @_bn_apply_add_relu_kernel(%arg0: i32, %arg1: memref<2x32x256xf32, #tpu.memory_space<vmem>>, %arg2: memref<32x2xf32, #tpu.memory_space<vmem>>, %arg3: memref<2x32x256xf32, #tpu.memory_space<vmem>>, %arg4: memref<2x32x256xf32, #tpu.memory_space<vmem>>) attributes {dimension_semantics = [#tpu.dimension_semantics<parallel>], iteration_bounds = array<i64: 1>, scalar_prefetch = 0 : i64, scratch_operands = 0 : i64, tpu.core_type = #tpu.core_type<tc>, window_params = [{transform_indices = @transform_0, window_bounds = array<i64: 2, 32, 256>}, {pipeline_mode = #tpu.pipeline_mode<synchronous>, transform_indices = @transform_1, window_bounds = array<i64: 32, 2>}, {transform_indices = @transform_2, window_bounds = array<i64: 2, 32, 256>}, {transform_indices = @transform_3, window_bounds = array<i64: 2, 32, 256>}]} {
    %c0 = arith.constant 0 : index
    %c0_0 = arith.constant 0 : index
    %0 = vector.load %arg2[%c0, %c0_0] : memref<32x2xf32, #tpu.memory_space<vmem>>, vector<32x1xf32>
    %1 = vector.shape_cast %0 : vector<32x1xf32> to vector<1x32x1xf32>
    %c0_1 = arith.constant 0 : index
    %c1 = arith.constant 1 : index
    %2 = vector.load %arg2[%c0_1, %c1] : memref<32x2xf32, #tpu.memory_space<vmem>>, vector<32x1xf32>
    %3 = vector.shape_cast %2 : vector<32x1xf32> to vector<1x32x1xf32>
    %c0_2 = arith.constant 0 : index
    %c0_3 = arith.constant 0 : index
    %c0_4 = arith.constant 0 : index
    %4 = vector.load %arg1[%c0_2, %c0_3, %c0_4] : memref<2x32x256xf32, #tpu.memory_space<vmem>>, vector<2x32x256xf32>
    %5 = vector.broadcast %1 : vector<1x32x1xf32> to vector<2x32x256xf32>
    %6 = arith.mulf %4, %5 : vector<2x32x256xf32>
    %7 = vector.broadcast %3 : vector<1x32x1xf32> to vector<2x32x256xf32>
    %8 = arith.addf %6, %7 : vector<2x32x256xf32>
    %c0_5 = arith.constant 0 : index
    %c0_6 = arith.constant 0 : index
    %c0_7 = arith.constant 0 : index
    %9 = vector.load %arg3[%c0_5, %c0_6, %c0_7] : memref<2x32x256xf32, #tpu.memory_space<vmem>>, vector<2x32x256xf32>
    %10 = arith.addf %8, %9 : vector<2x32x256xf32>
    %cst = arith.constant 0.000000e+00 : f32
    %11 = vector.broadcast %cst : f32 to vector<2x32x256xf32>
    %12 = arith.maximumf %10, %11 : vector<2x32x256xf32>
    %c0_8 = arith.constant 0 : index
    %c0_9 = arith.constant 0 : index
    %c0_10 = arith.constant 0 : index
    %13 = vector.load %arg4[%c0_8, %c0_9, %c0_10] : memref<2x32x256xf32, #tpu.memory_space<vmem>>, vector<2x32x256xf32>
    tpu.vector_store %arg4[%c0_8, %c0_9, %c0_10], %12 {strides = array<i32>} : memref<2x32x256xf32, #tpu.memory_space<vmem>>, vector<2x32x256xf32>,
    return
  }
  func.func @transform_0(%arg0: i32) -> (i32, i32, i32) {
    %c0_i32 = arith.constant 0 : i32
    %c0_i32_0 = arith.constant 0 : i32
    %c0_i32_1 = arith.constant 0 : i32
    return %arg0, %c0_i32, %c0_i32_0 : i32, i32, i32
  }
  func.func @transform_1(%arg0: i32) -> (i32, i32) {
    %c0_i32 = arith.constant 0 : i32
    %c0_i32_0 = arith.constant 0 : i32
    %c0_i32_1 = arith.constant 0 : i32
    return %c0_i32, %c0_i32_0 : i32, i32
  }
  func.func @transform_2(%arg0: i32) -> (i32, i32, i32) {
    %c0_i32 = arith.constant 0 : i32
    %c0_i32_0 = arith.constant 0 : i32
    %c0_i32_1 = arith.constant 0 : i32
    return %arg0, %c0_i32, %c0_i32_0 : i32, i32, i32
  }
  func.func @transform_3(%arg0: i32) -> (i32, i32, i32) {
    %c0_i32 = arith.constant 0 : i32
    %c0_i32_0 = arith.constant 0 : i32
    %c0_i32_1 = arith.constant 0 : i32
    return %arg0, %c0_i32, %c0_i32_0 : i32, i32, i32
  }
}

module attributes {stable_mosaic.version = 11 : i64} {
  func.func @_bottleneck_fused_kernel(%arg0: i32, %arg1: memref<2x32x256xf32, #tpu.memory_space<vmem>>, %arg2: memref<8x32xf32, #tpu.memory_space<vmem>>, %arg3: memref<8x72xf32, #tpu.memory_space<vmem>>, %arg4: memref<32x8xf32, #tpu.memory_space<vmem>>, %arg5: memref<9x1x256xf32, #tpu.memory_space<vmem>>, %arg6: memref<8x3xf32, #tpu.memory_space<vmem>>, %arg7: memref<8x3xf32, #tpu.memory_space<vmem>>, %arg8: memref<2x32x256xf32, #tpu.memory_space<vmem>>, %arg9: memref<1x32x1xf32, #tpu.memory_space<vmem>>, %arg10: memref<1x32x1xf32, #tpu.memory_space<vmem>>, %arg11: memref<72x256xf32, #tpu.memory_space<vmem>>) attributes {dimension_semantics = [#tpu.dimension_semantics<parallel>], iteration_bounds = array<i64: 1>, scalar_prefetch = 0 : i64, scratch_operands = 1 : i64, tpu.core_type = #tpu.core_type<tc>, window_params = [{transform_indices = @transform_0, window_bounds = array<i64: 2, 32, 256>}, {pipeline_mode = #tpu.pipeline_mode<synchronous>, transform_indices = @transform_1, window_bounds = array<i64: 8, 32>}, {pipeline_mode = #tpu.pipeline_mode<synchronous>, transform_indices = @transform_2, window_bounds = array<i64: 8, 72>}, {pipeline_mode = #tpu.pipeline_mode<synchronous>, transform_indices = @transform_3, window_bounds = array<i64: 32, 8>}, {pipeline_mode = #tpu.pipeline_mode<synchronous>, transform_indices = @transform_4, window_bounds = array<i64: 9, 1, 256>}, {pipeline_mode = #tpu.pipeline_mode<synchronous>, transform_indices = @transform_5, window_bounds = array<i64: 8, 3>}, {pipeline_mode = #tpu.pipeline_mode<synchronous>, transform_indices = @transform_6, window_bounds = array<i64: 8, 3>}, {transform_indices = @transform_7, window_bounds = array<i64: 2, 32, 256>}, {transform_indices = @transform_8, window_bounds = array<i64: 1, 32, 1>}, {transform_indices = @transform_9, window_bounds = array<i64: 1, 32, 1>}]} {
    %c0 = arith.constant 0 : index
    %c0_0 = arith.constant 0 : index
    %0 = vector.load %arg6[%c0, %c0_0] : memref<8x3xf32, #tpu.memory_space<vmem>>, vector<8x1xf32>
    %c0_1 = arith.constant 0 : index
    %c1 = arith.constant 1 : index
    %1 = vector.load %arg6[%c0_1, %c1] : memref<8x3xf32, #tpu.memory_space<vmem>>, vector<8x1xf32>
    %c0_2 = arith.constant 0 : index
    %c2 = arith.constant 2 : index
    %2 = vector.load %arg6[%c0_2, %c2] : memref<8x3xf32, #tpu.memory_space<vmem>>, vector<8x1xf32>
    %c0_3 = arith.constant 0 : index
    %c0_4 = arith.constant 0 : index
    %3 = vector.load %arg7[%c0_3, %c0_4] : memref<8x3xf32, #tpu.memory_space<vmem>>, vector<8x1xf32>
    %c0_5 = arith.constant 0 : index
    %c1_6 = arith.constant 1 : index
    %4 = vector.load %arg7[%c0_5, %c1_6] : memref<8x3xf32, #tpu.memory_space<vmem>>, vector<8x1xf32>
    %c0_7 = arith.constant 0 : index
    %c2_8 = arith.constant 2 : index
    %5 = vector.load %arg7[%c0_7, %c2_8] : memref<8x3xf32, #tpu.memory_space<vmem>>, vector<8x1xf32>
    %cst = arith.constant 0.000000e+00 : f32
    %6 = vector.broadcast %cst : f32 to vector<32x1xf32>
    %cst_9 = arith.constant 0.000000e+00 : f32
    %7 = vector.broadcast %cst_9 : f32 to vector<32x1xf32>
    %c0_10 = arith.constant 0 : index
    %c0_11 = arith.constant 0 : index
    %c0_12 = arith.constant 0 : index
    %8 = vector.load %arg1[%c0_10, %c0_11, %c0_12] : memref<2x32x256xf32, #tpu.memory_space<vmem>>, vector<1x32x256xf32>
    %9 = vector.shape_cast %8 : vector<1x32x256xf32> to vector<32x256xf32>
    %c0_13 = arith.constant 0 : index
    %c0_14 = arith.constant 0 : index
    %10 = vector.load %arg2[%c0_13, %c0_14] : memref<8x32xf32, #tpu.memory_space<vmem>>, vector<8x32xf32>
    %cst_15 = arith.constant dense<0.000000e+00> : vector<8x256xf32>
    %11 = tpu.matmul %10, %9, %cst_15 {dimension_numbers = #tpu.dot_dimension_numbers<[1], [0], [0], [1], [0, 0, 1, 1], [], []>} : vector<8x32xf32>, vector<32x256xf32>, vector<8x256xf32> -> vector<8x256xf32>
    %cst_16 = arith.constant dense<0.000000e+00> : vector<8xf32>
    %12 = vector.multi_reduction <add>, %11, %cst_16 [1] : vector<8x256xf32> to vector<8xf32>
    %13 = vector.shape_cast %12 : vector<8xf32> to vector<8x1xf32>
    %14 = arith.mulf %11, %11 : vector<8x256xf32>
    %cst_17 = arith.constant dense<0.000000e+00> : vector<8xf32>
    %15 = vector.multi_reduction <add>, %14, %cst_17 [1] : vector<8x256xf32> to vector<8xf32>
    %16 = vector.shape_cast %15 : vector<8xf32> to vector<8x1xf32>
    %17 = tpu.iota {dimensions = array<i32: 0>} : vector<8x1xi32>
    %cst_18 = arith.constant 0.000000e+00 : f32
    %18 = vector.broadcast %cst_18 : f32 to vector<8x1xf32>
    %c0_i32 = arith.constant 0 : i32
    %19 = vector.broadcast %c0_i32 : i32 to vector<8x1xi32>
    %20 = arith.cmpi sge, %17, %19 : vector<8x1xi32>
    %c2_i32 = arith.constant 2 : i32
    %21 = vector.broadcast %c2_i32 : i32 to vector<8x1xi32>
    %22 = arith.cmpi slt, %17, %21 : vector<8x1xi32>
    %23 = arith.andi %20, %22 : vector<8x1xi1>
    %24 = arith.extui %23 : vector<8x1xi1> to vector<8x1xi32>
    %25 = arith.sitofp %24 : vector<8x1xi32> to vector<8x1xf32>
    %26 = arith.mulf %13, %25 : vector<8x1xf32>
    %27 = vector.shape_cast %26 : vector<8x1xf32> to vector<1x8x1xf32>
    %cst_19 = arith.constant dense<0.000000e+00> : vector<1xf32>
    %28 = vector.multi_reduction <add>, %27, %cst_19 [1, 2] : vector<1x8x1xf32> to vector<1xf32>
    %29 = vector.shape_cast %28 : vector<1xf32> to vector<1x1x1xf32>
    %30 = vector.extract %29[0, 0, 0] : f32 from vector<1x1x1xf32>
    %31 = arith.mulf %16, %25 : vector<8x1xf32>
    %32 = vector.shape_cast %31 : vector<8x1xf32> to vector<1x8x1xf32>
    %cst_20 = arith.constant dense<0.000000e+00> : vector<1xf32>
    %33 = vector.multi_reduction <add>, %32, %cst_20 [1, 2] : vector<1x8x1xf32> to vector<1xf32>
    %34 = vector.shape_cast %33 : vector<1xf32> to vector<1x1x1xf32>
    %35 = vector.extract %34[0, 0, 0] : f32 from vector<1x1x1xf32>
    %cst_21 = arith.constant 5.120000e+02 : f32
    %36 = arith.divf %30, %cst_21 : f32
    %37 = arith.mulf %30, %36 : f32
    %38 = arith.subf %35, %37 : f32
    %cst_22 = arith.constant 5.110000e+02 : f32
    %39 = arith.divf %38, %cst_22 : f32
    %cst_23 = arith.constant 9.99999974E-6 : f32
    %40 = arith.addf %39, %cst_23 : f32
    %41 = math.rsqrt %40 : f32
    %42 = vector.broadcast %41 : f32 to vector<8x1xf32>
    %43 = arith.mulf %25, %42 : vector<8x1xf32>
    %44 = arith.addf %18, %43 : vector<8x1xf32>
    %c2_i32_24 = arith.constant 2 : i32
    %45 = vector.broadcast %c2_i32_24 : i32 to vector<8x1xi32>
    %46 = arith.cmpi sge, %17, %45 : vector<8x1xi32>
    %c4_i32 = arith.constant 4 : i32
    %47 = vector.broadcast %c4_i32 : i32 to vector<8x1xi32>
    %48 = arith.cmpi slt, %17, %47 : vector<8x1xi32>
    %49 = arith.andi %46, %48 : vector<8x1xi1>
    %50 = arith.extui %49 : vector<8x1xi1> to vector<8x1xi32>
    %51 = arith.sitofp %50 : vector<8x1xi32> to vector<8x1xf32>
    %52 = arith.mulf %13, %51 : vector<8x1xf32>
    %53 = vector.shape_cast %52 : vector<8x1xf32> to vector<1x8x1xf32>
    %cst_25 = arith.constant dense<0.000000e+00> : vector<1xf32>
    %54 = vector.multi_reduction <add>, %53, %cst_25 [1, 2] : vector<1x8x1xf32> to vector<1xf32>
    %55 = vector.shape_cast %54 : vector<1xf32> to vector<1x1x1xf32>
    %56 = vector.extract %55[0, 0, 0] : f32 from vector<1x1x1xf32>
    %57 = arith.mulf %16, %51 : vector<8x1xf32>
    %58 = vector.shape_cast %57 : vector<8x1xf32> to vector<1x8x1xf32>
    %cst_26 = arith.constant dense<0.000000e+00> : vector<1xf32>
    %59 = vector.multi_reduction <add>, %58, %cst_26 [1, 2] : vector<1x8x1xf32> to vector<1xf32>
    %60 = vector.shape_cast %59 : vector<1xf32> to vector<1x1x1xf32>
    %61 = vector.extract %60[0, 0, 0] : f32 from vector<1x1x1xf32>
    %cst_27 = arith.constant 5.120000e+02 : f32
    %62 = arith.divf %56, %cst_27 : f32
    %63 = arith.mulf %56, %62 : f32
    %64 = arith.subf %61, %63 : f32
    %cst_28 = arith.constant 5.110000e+02 : f32
    %65 = arith.divf %64, %cst_28 : f32
    %cst_29 = arith.constant 9.99999974E-6 : f32
    %66 = arith.addf %65, %cst_29 : f32
    %67 = math.rsqrt %66 : f32
    %68 = vector.broadcast %67 : f32 to vector<8x1xf32>
    %69 = arith.mulf %51, %68 : vector<8x1xf32>
    %70 = arith.addf %44, %69 : vector<8x1xf32>
    %c4_i32_30 = arith.constant 4 : i32
    %71 = vector.broadcast %c4_i32_30 : i32 to vector<8x1xi32>
    %72 = arith.cmpi sge, %17, %71 : vector<8x1xi32>
    %c6_i32 = arith.constant 6 : i32
    %73 = vector.broadcast %c6_i32 : i32 to vector<8x1xi32>
    %74 = arith.cmpi slt, %17, %73 : vector<8x1xi32>
    %75 = arith.andi %72, %74 : vector<8x1xi1>
    %76 = arith.extui %75 : vector<8x1xi1> to vector<8x1xi32>
    %77 = arith.sitofp %76 : vector<8x1xi32> to vector<8x1xf32>
    %78 = arith.mulf %13, %77 : vector<8x1xf32>
    %79 = vector.shape_cast %78 : vector<8x1xf32> to vector<1x8x1xf32>
    %cst_31 = arith.constant dense<0.000000e+00> : vector<1xf32>
    %80 = vector.multi_reduction <add>, %79, %cst_31 [1, 2] : vector<1x8x1xf32> to vector<1xf32>
    %81 = vector.shape_cast %80 : vector<1xf32> to vector<1x1x1xf32>
    %82 = vector.extract %81[0, 0, 0] : f32 from vector<1x1x1xf32>
    %83 = arith.mulf %16, %77 : vector<8x1xf32>
    %84 = vector.shape_cast %83 : vector<8x1xf32> to vector<1x8x1xf32>
    %cst_32 = arith.constant dense<0.000000e+00> : vector<1xf32>
    %85 = vector.multi_reduction <add>, %84, %cst_32 [1, 2] : vector<1x8x1xf32> to vector<1xf32>
    %86 = vector.shape_cast %85 : vector<1xf32> to vector<1x1x1xf32>
    %87 = vector.extract %86[0, 0, 0] : f32 from vector<1x1x1xf32>
    %cst_33 = arith.constant 5.120000e+02 : f32
    %88 = arith.divf %82, %cst_33 : f32
    %89 = arith.mulf %82, %88 : f32
    %90 = arith.subf %87, %89 : f32
    %cst_34 = arith.constant 5.110000e+02 : f32
    %91 = arith.divf %90, %cst_34 : f32
    %cst_35 = arith.constant 9.99999974E-6 : f32
    %92 = arith.addf %91, %cst_35 : f32
    %93 = math.rsqrt %92 : f32
    %94 = vector.broadcast %93 : f32 to vector<8x1xf32>
    %95 = arith.mulf %77, %94 : vector<8x1xf32>
    %96 = arith.addf %70, %95 : vector<8x1xf32>
    %c6_i32_36 = arith.constant 6 : i32
    %97 = vector.broadcast %c6_i32_36 : i32 to vector<8x1xi32>
    %98 = arith.cmpi sge, %17, %97 : vector<8x1xi32>
    %c8_i32 = arith.constant 8 : i32
    %99 = vector.broadcast %c8_i32 : i32 to vector<8x1xi32>
    %100 = arith.cmpi slt, %17, %99 : vector<8x1xi32>
    %101 = arith.andi %98, %100 : vector<8x1xi1>
    %102 = arith.extui %101 : vector<8x1xi1> to vector<8x1xi32>
    %103 = arith.sitofp %102 : vector<8x1xi32> to vector<8x1xf32>
    %104 = arith.mulf %13, %103 : vector<8x1xf32>
    %105 = vector.shape_cast %104 : vector<8x1xf32> to vector<1x8x1xf32>
    %cst_37 = arith.constant dense<0.000000e+00> : vector<1xf32>
    %106 = vector.multi_reduction <add>, %105, %cst_37 [1, 2] : vector<1x8x1xf32> to vector<1xf32>
    %107 = vector.shape_cast %106 : vector<1xf32> to vector<1x1x1xf32>
    %108 = vector.extract %107[0, 0, 0] : f32 from vector<1x1x1xf32>
    %109 = arith.mulf %16, %103 : vector<8x1xf32>
    %110 = vector.shape_cast %109 : vector<8x1xf32> to vector<1x8x1xf32>
    %cst_38 = arith.constant dense<0.000000e+00> : vector<1xf32>
    %111 = vector.multi_reduction <add>, %110, %cst_38 [1, 2] : vector<1x8x1xf32> to vector<1xf32>
    %112 = vector.shape_cast %111 : vector<1xf32> to vector<1x1x1xf32>
    %113 = vector.extract %112[0, 0, 0] : f32 from vector<1x1x1xf32>
    %cst_39 = arith.constant 5.120000e+02 : f32
    %114 = arith.divf %108, %cst_39 : f32
    %115 = arith.mulf %108, %114 : f32
    %116 = arith.subf %113, %115 : f32
    %cst_40 = arith.constant 5.110000e+02 : f32
    %117 = arith.divf %116, %cst_40 : f32
    %cst_41 = arith.constant 9.99999974E-6 : f32
    %118 = arith.addf %117, %cst_41 : f32
    %119 = math.rsqrt %118 : f32
    %120 = vector.broadcast %119 : f32 to vector<8x1xf32>
    %121 = arith.mulf %103, %120 : vector<8x1xf32>
    %122 = arith.addf %96, %121 : vector<8x1xf32>
    %123 = arith.mulf %122, %0 : vector<8x1xf32>
    %124 = vector.broadcast %2 : vector<8x1xf32> to vector<8x256xf32>
    %125 = arith.mulf %124, %11 : vector<8x256xf32>
    %126 = arith.negf %125 : vector<8x256xf32>
    %127 = math.exp %126 : vector<8x256xf32>
    %cst_42 = arith.constant 1.000000e+00 : f32
    %128 = vector.broadcast %cst_42 : f32 to vector<8x256xf32>
    %129 = arith.addf %128, %127 : vector<8x256xf32>
    %130 = arith.divf %128, %129 : vector<8x256xf32>
    %131 = arith.mulf %11, %130 : vector<8x256xf32>
    %132 = vector.broadcast %123 : vector<8x1xf32> to vector<8x256xf32>
    %133 = arith.mulf %131, %132 : vector<8x256xf32>
    %134 = vector.broadcast %1 : vector<8x1xf32> to vector<8x256xf32>
    %135 = arith.addf %133, %134 : vector<8x256xf32>
    %cst_43 = arith.constant 0.000000e+00 : f32
    %136 = vector.broadcast %cst_43 : f32 to vector<8x256xf32>
    %137 = arith.maximumf %135, %136 : vector<8x256xf32>
    %c17_i32 = arith.constant 17 : i32
    %138 = tpu.dynamic_rotate %137 by %c17_i32 dim 1 : vector<8x256xf32>, i32 -> vector<8x256xf32>
    %c0_44 = arith.constant 0 : index
    %c0_45 = arith.constant 0 : index
    %c0_46 = arith.constant 0 : index
    %139 = vector.load %arg5[%c0_44, %c0_45, %c0_46] : memref<9x1x256xf32, #tpu.memory_space<vmem>>, vector<1x1x256xf32>
    %140 = vector.shape_cast %139 : vector<1x1x256xf32> to vector<1x256xf32>
    %141 = vector.broadcast %140 : vector<1x256xf32> to vector<8x256xf32>
    %142 = arith.mulf %138, %141 : vector<8x256xf32>
    %c0_47 = arith.constant 0 : index
    %c0_48 = arith.constant 0 : index
    %143 = vector.load %arg11[%c0_47, %c0_48] : memref<72x256xf32, #tpu.memory_space<vmem>>, vector<8x256xf32>
    tpu.vector_store %arg11[%c0_47, %c0_48], %142 {strides = array<i32>} : memref<72x256xf32, #tpu.memory_space<vmem>>, vector<8x256xf32>,
    %c16_i32 = arith.constant 16 : i32
    %144 = tpu.dynamic_rotate %137 by %c16_i32 dim 1 : vector<8x256xf32>, i32 -> vector<8x256xf32>
    %c1_49 = arith.constant 1 : index
    %c0_50 = arith.constant 0 : index
    %c0_51 = arith.constant 0 : index
    %145 = vector.load %arg5[%c1_49, %c0_50, %c0_51] : memref<9x1x256xf32, #tpu.memory_space<vmem>>, vector<1x1x256xf32>
    %146 = vector.shape_cast %145 : vector<1x1x256xf32> to vector<1x256xf32>
    %147 = vector.broadcast %146 : vector<1x256xf32> to vector<8x256xf32>
    %148 = arith.mulf %144, %147 : vector<8x256xf32>
    %c8 = arith.constant 8 : index
    %c0_52 = arith.constant 0 : index
    %149 = vector.load %arg11[%c8, %c0_52] : memref<72x256xf32, #tpu.memory_space<vmem>>, vector<8x256xf32>
    tpu.vector_store %arg11[%c8, %c0_52], %148 {strides = array<i32>} : memref<72x256xf32, #tpu.memory_space<vmem>>, vector<8x256xf32>,
    %c15_i32 = arith.constant 15 : i32
    %150 = tpu.dynamic_rotate %137 by %c15_i32 dim 1 : vector<8x256xf32>, i32 -> vector<8x256xf32>
    %c2_53 = arith.constant 2 : index
    %c0_54 = arith.constant 0 : index
    %c0_55 = arith.constant 0 : index
    %151 = vector.load %arg5[%c2_53, %c0_54, %c0_55] : memref<9x1x256xf32, #tpu.memory_space<vmem>>, vector<1x1x256xf32>
    %152 = vector.shape_cast %151 : vector<1x1x256xf32> to vector<1x256xf32>
    %153 = vector.broadcast %152 : vector<1x256xf32> to vector<8x256xf32>
    %154 = arith.mulf %150, %153 : vector<8x256xf32>
    %c16 = arith.constant 16 : index
    %c0_56 = arith.constant 0 : index
    %155 = vector.load %arg11[%c16, %c0_56] : memref<72x256xf32, #tpu.memory_space<vmem>>, vector<8x256xf32>
    tpu.vector_store %arg11[%c16, %c0_56], %154 {strides = array<i32>} : memref<72x256xf32, #tpu.memory_space<vmem>>, vector<8x256xf32>,
    %c1_i32 = arith.constant 1 : i32
    %156 = tpu.dynamic_rotate %137 by %c1_i32 dim 1 : vector<8x256xf32>, i32 -> vector<8x256xf32>
    %c3 = arith.constant 3 : index
    %c0_57 = arith.constant 0 : index
    %c0_58 = arith.constant 0 : index
    %157 = vector.load %arg5[%c3, %c0_57, %c0_58] : memref<9x1x256xf32, #tpu.memory_space<vmem>>, vector<1x1x256xf32>
    %158 = vector.shape_cast %157 : vector<1x1x256xf32> to vector<1x256xf32>
    %159 = vector.broadcast %158 : vector<1x256xf32> to vector<8x256xf32>
    %160 = arith.mulf %156, %159 : vector<8x256xf32>
    %c24 = arith.constant 24 : index
    %c0_59 = arith.constant 0 : index
    %161 = vector.load %arg11[%c24, %c0_59] : memref<72x256xf32, #tpu.memory_space<vmem>>, vector<8x256xf32>
    tpu.vector_store %arg11[%c24, %c0_59], %160 {strides = array<i32>} : memref<72x256xf32, #tpu.memory_space<vmem>>, vector<8x256xf32>,
    %c4 = arith.constant 4 : index
    %c0_60 = arith.constant 0 : index
    %c0_61 = arith.constant 0 : index
    %162 = vector.load %arg5[%c4, %c0_60, %c0_61] : memref<9x1x256xf32, #tpu.memory_space<vmem>>, vector<1x1x256xf32>
    %163 = vector.shape_cast %162 : vector<1x1x256xf32> to vector<1x256xf32>
    %164 = vector.broadcast %163 : vector<1x256xf32> to vector<8x256xf32>
    %165 = arith.mulf %137, %164 : vector<8x256xf32>
    %c32 = arith.constant 32 : index
    %c0_62 = arith.constant 0 : index
    %166 = vector.load %arg11[%c32, %c0_62] : memref<72x256xf32, #tpu.memory_space<vmem>>, vector<8x256xf32>
    tpu.vector_store %arg11[%c32, %c0_62], %165 {strides = array<i32>} : memref<72x256xf32, #tpu.memory_space<vmem>>, vector<8x256xf32>,
    %c255_i32 = arith.constant 255 : i32
    %167 = tpu.dynamic_rotate %137 by %c255_i32 dim 1 : vector<8x256xf32>, i32 -> vector<8x256xf32>
    %c5 = arith.constant 5 : index
    %c0_63 = arith.constant 0 : index
    %c0_64 = arith.constant 0 : index
    %168 = vector.load %arg5[%c5, %c0_63, %c0_64] : memref<9x1x256xf32, #tpu.memory_space<vmem>>, vector<1x1x256xf32>
    %169 = vector.shape_cast %168 : vector<1x1x256xf32> to vector<1x256xf32>
    %170 = vector.broadcast %169 : vector<1x256xf32> to vector<8x256xf32>
    %171 = arith.mulf %167, %170 : vector<8x256xf32>
    %c40 = arith.constant 40 : index
    %c0_65 = arith.constant 0 : index
    %172 = vector.load %arg11[%c40, %c0_65] : memref<72x256xf32, #tpu.memory_space<vmem>>, vector<8x256xf32>
    tpu.vector_store %arg11[%c40, %c0_65], %171 {strides = array<i32>} : memref<72x256xf32, #tpu.memory_space<vmem>>, vector<8x256xf32>,
    %c241_i32 = arith.constant 241 : i32
    %173 = tpu.dynamic_rotate %137 by %c241_i32 dim 1 : vector<8x256xf32>, i32 -> vector<8x256xf32>
    %c6 = arith.constant 6 : index
    %c0_66 = arith.constant 0 : index
    %c0_67 = arith.constant 0 : index
    %174 = vector.load %arg5[%c6, %c0_66, %c0_67] : memref<9x1x256xf32, #tpu.memory_space<vmem>>, vector<1x1x256xf32>
    %175 = vector.shape_cast %174 : vector<1x1x256xf32> to vector<1x256xf32>
    %176 = vector.broadcast %175 : vector<1x256xf32> to vector<8x256xf32>
    %177 = arith.mulf %173, %176 : vector<8x256xf32>
    %c48 = arith.constant 48 : index
    %c0_68 = arith.constant 0 : index
    %178 = vector.load %arg11[%c48, %c0_68] : memref<72x256xf32, #tpu.memory_space<vmem>>, vector<8x256xf32>
    tpu.vector_store %arg11[%c48, %c0_68], %177 {strides = array<i32>} : memref<72x256xf32, #tpu.memory_space<vmem>>, vector<8x256xf32>,
    %c240_i32 = arith.constant 240 : i32
    %179 = tpu.dynamic_rotate %137 by %c240_i32 dim 1 : vector<8x256xf32>, i32 -> vector<8x256xf32>
    %c7 = arith.constant 7 : index
    %c0_69 = arith.constant 0 : index
    %c0_70 = arith.constant 0 : index
    %180 = vector.load %arg5[%c7, %c0_69, %c0_70] : memref<9x1x256xf32, #tpu.memory_space<vmem>>, vector<1x1x256xf32>
    %181 = vector.shape_cast %180 : vector<1x1x256xf32> to vector<1x256xf32>
    %182 = vector.broadcast %181 : vector<1x256xf32> to vector<8x256xf32>
    %183 = arith.mulf %179, %182 : vector<8x256xf32>
    %c56 = arith.constant 56 : index
    %c0_71 = arith.constant 0 : index
    %184 = vector.load %arg11[%c56, %c0_71] : memref<72x256xf32, #tpu.memory_space<vmem>>, vector<8x256xf32>
    tpu.vector_store %arg11[%c56, %c0_71], %183 {strides = array<i32>} : memref<72x256xf32, #tpu.memory_space<vmem>>, vector<8x256xf32>,
    %c239_i32 = arith.constant 239 : i32
    %185 = tpu.dynamic_rotate %137 by %c239_i32 dim 1 : vector<8x256xf32>, i32 -> vector<8x256xf32>
    %c8_72 = arith.constant 8 : index
    %c0_73 = arith.constant 0 : index
    %c0_74 = arith.constant 0 : index
    %186 = vector.load %arg5[%c8_72, %c0_73, %c0_74] : memref<9x1x256xf32, #tpu.memory_space<vmem>>, vector<1x1x256xf32>
    %187 = vector.shape_cast %186 : vector<1x1x256xf32> to vector<1x256xf32>
    %188 = vector.broadcast %187 : vector<1x256xf32> to vector<8x256xf32>
    %189 = arith.mulf %185, %188 : vector<8x256xf32>
    %c64 = arith.constant 64 : index
    %c0_75 = arith.constant 0 : index
    %190 = vector.load %arg11[%c64, %c0_75] : memref<72x256xf32, #tpu.memory_space<vmem>>, vector<8x256xf32>
    tpu.vector_store %arg11[%c64, %c0_75], %189 {strides = array<i32>} : memref<72x256xf32, #tpu.memory_space<vmem>>, vector<8x256xf32>,
    %c0_76 = arith.constant 0 : index
    %c0_77 = arith.constant 0 : index
    %191 = vector.load %arg3[%c0_76, %c0_77] : memref<8x72xf32, #tpu.memory_space<vmem>>, vector<8x72xf32>
    %c0_78 = arith.constant 0 : index
    %c0_79 = arith.constant 0 : index
    %192 = vector.load %arg11[%c0_78, %c0_79] : memref<72x256xf32, #tpu.memory_space<vmem>>, vector<72x256xf32>
    %cst_80 = arith.constant dense<0.000000e+00> : vector<8x256xf32>
    %193 = tpu.matmul %191, %192, %cst_80 {dimension_numbers = #tpu.dot_dimension_numbers<[1], [0], [0], [1], [0, 0, 1, 1], [], []>} : vector<8x72xf32>, vector<72x256xf32>, vector<8x256xf32> -> vector<8x256xf32>
    %cst_81 = arith.constant dense<0.000000e+00> : vector<8xf32>
    %194 = vector.multi_reduction <add>, %193, %cst_81 [1] : vector<8x256xf32> to vector<8xf32>
    %195 = vector.shape_cast %194 : vector<8xf32> to vector<8x1xf32>
    %196 = arith.mulf %193, %193 : vector<8x256xf32>
    %cst_82 = arith.constant dense<0.000000e+00> : vector<8xf32>
    %197 = vector.multi_reduction <add>, %196, %cst_82 [1] : vector<8x256xf32> to vector<8xf32>
    %198 = vector.shape_cast %197 : vector<8xf32> to vector<8x1xf32>
    %199 = tpu.iota {dimensions = array<i32: 0>} : vector<8x1xi32>
    %cst_83 = arith.constant 0.000000e+00 : f32
    %200 = vector.broadcast %cst_83 : f32 to vector<8x1xf32>
    %c0_i32_84 = arith.constant 0 : i32
    %201 = vector.broadcast %c0_i32_84 : i32 to vector<8x1xi32>
    %202 = arith.cmpi sge, %199, %201 : vector<8x1xi32>
    %c2_i32_85 = arith.constant 2 : i32
    %203 = vector.broadcast %c2_i32_85 : i32 to vector<8x1xi32>
    %204 = arith.cmpi slt, %199, %203 : vector<8x1xi32>
    %205 = arith.andi %202, %204 : vector<8x1xi1>
    %206 = arith.extui %205 : vector<8x1xi1> to vector<8x1xi32>
    %207 = arith.sitofp %206 : vector<8x1xi32> to vector<8x1xf32>
    %208 = arith.mulf %195, %207 : vector<8x1xf32>
    %209 = vector.shape_cast %208 : vector<8x1xf32> to vector<1x8x1xf32>
    %cst_86 = arith.constant dense<0.000000e+00> : vector<1xf32>
    %210 = vector.multi_reduction <add>, %209, %cst_86 [1, 2] : vector<1x8x1xf32> to vector<1xf32>
    %211 = vector.shape_cast %210 : vector<1xf32> to vector<1x1x1xf32>
    %212 = vector.extract %211[0, 0, 0] : f32 from vector<1x1x1xf32>
    %213 = arith.mulf %198, %207 : vector<8x1xf32>
    %214 = vector.shape_cast %213 : vector<8x1xf32> to vector<1x8x1xf32>
    %cst_87 = arith.constant dense<0.000000e+00> : vector<1xf32>
    %215 = vector.multi_reduction <add>, %214, %cst_87 [1, 2] : vector<1x8x1xf32> to vector<1xf32>
    %216 = vector.shape_cast %215 : vector<1xf32> to vector<1x1x1xf32>
    %217 = vector.extract %216[0, 0, 0] : f32 from vector<1x1x1xf32>
    %cst_88 = arith.constant 5.120000e+02 : f32
    %218 = arith.divf %212, %cst_88 : f32
    %219 = arith.mulf %212, %218 : f32
    %220 = arith.subf %217, %219 : f32
    %cst_89 = arith.constant 5.110000e+02 : f32
    %221 = arith.divf %220, %cst_89 : f32
    %cst_90 = arith.constant 9.99999974E-6 : f32
    %222 = arith.addf %221, %cst_90 : f32
    %223 = math.rsqrt %222 : f32
    %224 = vector.broadcast %223 : f32 to vector<8x1xf32>
    %225 = arith.mulf %207, %224 : vector<8x1xf32>
    %226 = arith.addf %200, %225 : vector<8x1xf32>
    %c2_i32_91 = arith.constant 2 : i32
    %227 = vector.broadcast %c2_i32_91 : i32 to vector<8x1xi32>
    %228 = arith.cmpi sge, %199, %227 : vector<8x1xi32>
    %c4_i32_92 = arith.constant 4 : i32
    %229 = vector.broadcast %c4_i32_92 : i32 to vector<8x1xi32>
    %230 = arith.cmpi slt, %199, %229 : vector<8x1xi32>
    %231 = arith.andi %228, %230 : vector<8x1xi1>
    %232 = arith.extui %231 : vector<8x1xi1> to vector<8x1xi32>
    %233 = arith.sitofp %232 : vector<8x1xi32> to vector<8x1xf32>
    %234 = arith.mulf %195, %233 : vector<8x1xf32>
    %235 = vector.shape_cast %234 : vector<8x1xf32> to vector<1x8x1xf32>
    %cst_93 = arith.constant dense<0.000000e+00> : vector<1xf32>
    %236 = vector.multi_reduction <add>, %235, %cst_93 [1, 2] : vector<1x8x1xf32> to vector<1xf32>
    %237 = vector.shape_cast %236 : vector<1xf32> to vector<1x1x1xf32>
    %238 = vector.extract %237[0, 0, 0] : f32 from vector<1x1x1xf32>
    %239 = arith.mulf %198, %233 : vector<8x1xf32>
    %240 = vector.shape_cast %239 : vector<8x1xf32> to vector<1x8x1xf32>
    %cst_94 = arith.constant dense<0.000000e+00> : vector<1xf32>
    %241 = vector.multi_reduction <add>, %240, %cst_94 [1, 2] : vector<1x8x1xf32> to vector<1xf32>
    %242 = vector.shape_cast %241 : vector<1xf32> to vector<1x1x1xf32>
    %243 = vector.extract %242[0, 0, 0] : f32 from vector<1x1x1xf32>
    %cst_95 = arith.constant 5.120000e+02 : f32
    %244 = arith.divf %238, %cst_95 : f32
    %245 = arith.mulf %238, %244 : f32
    %246 = arith.subf %243, %245 : f32
    %cst_96 = arith.constant 5.110000e+02 : f32
    %247 = arith.divf %246, %cst_96 : f32
    %cst_97 = arith.constant 9.99999974E-6 : f32
    %248 = arith.addf %247, %cst_97 : f32
    %249 = math.rsqrt %248 : f32
    %250 = vector.broadcast %249 : f32 to vector<8x1xf32>
    %251 = arith.mulf %233, %250 : vector<8x1xf32>
    %252 = arith.addf %226, %251 : vector<8x1xf32>
    %c4_i32_98 = arith.constant 4 : i32
    %253 = vector.broadcast %c4_i32_98 : i32 to vector<8x1xi32>
    %254 = arith.cmpi sge, %199, %253 : vector<8x1xi32>
    %c6_i32_99 = arith.constant 6 : i32
    %255 = vector.broadcast %c6_i32_99 : i32 to vector<8x1xi32>
    %256 = arith.cmpi slt, %199, %255 : vector<8x1xi32>
    %257 = arith.andi %254, %256 : vector<8x1xi1>
    %258 = arith.extui %257 : vector<8x1xi1> to vector<8x1xi32>
    %259 = arith.sitofp %258 : vector<8x1xi32> to vector<8x1xf32>
    %260 = arith.mulf %195, %259 : vector<8x1xf32>
    %261 = vector.shape_cast %260 : vector<8x1xf32> to vector<1x8x1xf32>
    %cst_100 = arith.constant dense<0.000000e+00> : vector<1xf32>
    %262 = vector.multi_reduction <add>, %261, %cst_100 [1, 2] : vector<1x8x1xf32> to vector<1xf32>
    %263 = vector.shape_cast %262 : vector<1xf32> to vector<1x1x1xf32>
    %264 = vector.extract %263[0, 0, 0] : f32 from vector<1x1x1xf32>
    %265 = arith.mulf %198, %259 : vector<8x1xf32>
    %266 = vector.shape_cast %265 : vector<8x1xf32> to vector<1x8x1xf32>
    %cst_101 = arith.constant dense<0.000000e+00> : vector<1xf32>
    %267 = vector.multi_reduction <add>, %266, %cst_101 [1, 2] : vector<1x8x1xf32> to vector<1xf32>
    %268 = vector.shape_cast %267 : vector<1xf32> to vector<1x1x1xf32>
    %269 = vector.extract %268[0, 0, 0] : f32 from vector<1x1x1xf32>
    %cst_102 = arith.constant 5.120000e+02 : f32
    %270 = arith.divf %264, %cst_102 : f32
    %271 = arith.mulf %264, %270 : f32
    %272 = arith.subf %269, %271 : f32
    %cst_103 = arith.constant 5.110000e+02 : f32
    %273 = arith.divf %272, %cst_103 : f32
    %cst_104 = arith.constant 9.99999974E-6 : f32
    %274 = arith.addf %273, %cst_104 : f32
    %275 = math.rsqrt %274 : f32
    %276 = vector.broadcast %275 : f32 to vector<8x1xf32>
    %277 = arith.mulf %259, %276 : vector<8x1xf32>
    %278 = arith.addf %252, %277 : vector<8x1xf32>
    %c6_i32_105 = arith.constant 6 : i32
    %279 = vector.broadcast %c6_i32_105 : i32 to vector<8x1xi32>
    %280 = arith.cmpi sge, %199, %279 : vector<8x1xi32>
    %c8_i32_106 = arith.constant 8 : i32
    %281 = vector.broadcast %c8_i32_106 : i32 to vector<8x1xi32>
    %282 = arith.cmpi slt, %199, %281 : vector<8x1xi32>
    %283 = arith.andi %280, %282 : vector<8x1xi1>
    %284 = arith.extui %283 : vector<8x1xi1> to vector<8x1xi32>
    %285 = arith.sitofp %284 : vector<8x1xi32> to vector<8x1xf32>
    %286 = arith.mulf %195, %285 : vector<8x1xf32>
    %287 = vector.shape_cast %286 : vector<8x1xf32> to vector<1x8x1xf32>
    %cst_107 = arith.constant dense<0.000000e+00> : vector<1xf32>
    %288 = vector.multi_reduction <add>, %287, %cst_107 [1, 2] : vector<1x8x1xf32> to vector<1xf32>
    %289 = vector.shape_cast %288 : vector<1xf32> to vector<1x1x1xf32>
    %290 = vector.extract %289[0, 0, 0] : f32 from vector<1x1x1xf32>
    %291 = arith.mulf %198, %285 : vector<8x1xf32>
    %292 = vector.shape_cast %291 : vector<8x1xf32> to vector<1x8x1xf32>
    %cst_108 = arith.constant dense<0.000000e+00> : vector<1xf32>
    %293 = vector.multi_reduction <add>, %292, %cst_108 [1, 2] : vector<1x8x1xf32> to vector<1xf32>
    %294 = vector.shape_cast %293 : vector<1xf32> to vector<1x1x1xf32>
    %295 = vector.extract %294[0, 0, 0] : f32 from vector<1x1x1xf32>
    %cst_109 = arith.constant 5.120000e+02 : f32
    %296 = arith.divf %290, %cst_109 : f32
    %297 = arith.mulf %290, %296 : f32
    %298 = arith.subf %295, %297 : f32
    %cst_110 = arith.constant 5.110000e+02 : f32
    %299 = arith.divf %298, %cst_110 : f32
    %cst_111 = arith.constant 9.99999974E-6 : f32
    %300 = arith.addf %299, %cst_111 : f32
    %301 = math.rsqrt %300 : f32
    %302 = vector.broadcast %301 : f32 to vector<8x1xf32>
    %303 = arith.mulf %285, %302 : vector<8x1xf32>
    %304 = arith.addf %278, %303 : vector<8x1xf32>
    %305 = arith.mulf %304, %3 : vector<8x1xf32>
    %306 = vector.broadcast %5 : vector<8x1xf32> to vector<8x256xf32>
    %307 = arith.mulf %306, %193 : vector<8x256xf32>
    %308 = arith.negf %307 : vector<8x256xf32>
    %309 = math.exp %308 : vector<8x256xf32>
    %cst_112 = arith.constant 1.000000e+00 : f32
    %310 = vector.broadcast %cst_112 : f32 to vector<8x256xf32>
    %311 = arith.addf %310, %309 : vector<8x256xf32>
    %312 = arith.divf %310, %311 : vector<8x256xf32>
    %313 = arith.mulf %193, %312 : vector<8x256xf32>
    %314 = vector.broadcast %305 : vector<8x1xf32> to vector<8x256xf32>
    %315 = arith.mulf %313, %314 : vector<8x256xf32>
    %316 = vector.broadcast %4 : vector<8x1xf32> to vector<8x256xf32>
    %317 = arith.addf %315, %316 : vector<8x256xf32>
    %cst_113 = arith.constant 0.000000e+00 : f32
    %318 = vector.broadcast %cst_113 : f32 to vector<8x256xf32>
    %319 = arith.maximumf %317, %318 : vector<8x256xf32>
    %c0_114 = arith.constant 0 : index
    %c0_115 = arith.constant 0 : index
    %320 = vector.load %arg4[%c0_114, %c0_115] : memref<32x8xf32, #tpu.memory_space<vmem>>, vector<32x8xf32>
    %cst_116 = arith.constant dense<0.000000e+00> : vector<32x256xf32>
    %321 = tpu.matmul %320, %319, %cst_116 {dimension_numbers = #tpu.dot_dimension_numbers<[1], [0], [0], [1], [0, 0, 1, 1], [], []>} : vector<32x8xf32>, vector<8x256xf32>, vector<32x256xf32> -> vector<32x256xf32>
    %c0_117 = arith.constant 0 : index
    %c0_118 = arith.constant 0 : index
    %c0_119 = arith.constant 0 : index
    %322 = vector.load %arg8[%c0_117, %c0_118, %c0_119] : memref<2x32x256xf32, #tpu.memory_space<vmem>>, vector<1x32x256xf32>
    %323 = vector.shape_cast %322 : vector<1x32x256xf32> to vector<32x256xf32>
    %324 = vector.shape_cast %321 : vector<32x256xf32> to vector<1x32x256xf32>
    tpu.vector_store %arg8[%c0_117, %c0_118, %c0_119], %324 {strides = array<i32>} : memref<2x32x256xf32, #tpu.memory_space<vmem>>, vector<1x32x256xf32>,
    %cst_120 = arith.constant dense<0.000000e+00> : vector<32xf32>
    %325 = vector.multi_reduction <add>, %321, %cst_120 [1] : vector<32x256xf32> to vector<32xf32>
    %326 = vector.shape_cast %325 : vector<32xf32> to vector<32x1xf32>
    %327 = arith.addf %6, %326 : vector<32x1xf32>
    %328 = arith.mulf %321, %321 : vector<32x256xf32>
    %cst_121 = arith.constant dense<0.000000e+00> : vector<32xf32>
    %329 = vector.multi_reduction <add>, %328, %cst_121 [1] : vector<32x256xf32> to vector<32xf32>
    %330 = vector.shape_cast %329 : vector<32xf32> to vector<32x1xf32>
    %331 = arith.addf %7, %330 : vector<32x1xf32>
    %c1_122 = arith.constant 1 : index
    %c0_123 = arith.constant 0 : index
    %c0_124 = arith.constant 0 : index
    %332 = vector.load %arg1[%c1_122, %c0_123, %c0_124] : memref<2x32x256xf32, #tpu.memory_space<vmem>>, vector<1x32x256xf32>
    %333 = vector.shape_cast %332 : vector<1x32x256xf32> to vector<32x256xf32>
    %c0_125 = arith.constant 0 : index
    %c0_126 = arith.constant 0 : index
    %334 = vector.load %arg2[%c0_125, %c0_126] : memref<8x32xf32, #tpu.memory_space<vmem>>, vector<8x32xf32>
    %cst_127 = arith.constant dense<0.000000e+00> : vector<8x256xf32>
    %335 = tpu.matmul %334, %333, %cst_127 {dimension_numbers = #tpu.dot_dimension_numbers<[1], [0], [0], [1], [0, 0, 1, 1], [], []>} : vector<8x32xf32>, vector<32x256xf32>, vector<8x256xf32> -> vector<8x256xf32>
    %cst_128 = arith.constant dense<0.000000e+00> : vector<8xf32>
    %336 = vector.multi_reduction <add>, %335, %cst_128 [1] : vector<8x256xf32> to vector<8xf32>
    %337 = vector.shape_cast %336 : vector<8xf32> to vector<8x1xf32>
    %338 = arith.mulf %335, %335 : vector<8x256xf32>
    %cst_129 = arith.constant dense<0.000000e+00> : vector<8xf32>
    %339 = vector.multi_reduction <add>, %338, %cst_129 [1] : vector<8x256xf32> to vector<8xf32>
    %340 = vector.shape_cast %339 : vector<8xf32> to vector<8x1xf32>
    %341 = tpu.iota {dimensions = array<i32: 0>} : vector<8x1xi32>
    %cst_130 = arith.constant 0.000000e+00 : f32
    %342 = vector.broadcast %cst_130 : f32 to vector<8x1xf32>
    %c0_i32_131 = arith.constant 0 : i32
    %343 = vector.broadcast %c0_i32_131 : i32 to vector<8x1xi32>
    %344 = arith.cmpi sge, %341, %343 : vector<8x1xi32>
    %c2_i32_132 = arith.constant 2 : i32
    %345 = vector.broadcast %c2_i32_132 : i32 to vector<8x1xi32>
    %346 = arith.cmpi slt, %341, %345 : vector<8x1xi32>
    %347 = arith.andi %344, %346 : vector<8x1xi1>
    %348 = arith.extui %347 : vector<8x1xi1> to vector<8x1xi32>
    %349 = arith.sitofp %348 : vector<8x1xi32> to vector<8x1xf32>
    %350 = arith.mulf %337, %349 : vector<8x1xf32>
    %351 = vector.shape_cast %350 : vector<8x1xf32> to vector<1x8x1xf32>
    %cst_133 = arith.constant dense<0.000000e+00> : vector<1xf32>
    %352 = vector.multi_reduction <add>, %351, %cst_133 [1, 2] : vector<1x8x1xf32> to vector<1xf32>
    %353 = vector.shape_cast %352 : vector<1xf32> to vector<1x1x1xf32>
    %354 = vector.extract %353[0, 0, 0] : f32 from vector<1x1x1xf32>
    %355 = arith.mulf %340, %349 : vector<8x1xf32>
    %356 = vector.shape_cast %355 : vector<8x1xf32> to vector<1x8x1xf32>
    %cst_134 = arith.constant dense<0.000000e+00> : vector<1xf32>
    %357 = vector.multi_reduction <add>, %356, %cst_134 [1, 2] : vector<1x8x1xf32> to vector<1xf32>
    %358 = vector.shape_cast %357 : vector<1xf32> to vector<1x1x1xf32>
    %359 = vector.extract %358[0, 0, 0] : f32 from vector<1x1x1xf32>
    %cst_135 = arith.constant 5.120000e+02 : f32
    %360 = arith.divf %354, %cst_135 : f32
    %361 = arith.mulf %354, %360 : f32
    %362 = arith.subf %359, %361 : f32
    %cst_136 = arith.constant 5.110000e+02 : f32
    %363 = arith.divf %362, %cst_136 : f32
    %cst_137 = arith.constant 9.99999974E-6 : f32
    %364 = arith.addf %363, %cst_137 : f32
    %365 = math.rsqrt %364 : f32
    %366 = vector.broadcast %365 : f32 to vector<8x1xf32>
    %367 = arith.mulf %349, %366 : vector<8x1xf32>
    %368 = arith.addf %342, %367 : vector<8x1xf32>
    %c2_i32_138 = arith.constant 2 : i32
    %369 = vector.broadcast %c2_i32_138 : i32 to vector<8x1xi32>
    %370 = arith.cmpi sge, %341, %369 : vector<8x1xi32>
    %c4_i32_139 = arith.constant 4 : i32
    %371 = vector.broadcast %c4_i32_139 : i32 to vector<8x1xi32>
    %372 = arith.cmpi slt, %341, %371 : vector<8x1xi32>
    %373 = arith.andi %370, %372 : vector<8x1xi1>
    %374 = arith.extui %373 : vector<8x1xi1> to vector<8x1xi32>
    %375 = arith.sitofp %374 : vector<8x1xi32> to vector<8x1xf32>
    %376 = arith.mulf %337, %375 : vector<8x1xf32>
    %377 = vector.shape_cast %376 : vector<8x1xf32> to vector<1x8x1xf32>
    %cst_140 = arith.constant dense<0.000000e+00> : vector<1xf32>
    %378 = vector.multi_reduction <add>, %377, %cst_140 [1, 2] : vector<1x8x1xf32> to vector<1xf32>
    %379 = vector.shape_cast %378 : vector<1xf32> to vector<1x1x1xf32>
    %380 = vector.extract %379[0, 0, 0] : f32 from vector<1x1x1xf32>
    %381 = arith.mulf %340, %375 : vector<8x1xf32>
    %382 = vector.shape_cast %381 : vector<8x1xf32> to vector<1x8x1xf32>
    %cst_141 = arith.constant dense<0.000000e+00> : vector<1xf32>
    %383 = vector.multi_reduction <add>, %382, %cst_141 [1, 2] : vector<1x8x1xf32> to vector<1xf32>
    %384 = vector.shape_cast %383 : vector<1xf32> to vector<1x1x1xf32>
    %385 = vector.extract %384[0, 0, 0] : f32 from vector<1x1x1xf32>
    %cst_142 = arith.constant 5.120000e+02 : f32
    %386 = arith.divf %380, %cst_142 : f32
    %387 = arith.mulf %380, %386 : f32
    %388 = arith.subf %385, %387 : f32
    %cst_143 = arith.constant 5.110000e+02 : f32
    %389 = arith.divf %388, %cst_143 : f32
    %cst_144 = arith.constant 9.99999974E-6 : f32
    %390 = arith.addf %389, %cst_144 : f32
    %391 = math.rsqrt %390 : f32
    %392 = vector.broadcast %391 : f32 to vector<8x1xf32>
    %393 = arith.mulf %375, %392 : vector<8x1xf32>
    %394 = arith.addf %368, %393 : vector<8x1xf32>
    %c4_i32_145 = arith.constant 4 : i32
    %395 = vector.broadcast %c4_i32_145 : i32 to vector<8x1xi32>
    %396 = arith.cmpi sge, %341, %395 : vector<8x1xi32>
    %c6_i32_146 = arith.constant 6 : i32
    %397 = vector.broadcast %c6_i32_146 : i32 to vector<8x1xi32>
    %398 = arith.cmpi slt, %341, %397 : vector<8x1xi32>
    %399 = arith.andi %396, %398 : vector<8x1xi1>
    %400 = arith.extui %399 : vector<8x1xi1> to vector<8x1xi32>
    %401 = arith.sitofp %400 : vector<8x1xi32> to vector<8x1xf32>
    %402 = arith.mulf %337, %401 : vector<8x1xf32>
    %403 = vector.shape_cast %402 : vector<8x1xf32> to vector<1x8x1xf32>
    %cst_147 = arith.constant dense<0.000000e+00> : vector<1xf32>
    %404 = vector.multi_reduction <add>, %403, %cst_147 [1, 2] : vector<1x8x1xf32> to vector<1xf32>
    %405 = vector.shape_cast %404 : vector<1xf32> to vector<1x1x1xf32>
    %406 = vector.extract %405[0, 0, 0] : f32 from vector<1x1x1xf32>
    %407 = arith.mulf %340, %401 : vector<8x1xf32>
    %408 = vector.shape_cast %407 : vector<8x1xf32> to vector<1x8x1xf32>
    %cst_148 = arith.constant dense<0.000000e+00> : vector<1xf32>
    %409 = vector.multi_reduction <add>, %408, %cst_148 [1, 2] : vector<1x8x1xf32> to vector<1xf32>
    %410 = vector.shape_cast %409 : vector<1xf32> to vector<1x1x1xf32>
    %411 = vector.extract %410[0, 0, 0] : f32 from vector<1x1x1xf32>
    %cst_149 = arith.constant 5.120000e+02 : f32
    %412 = arith.divf %406, %cst_149 : f32
    %413 = arith.mulf %406, %412 : f32
    %414 = arith.subf %411, %413 : f32
    %cst_150 = arith.constant 5.110000e+02 : f32
    %415 = arith.divf %414, %cst_150 : f32
    %cst_151 = arith.constant 9.99999974E-6 : f32
    %416 = arith.addf %415, %cst_151 : f32
    %417 = math.rsqrt %416 : f32
    %418 = vector.broadcast %417 : f32 to vector<8x1xf32>
    %419 = arith.mulf %401, %418 : vector<8x1xf32>
    %420 = arith.addf %394, %419 : vector<8x1xf32>
    %c6_i32_152 = arith.constant 6 : i32
    %421 = vector.broadcast %c6_i32_152 : i32 to vector<8x1xi32>
    %422 = arith.cmpi sge, %341, %421 : vector<8x1xi32>
    %c8_i32_153 = arith.constant 8 : i32
    %423 = vector.broadcast %c8_i32_153 : i32 to vector<8x1xi32>
    %424 = arith.cmpi slt, %341, %423 : vector<8x1xi32>
    %425 = arith.andi %422, %424 : vector<8x1xi1>
    %426 = arith.extui %425 : vector<8x1xi1> to vector<8x1xi32>
    %427 = arith.sitofp %426 : vector<8x1xi32> to vector<8x1xf32>
    %428 = arith.mulf %337, %427 : vector<8x1xf32>
    %429 = vector.shape_cast %428 : vector<8x1xf32> to vector<1x8x1xf32>
    %cst_154 = arith.constant dense<0.000000e+00> : vector<1xf32>
    %430 = vector.multi_reduction <add>, %429, %cst_154 [1, 2] : vector<1x8x1xf32> to vector<1xf32>
    %431 = vector.shape_cast %430 : vector<1xf32> to vector<1x1x1xf32>
    %432 = vector.extract %431[0, 0, 0] : f32 from vector<1x1x1xf32>
    %433 = arith.mulf %340, %427 : vector<8x1xf32>
    %434 = vector.shape_cast %433 : vector<8x1xf32> to vector<1x8x1xf32>
    %cst_155 = arith.constant dense<0.000000e+00> : vector<1xf32>
    %435 = vector.multi_reduction <add>, %434, %cst_155 [1, 2] : vector<1x8x1xf32> to vector<1xf32>
    %436 = vector.shape_cast %435 : vector<1xf32> to vector<1x1x1xf32>
    %437 = vector.extract %436[0, 0, 0] : f32 from vector<1x1x1xf32>
    %cst_156 = arith.constant 5.120000e+02 : f32
    %438 = arith.divf %432, %cst_156 : f32
    %439 = arith.mulf %432, %438 : f32
    %440 = arith.subf %437, %439 : f32
    %cst_157 = arith.constant 5.110000e+02 : f32
    %441 = arith.divf %440, %cst_157 : f32
    %cst_158 = arith.constant 9.99999974E-6 : f32
    %442 = arith.addf %441, %cst_158 : f32
    %443 = math.rsqrt %442 : f32
    %444 = vector.broadcast %443 : f32 to vector<8x1xf32>
    %445 = arith.mulf %427, %444 : vector<8x1xf32>
    %446 = arith.addf %420, %445 : vector<8x1xf32>
    %447 = arith.mulf %446, %0 : vector<8x1xf32>
    %448 = vector.broadcast %2 : vector<8x1xf32> to vector<8x256xf32>
    %449 = arith.mulf %448, %335 : vector<8x256xf32>
    %450 = arith.negf %449 : vector<8x256xf32>
    %451 = math.exp %450 : vector<8x256xf32>
    %cst_159 = arith.constant 1.000000e+00 : f32
    %452 = vector.broadcast %cst_159 : f32 to vector<8x256xf32>
    %453 = arith.addf %452, %451 : vector<8x256xf32>
    %454 = arith.divf %452, %453 : vector<8x256xf32>
    %455 = arith.mulf %335, %454 : vector<8x256xf32>
    %456 = vector.broadcast %447 : vector<8x1xf32> to vector<8x256xf32>
    %457 = arith.mulf %455, %456 : vector<8x256xf32>
    %458 = vector.broadcast %1 : vector<8x1xf32> to vector<8x256xf32>
    %459 = arith.addf %457, %458 : vector<8x256xf32>
    %cst_160 = arith.constant 0.000000e+00 : f32
    %460 = vector.broadcast %cst_160 : f32 to vector<8x256xf32>
    %461 = arith.maximumf %459, %460 : vector<8x256xf32>
    %c17_i32_161 = arith.constant 17 : i32
    %462 = tpu.dynamic_rotate %461 by %c17_i32_161 dim 1 : vector<8x256xf32>, i32 -> vector<8x256xf32>
    %c0_162 = arith.constant 0 : index
    %c0_163 = arith.constant 0 : index
    %c0_164 = arith.constant 0 : index
    %463 = vector.load %arg5[%c0_162, %c0_163, %c0_164] : memref<9x1x256xf32, #tpu.memory_space<vmem>>, vector<1x1x256xf32>
    %464 = vector.shape_cast %463 : vector<1x1x256xf32> to vector<1x256xf32>
    %465 = vector.broadcast %464 : vector<1x256xf32> to vector<8x256xf32>
    %466 = arith.mulf %462, %465 : vector<8x256xf32>
    %c0_165 = arith.constant 0 : index
    %c0_166 = arith.constant 0 : index
    %467 = vector.load %arg11[%c0_165, %c0_166] : memref<72x256xf32, #tpu.memory_space<vmem>>, vector<8x256xf32>
    tpu.vector_store %arg11[%c0_165, %c0_166], %466 {strides = array<i32>} : memref<72x256xf32, #tpu.memory_space<vmem>>, vector<8x256xf32>,
    %c16_i32_167 = arith.constant 16 : i32
    %468 = tpu.dynamic_rotate %461 by %c16_i32_167 dim 1 : vector<8x256xf32>, i32 -> vector<8x256xf32>
    %c1_168 = arith.constant 1 : index
    %c0_169 = arith.constant 0 : index
    %c0_170 = arith.constant 0 : index
    %469 = vector.load %arg5[%c1_168, %c0_169, %c0_170] : memref<9x1x256xf32, #tpu.memory_space<vmem>>, vector<1x1x256xf32>
    %470 = vector.shape_cast %469 : vector<1x1x256xf32> to vector<1x256xf32>
    %471 = vector.broadcast %470 : vector<1x256xf32> to vector<8x256xf32>
    %472 = arith.mulf %468, %471 : vector<8x256xf32>
    %c8_171 = arith.constant 8 : index
    %c0_172 = arith.constant 0 : index
    %473 = vector.load %arg11[%c8_171, %c0_172] : memref<72x256xf32, #tpu.memory_space<vmem>>, vector<8x256xf32>
    tpu.vector_store %arg11[%c8_171, %c0_172], %472 {strides = array<i32>} : memref<72x256xf32, #tpu.memory_space<vmem>>, vector<8x256xf32>,
    %c15_i32_173 = arith.constant 15 : i32
    %474 = tpu.dynamic_rotate %461 by %c15_i32_173 dim 1 : vector<8x256xf32>, i32 -> vector<8x256xf32>
    %c2_174 = arith.constant 2 : index
    %c0_175 = arith.constant 0 : index
    %c0_176 = arith.constant 0 : index
    %475 = vector.load %arg5[%c2_174, %c0_175, %c0_176] : memref<9x1x256xf32, #tpu.memory_space<vmem>>, vector<1x1x256xf32>
    %476 = vector.shape_cast %475 : vector<1x1x256xf32> to vector<1x256xf32>
    %477 = vector.broadcast %476 : vector<1x256xf32> to vector<8x256xf32>
    %478 = arith.mulf %474, %477 : vector<8x256xf32>
    %c16_177 = arith.constant 16 : index
    %c0_178 = arith.constant 0 : index
    %479 = vector.load %arg11[%c16_177, %c0_178] : memref<72x256xf32, #tpu.memory_space<vmem>>, vector<8x256xf32>
    tpu.vector_store %arg11[%c16_177, %c0_178], %478 {strides = array<i32>} : memref<72x256xf32, #tpu.memory_space<vmem>>, vector<8x256xf32>,
    %c1_i32_179 = arith.constant 1 : i32
    %480 = tpu.dynamic_rotate %461 by %c1_i32_179 dim 1 : vector<8x256xf32>, i32 -> vector<8x256xf32>
    %c3_180 = arith.constant 3 : index
    %c0_181 = arith.constant 0 : index
    %c0_182 = arith.constant 0 : index
    %481 = vector.load %arg5[%c3_180, %c0_181, %c0_182] : memref<9x1x256xf32, #tpu.memory_space<vmem>>, vector<1x1x256xf32>
    %482 = vector.shape_cast %481 : vector<1x1x256xf32> to vector<1x256xf32>
    %483 = vector.broadcast %482 : vector<1x256xf32> to vector<8x256xf32>
    %484 = arith.mulf %480, %483 : vector<8x256xf32>
    %c24_183 = arith.constant 24 : index
    %c0_184 = arith.constant 0 : index
    %485 = vector.load %arg11[%c24_183, %c0_184] : memref<72x256xf32, #tpu.memory_space<vmem>>, vector<8x256xf32>
    tpu.vector_store %arg11[%c24_183, %c0_184], %484 {strides = array<i32>} : memref<72x256xf32, #tpu.memory_space<vmem>>, vector<8x256xf32>,
    %c4_185 = arith.constant 4 : index
    %c0_186 = arith.constant 0 : index
    %c0_187 = arith.constant 0 : index
    %486 = vector.load %arg5[%c4_185, %c0_186, %c0_187] : memref<9x1x256xf32, #tpu.memory_space<vmem>>, vector<1x1x256xf32>
    %487 = vector.shape_cast %486 : vector<1x1x256xf32> to vector<1x256xf32>
    %488 = vector.broadcast %487 : vector<1x256xf32> to vector<8x256xf32>
    %489 = arith.mulf %461, %488 : vector<8x256xf32>
    %c32_188 = arith.constant 32 : index
    %c0_189 = arith.constant 0 : index
    %490 = vector.load %arg11[%c32_188, %c0_189] : memref<72x256xf32, #tpu.memory_space<vmem>>, vector<8x256xf32>
    tpu.vector_store %arg11[%c32_188, %c0_189], %489 {strides = array<i32>} : memref<72x256xf32, #tpu.memory_space<vmem>>, vector<8x256xf32>,
    %c255_i32_190 = arith.constant 255 : i32
    %491 = tpu.dynamic_rotate %461 by %c255_i32_190 dim 1 : vector<8x256xf32>, i32 -> vector<8x256xf32>
    %c5_191 = arith.constant 5 : index
    %c0_192 = arith.constant 0 : index
    %c0_193 = arith.constant 0 : index
    %492 = vector.load %arg5[%c5_191, %c0_192, %c0_193] : memref<9x1x256xf32, #tpu.memory_space<vmem>>, vector<1x1x256xf32>
    %493 = vector.shape_cast %492 : vector<1x1x256xf32> to vector<1x256xf32>
    %494 = vector.broadcast %493 : vector<1x256xf32> to vector<8x256xf32>
    %495 = arith.mulf %491, %494 : vector<8x256xf32>
    %c40_194 = arith.constant 40 : index
    %c0_195 = arith.constant 0 : index
    %496 = vector.load %arg11[%c40_194, %c0_195] : memref<72x256xf32, #tpu.memory_space<vmem>>, vector<8x256xf32>
    tpu.vector_store %arg11[%c40_194, %c0_195], %495 {strides = array<i32>} : memref<72x256xf32, #tpu.memory_space<vmem>>, vector<8x256xf32>,
    %c241_i32_196 = arith.constant 241 : i32
    %497 = tpu.dynamic_rotate %461 by %c241_i32_196 dim 1 : vector<8x256xf32>, i32 -> vector<8x256xf32>
    %c6_197 = arith.constant 6 : index
    %c0_198 = arith.constant 0 : index
    %c0_199 = arith.constant 0 : index
    %498 = vector.load %arg5[%c6_197, %c0_198, %c0_199] : memref<9x1x256xf32, #tpu.memory_space<vmem>>, vector<1x1x256xf32>
    %499 = vector.shape_cast %498 : vector<1x1x256xf32> to vector<1x256xf32>
    %500 = vector.broadcast %499 : vector<1x256xf32> to vector<8x256xf32>
    %501 = arith.mulf %497, %500 : vector<8x256xf32>
    %c48_200 = arith.constant 48 : index
    %c0_201 = arith.constant 0 : index
    %502 = vector.load %arg11[%c48_200, %c0_201] : memref<72x256xf32, #tpu.memory_space<vmem>>, vector<8x256xf32>
    tpu.vector_store %arg11[%c48_200, %c0_201], %501 {strides = array<i32>} : memref<72x256xf32, #tpu.memory_space<vmem>>, vector<8x256xf32>,
    %c240_i32_202 = arith.constant 240 : i32
    %503 = tpu.dynamic_rotate %461 by %c240_i32_202 dim 1 : vector<8x256xf32>, i32 -> vector<8x256xf32>
    %c7_203 = arith.constant 7 : index
    %c0_204 = arith.constant 0 : index
    %c0_205 = arith.constant 0 : index
    %504 = vector.load %arg5[%c7_203, %c0_204, %c0_205] : memref<9x1x256xf32, #tpu.memory_space<vmem>>, vector<1x1x256xf32>
    %505 = vector.shape_cast %504 : vector<1x1x256xf32> to vector<1x256xf32>
    %506 = vector.broadcast %505 : vector<1x256xf32> to vector<8x256xf32>
    %507 = arith.mulf %503, %506 : vector<8x256xf32>
    %c56_206 = arith.constant 56 : index
    %c0_207 = arith.constant 0 : index
    %508 = vector.load %arg11[%c56_206, %c0_207] : memref<72x256xf32, #tpu.memory_space<vmem>>, vector<8x256xf32>
    tpu.vector_store %arg11[%c56_206, %c0_207], %507 {strides = array<i32>} : memref<72x256xf32, #tpu.memory_space<vmem>>, vector<8x256xf32>,
    %c239_i32_208 = arith.constant 239 : i32
    %509 = tpu.dynamic_rotate %461 by %c239_i32_208 dim 1 : vector<8x256xf32>, i32 -> vector<8x256xf32>
    %c8_209 = arith.constant 8 : index
    %c0_210 = arith.constant 0 : index
    %c0_211 = arith.constant 0 : index
    %510 = vector.load %arg5[%c8_209, %c0_210, %c0_211] : memref<9x1x256xf32, #tpu.memory_space<vmem>>, vector<1x1x256xf32>
    %511 = vector.shape_cast %510 : vector<1x1x256xf32> to vector<1x256xf32>
    %512 = vector.broadcast %511 : vector<1x256xf32> to vector<8x256xf32>
    %513 = arith.mulf %509, %512 : vector<8x256xf32>
    %c64_212 = arith.constant 64 : index
    %c0_213 = arith.constant 0 : index
    %514 = vector.load %arg11[%c64_212, %c0_213] : memref<72x256xf32, #tpu.memory_space<vmem>>, vector<8x256xf32>
    tpu.vector_store %arg11[%c64_212, %c0_213], %513 {strides = array<i32>} : memref<72x256xf32, #tpu.memory_space<vmem>>, vector<8x256xf32>,
    %c0_214 = arith.constant 0 : index
    %c0_215 = arith.constant 0 : index
    %515 = vector.load %arg3[%c0_214, %c0_215] : memref<8x72xf32, #tpu.memory_space<vmem>>, vector<8x72xf32>
    %c0_216 = arith.constant 0 : index
    %c0_217 = arith.constant 0 : index
    %516 = vector.load %arg11[%c0_216, %c0_217] : memref<72x256xf32, #tpu.memory_space<vmem>>, vector<72x256xf32>
    %cst_218 = arith.constant dense<0.000000e+00> : vector<8x256xf32>
    %517 = tpu.matmul %515, %516, %cst_218 {dimension_numbers = #tpu.dot_dimension_numbers<[1], [0], [0], [1], [0, 0, 1, 1], [], []>} : vector<8x72xf32>, vector<72x256xf32>, vector<8x256xf32> -> vector<8x256xf32>
    %cst_219 = arith.constant dense<0.000000e+00> : vector<8xf32>
    %518 = vector.multi_reduction <add>, %517, %cst_219 [1] : vector<8x256xf32> to vector<8xf32>
    %519 = vector.shape_cast %518 : vector<8xf32> to vector<8x1xf32>
    %520 = arith.mulf %517, %517 : vector<8x256xf32>
    %cst_220 = arith.constant dense<0.000000e+00> : vector<8xf32>
    %521 = vector.multi_reduction <add>, %520, %cst_220 [1] : vector<8x256xf32> to vector<8xf32>
    %522 = vector.shape_cast %521 : vector<8xf32> to vector<8x1xf32>
    %523 = tpu.iota {dimensions = array<i32: 0>} : vector<8x1xi32>
    %cst_221 = arith.constant 0.000000e+00 : f32
    %524 = vector.broadcast %cst_221 : f32 to vector<8x1xf32>
    %c0_i32_222 = arith.constant 0 : i32
    %525 = vector.broadcast %c0_i32_222 : i32 to vector<8x1xi32>
    %526 = arith.cmpi sge, %523, %525 : vector<8x1xi32>
    %c2_i32_223 = arith.constant 2 : i32
    %527 = vector.broadcast %c2_i32_223 : i32 to vector<8x1xi32>
    %528 = arith.cmpi slt, %523, %527 : vector<8x1xi32>
    %529 = arith.andi %526, %528 : vector<8x1xi1>
    %530 = arith.extui %529 : vector<8x1xi1> to vector<8x1xi32>
    %531 = arith.sitofp %530 : vector<8x1xi32> to vector<8x1xf32>
    %532 = arith.mulf %519, %531 : vector<8x1xf32>
    %533 = vector.shape_cast %532 : vector<8x1xf32> to vector<1x8x1xf32>
    %cst_224 = arith.constant dense<0.000000e+00> : vector<1xf32>
    %534 = vector.multi_reduction <add>, %533, %cst_224 [1, 2] : vector<1x8x1xf32> to vector<1xf32>
    %535 = vector.shape_cast %534 : vector<1xf32> to vector<1x1x1xf32>
    %536 = vector.extract %535[0, 0, 0] : f32 from vector<1x1x1xf32>
    %537 = arith.mulf %522, %531 : vector<8x1xf32>
    %538 = vector.shape_cast %537 : vector<8x1xf32> to vector<1x8x1xf32>
    %cst_225 = arith.constant dense<0.000000e+00> : vector<1xf32>
    %539 = vector.multi_reduction <add>, %538, %cst_225 [1, 2] : vector<1x8x1xf32> to vector<1xf32>
    %540 = vector.shape_cast %539 : vector<1xf32> to vector<1x1x1xf32>
    %541 = vector.extract %540[0, 0, 0] : f32 from vector<1x1x1xf32>
    %cst_226 = arith.constant 5.120000e+02 : f32
    %542 = arith.divf %536, %cst_226 : f32
    %543 = arith.mulf %536, %542 : f32
    %544 = arith.subf %541, %543 : f32
    %cst_227 = arith.constant 5.110000e+02 : f32
    %545 = arith.divf %544, %cst_227 : f32
    %cst_228 = arith.constant 9.99999974E-6 : f32
    %546 = arith.addf %545, %cst_228 : f32
    %547 = math.rsqrt %546 : f32
    %548 = vector.broadcast %547 : f32 to vector<8x1xf32>
    %549 = arith.mulf %531, %548 : vector<8x1xf32>
    %550 = arith.addf %524, %549 : vector<8x1xf32>
    %c2_i32_229 = arith.constant 2 : i32
    %551 = vector.broadcast %c2_i32_229 : i32 to vector<8x1xi32>
    %552 = arith.cmpi sge, %523, %551 : vector<8x1xi32>
    %c4_i32_230 = arith.constant 4 : i32
    %553 = vector.broadcast %c4_i32_230 : i32 to vector<8x1xi32>
    %554 = arith.cmpi slt, %523, %553 : vector<8x1xi32>
    %555 = arith.andi %552, %554 : vector<8x1xi1>
    %556 = arith.extui %555 : vector<8x1xi1> to vector<8x1xi32>
    %557 = arith.sitofp %556 : vector<8x1xi32> to vector<8x1xf32>
    %558 = arith.mulf %519, %557 : vector<8x1xf32>
    %559 = vector.shape_cast %558 : vector<8x1xf32> to vector<1x8x1xf32>
    %cst_231 = arith.constant dense<0.000000e+00> : vector<1xf32>
    %560 = vector.multi_reduction <add>, %559, %cst_231 [1, 2] : vector<1x8x1xf32> to vector<1xf32>
    %561 = vector.shape_cast %560 : vector<1xf32> to vector<1x1x1xf32>
    %562 = vector.extract %561[0, 0, 0] : f32 from vector<1x1x1xf32>
    %563 = arith.mulf %522, %557 : vector<8x1xf32>
    %564 = vector.shape_cast %563 : vector<8x1xf32> to vector<1x8x1xf32>
    %cst_232 = arith.constant dense<0.000000e+00> : vector<1xf32>
    %565 = vector.multi_reduction <add>, %564, %cst_232 [1, 2] : vector<1x8x1xf32> to vector<1xf32>
    %566 = vector.shape_cast %565 : vector<1xf32> to vector<1x1x1xf32>
    %567 = vector.extract %566[0, 0, 0] : f32 from vector<1x1x1xf32>
    %cst_233 = arith.constant 5.120000e+02 : f32
    %568 = arith.divf %562, %cst_233 : f32
    %569 = arith.mulf %562, %568 : f32
    %570 = arith.subf %567, %569 : f32
    %cst_234 = arith.constant 5.110000e+02 : f32
    %571 = arith.divf %570, %cst_234 : f32
    %cst_235 = arith.constant 9.99999974E-6 : f32
    %572 = arith.addf %571, %cst_235 : f32
    %573 = math.rsqrt %572 : f32
    %574 = vector.broadcast %573 : f32 to vector<8x1xf32>
    %575 = arith.mulf %557, %574 : vector<8x1xf32>
    %576 = arith.addf %550, %575 : vector<8x1xf32>
    %c4_i32_236 = arith.constant 4 : i32
    %577 = vector.broadcast %c4_i32_236 : i32 to vector<8x1xi32>
    %578 = arith.cmpi sge, %523, %577 : vector<8x1xi32>
    %c6_i32_237 = arith.constant 6 : i32
    %579 = vector.broadcast %c6_i32_237 : i32 to vector<8x1xi32>
    %580 = arith.cmpi slt, %523, %579 : vector<8x1xi32>
    %581 = arith.andi %578, %580 : vector<8x1xi1>
    %582 = arith.extui %581 : vector<8x1xi1> to vector<8x1xi32>
    %583 = arith.sitofp %582 : vector<8x1xi32> to vector<8x1xf32>
    %584 = arith.mulf %519, %583 : vector<8x1xf32>
    %585 = vector.shape_cast %584 : vector<8x1xf32> to vector<1x8x1xf32>
    %cst_238 = arith.constant dense<0.000000e+00> : vector<1xf32>
    %586 = vector.multi_reduction <add>, %585, %cst_238 [1, 2] : vector<1x8x1xf32> to vector<1xf32>
    %587 = vector.shape_cast %586 : vector<1xf32> to vector<1x1x1xf32>
    %588 = vector.extract %587[0, 0, 0] : f32 from vector<1x1x1xf32>
    %589 = arith.mulf %522, %583 : vector<8x1xf32>
    %590 = vector.shape_cast %589 : vector<8x1xf32> to vector<1x8x1xf32>
    %cst_239 = arith.constant dense<0.000000e+00> : vector<1xf32>
    %591 = vector.multi_reduction <add>, %590, %cst_239 [1, 2] : vector<1x8x1xf32> to vector<1xf32>
    %592 = vector.shape_cast %591 : vector<1xf32> to vector<1x1x1xf32>
    %593 = vector.extract %592[0, 0, 0] : f32 from vector<1x1x1xf32>
    %cst_240 = arith.constant 5.120000e+02 : f32
    %594 = arith.divf %588, %cst_240 : f32
    %595 = arith.mulf %588, %594 : f32
    %596 = arith.subf %593, %595 : f32
    %cst_241 = arith.constant 5.110000e+02 : f32
    %597 = arith.divf %596, %cst_241 : f32
    %cst_242 = arith.constant 9.99999974E-6 : f32
    %598 = arith.addf %597, %cst_242 : f32
    %599 = math.rsqrt %598 : f32
    %600 = vector.broadcast %599 : f32 to vector<8x1xf32>
    %601 = arith.mulf %583, %600 : vector<8x1xf32>
    %602 = arith.addf %576, %601 : vector<8x1xf32>
    %c6_i32_243 = arith.constant 6 : i32
    %603 = vector.broadcast %c6_i32_243 : i32 to vector<8x1xi32>
    %604 = arith.cmpi sge, %523, %603 : vector<8x1xi32>
    %c8_i32_244 = arith.constant 8 : i32
    %605 = vector.broadcast %c8_i32_244 : i32 to vector<8x1xi32>
    %606 = arith.cmpi slt, %523, %605 : vector<8x1xi32>
    %607 = arith.andi %604, %606 : vector<8x1xi1>
    %608 = arith.extui %607 : vector<8x1xi1> to vector<8x1xi32>
    %609 = arith.sitofp %608 : vector<8x1xi32> to vector<8x1xf32>
    %610 = arith.mulf %519, %609 : vector<8x1xf32>
    %611 = vector.shape_cast %610 : vector<8x1xf32> to vector<1x8x1xf32>
    %cst_245 = arith.constant dense<0.000000e+00> : vector<1xf32>
    %612 = vector.multi_reduction <add>, %611, %cst_245 [1, 2] : vector<1x8x1xf32> to vector<1xf32>
    %613 = vector.shape_cast %612 : vector<1xf32> to vector<1x1x1xf32>
    %614 = vector.extract %613[0, 0, 0] : f32 from vector<1x1x1xf32>
    %615 = arith.mulf %522, %609 : vector<8x1xf32>
    %616 = vector.shape_cast %615 : vector<8x1xf32> to vector<1x8x1xf32>
    %cst_246 = arith.constant dense<0.000000e+00> : vector<1xf32>
    %617 = vector.multi_reduction <add>, %616, %cst_246 [1, 2] : vector<1x8x1xf32> to vector<1xf32>
    %618 = vector.shape_cast %617 : vector<1xf32> to vector<1x1x1xf32>
    %619 = vector.extract %618[0, 0, 0] : f32 from vector<1x1x1xf32>
    %cst_247 = arith.constant 5.120000e+02 : f32
    %620 = arith.divf %614, %cst_247 : f32
    %621 = arith.mulf %614, %620 : f32
    %622 = arith.subf %619, %621 : f32
    %cst_248 = arith.constant 5.110000e+02 : f32
    %623 = arith.divf %622, %cst_248 : f32
    %cst_249 = arith.constant 9.99999974E-6 : f32
    %624 = arith.addf %623, %cst_249 : f32
    %625 = math.rsqrt %624 : f32
    %626 = vector.broadcast %625 : f32 to vector<8x1xf32>
    %627 = arith.mulf %609, %626 : vector<8x1xf32>
    %628 = arith.addf %602, %627 : vector<8x1xf32>
    %629 = arith.mulf %628, %3 : vector<8x1xf32>
    %630 = vector.broadcast %5 : vector<8x1xf32> to vector<8x256xf32>
    %631 = arith.mulf %630, %517 : vector<8x256xf32>
    %632 = arith.negf %631 : vector<8x256xf32>
    %633 = math.exp %632 : vector<8x256xf32>
    %cst_250 = arith.constant 1.000000e+00 : f32
    %634 = vector.broadcast %cst_250 : f32 to vector<8x256xf32>
    %635 = arith.addf %634, %633 : vector<8x256xf32>
    %636 = arith.divf %634, %635 : vector<8x256xf32>
    %637 = arith.mulf %517, %636 : vector<8x256xf32>
    %638 = vector.broadcast %629 : vector<8x1xf32> to vector<8x256xf32>
    %639 = arith.mulf %637, %638 : vector<8x256xf32>
    %640 = vector.broadcast %4 : vector<8x1xf32> to vector<8x256xf32>
    %641 = arith.addf %639, %640 : vector<8x256xf32>
    %cst_251 = arith.constant 0.000000e+00 : f32
    %642 = vector.broadcast %cst_251 : f32 to vector<8x256xf32>
    %643 = arith.maximumf %641, %642 : vector<8x256xf32>
    %c0_252 = arith.constant 0 : index
    %c0_253 = arith.constant 0 : index
    %644 = vector.load %arg4[%c0_252, %c0_253] : memref<32x8xf32, #tpu.memory_space<vmem>>, vector<32x8xf32>
    %cst_254 = arith.constant dense<0.000000e+00> : vector<32x256xf32>
    %645 = tpu.matmul %644, %643, %cst_254 {dimension_numbers = #tpu.dot_dimension_numbers<[1], [0], [0], [1], [0, 0, 1, 1], [], []>} : vector<32x8xf32>, vector<8x256xf32>, vector<32x256xf32> -> vector<32x256xf32>
    %c1_255 = arith.constant 1 : index
    %c0_256 = arith.constant 0 : index
    %c0_257 = arith.constant 0 : index
    %646 = vector.load %arg8[%c1_255, %c0_256, %c0_257] : memref<2x32x256xf32, #tpu.memory_space<vmem>>, vector<1x32x256xf32>
    %647 = vector.shape_cast %646 : vector<1x32x256xf32> to vector<32x256xf32>
    %648 = vector.shape_cast %645 : vector<32x256xf32> to vector<1x32x256xf32>
    tpu.vector_store %arg8[%c1_255, %c0_256, %c0_257], %648 {strides = array<i32>} : memref<2x32x256xf32, #tpu.memory_space<vmem>>, vector<1x32x256xf32>,
    %cst_258 = arith.constant dense<0.000000e+00> : vector<32xf32>
    %649 = vector.multi_reduction <add>, %645, %cst_258 [1] : vector<32x256xf32> to vector<32xf32>
    %650 = vector.shape_cast %649 : vector<32xf32> to vector<32x1xf32>
    %651 = arith.addf %327, %650 : vector<32x1xf32>
    %652 = arith.mulf %645, %645 : vector<32x256xf32>
    %cst_259 = arith.constant dense<0.000000e+00> : vector<32xf32>
    %653 = vector.multi_reduction <add>, %652, %cst_259 [1] : vector<32x256xf32> to vector<32xf32>
    %654 = vector.shape_cast %653 : vector<32xf32> to vector<32x1xf32>
    %655 = arith.addf %331, %654 : vector<32x1xf32>
    %c0_260 = arith.constant 0 : index
    %c0_261 = arith.constant 0 : index
    %c0_262 = arith.constant 0 : index
    %656 = vector.load %arg9[%c0_260, %c0_261, %c0_262] : memref<1x32x1xf32, #tpu.memory_space<vmem>>, vector<1x32x1xf32>
    %657 = vector.shape_cast %656 : vector<1x32x1xf32> to vector<32x1xf32>
    %658 = vector.shape_cast %651 : vector<32x1xf32> to vector<1x32x1xf32>
    tpu.vector_store %arg9[%c0_260, %c0_261, %c0_262], %658 {strides = array<i32>} : memref<1x32x1xf32, #tpu.memory_space<vmem>>, vector<1x32x1xf32>,
    %c0_263 = arith.constant 0 : index
    %c0_264 = arith.constant 0 : index
    %c0_265 = arith.constant 0 : index
    %659 = vector.load %arg10[%c0_263, %c0_264, %c0_265] : memref<1x32x1xf32, #tpu.memory_space<vmem>>, vector<1x32x1xf32>
    %660 = vector.shape_cast %659 : vector<1x32x1xf32> to vector<32x1xf32>
    %661 = vector.shape_cast %655 : vector<32x1xf32> to vector<1x32x1xf32>
    tpu.vector_store %arg10[%c0_263, %c0_264, %c0_265], %661 {strides = array<i32>} : memref<1x32x1xf32, #tpu.memory_space<vmem>>, vector<1x32x1xf32>,
    return
  }
  func.func @transform_0(%arg0: i32) -> (i32, i32, i32) {
    %c0_i32 = arith.constant 0 : i32
    %c0_i32_0 = arith.constant 0 : i32
    %c0_i32_1 = arith.constant 0 : i32
    return %arg0, %c0_i32, %c0_i32_0 : i32, i32, i32
  }
  func.func @transform_1(%arg0: i32) -> (i32, i32) {
    %c0_i32 = arith.constant 0 : i32
    %c0_i32_0 = arith.constant 0 : i32
    %c0_i32_1 = arith.constant 0 : i32
    return %c0_i32, %c0_i32_0 : i32, i32
  }
  func.func @transform_2(%arg0: i32) -> (i32, i32) {
    %c0_i32 = arith.constant 0 : i32
    %c0_i32_0 = arith.constant 0 : i32
    %c0_i32_1 = arith.constant 0 : i32
    return %c0_i32, %c0_i32_0 : i32, i32
  }
  func.func @transform_3(%arg0: i32) -> (i32, i32) {
    %c0_i32 = arith.constant 0 : i32
    %c0_i32_0 = arith.constant 0 : i32
    %c0_i32_1 = arith.constant 0 : i32
    return %c0_i32, %c0_i32_0 : i32, i32
  }
  func.func @transform_4(%arg0: i32) -> (i32, i32, i32) {
    %c0_i32 = arith.constant 0 : i32
    %c0_i32_0 = arith.constant 0 : i32
    %c0_i32_1 = arith.constant 0 : i32
    %c0_i32_2 = arith.constant 0 : i32
    return %c0_i32, %c0_i32_0, %c0_i32_1 : i32, i32, i32
  }
  func.func @transform_5(%arg0: i32) -> (i32, i32) {
    %c0_i32 = arith.constant 0 : i32
    %c0_i32_0 = arith.constant 0 : i32
    %c0_i32_1 = arith.constant 0 : i32
    return %c0_i32, %c0_i32_0 : i32, i32
  }
  func.func @transform_6(%arg0: i32) -> (i32, i32) {
    %c0_i32 = arith.constant 0 : i32
    %c0_i32_0 = arith.constant 0 : i32
    %c0_i32_1 = arith.constant 0 : i32
    return %c0_i32, %c0_i32_0 : i32, i32
  }
  func.func @transform_7(%arg0: i32) -> (i32, i32, i32) {
    %c0_i32 = arith.constant 0 : i32
    %c0_i32_0 = arith.constant 0 : i32
    %c0_i32_1 = arith.constant 0 : i32
    return %arg0, %c0_i32, %c0_i32_0 : i32, i32, i32
  }
  func.func @transform_8(%arg0: i32) -> (i32, i32, i32) {
    %c0_i32 = arith.constant 0 : i32
    %c0_i32_0 = arith.constant 0 : i32
    %c0_i32_1 = arith.constant 0 : i32
    return %arg0, %c0_i32, %c0_i32_0 : i32, i32, i32
  }
  func.func @transform_9(%arg0: i32) -> (i32, i32, i32) {
    %c0_i32 = arith.constant 0 : i32
    %c0_i32_0 = arith.constant 0 : i32
    %c0_i32_1 = arith.constant 0 : i32
    return %arg0, %c0_i32, %c0_i32_0 : i32, i32, i32
  }
}

</mosaic_0001>

<bundles_post_ra>
// kernel: bottleneck_forward.3
= control target key start
LH: loop header
LB: loop body
LE: loop exit
PB: predicated region body
PF: predicated region fallthrough
CT: control target
= control target key end

     0   :  { %v176_v0 = vmov 0   ;;  %v177_v5 = vmov 1   ;;  %s354_s1 = inlined_call_operand.vmem [shape: f32[32,2], index: 1, kind: input, shape index: {}]   ;;  %s355_s0 = inlined_call_operand.vmem [shape: f32[2,32,256], index: 0, kind: input, shape index: {}]   ;;  %s356_s2 = inlined_call_operand.vmem [shape: f32[2,32,256], index: 2, kind: input, shape index: {}]   ;;  %s357_s3 = inlined_call_operand.vmem [shape: f32[2,32,256], index: 3, kind: output, shape index: {}]  }
   0x1   :  { %173 = vset.pattern.permute.xlu1 %v176_v0  ;;  %172 = vset.pattern.permute.xlu0 %v176_v0  ;;  %v16_v1 = vld [vmem:[%s354_s1 + $0x10] sm:$0xff]  ;;  %v14_v2 = vld [vmem:[%s354_s1] sm:$0xff]  ;;  %v17_v3 = vld [vmem:[%s354_s1 + $0x18] sm:$0xff] }
   0x2   :  { %46 = vperm.xlu1 %173, %v16_v1   ;;  %36 = vperm.xlu0 %172, %v14_v2   ;;  %v15_v4 = vld [vmem:[%s354_s1 + $0x8] sm:$0xff]  ;;  %v18_v8 = vld [vmem:[%s355_s0] sm:$0xff]  ;;  %v20_v17 = vld [vmem:[%s355_s0 + $0x10] sm:$0xff] }
   0x3   :  { %v19_v9 = vld [vmem:[%s355_s0 + $0x8] sm:$0xff]  ;;  %v26_v10 = vld [vmem:[%s355_s0 + $0x40] sm:$0xff]  ;;  %v21_v18 = vld [vmem:[%s355_s0 + $0x18] sm:$0xff] }
   0x4   :  { %v27_v11 = vld [vmem:[%s355_s0 + $0x48] sm:$0xff]  ;;  %v22_v12 = vld [vmem:[%s355_s0 + $0x20] sm:$0xff]  ;;  %v28_v20 = vld [vmem:[%s355_s0 + $0x50] sm:$0xff] }
   0x5   :  { %v23_v13 = vld [vmem:[%s355_s0 + $0x28] sm:$0xff]  ;;  %v30_v14 = vld [vmem:[%s355_s0 + $0x60] sm:$0xff]  ;;  %v29_v21 = vld [vmem:[%s355_s0 + $0x58] sm:$0xff] }
   0x6   :  { %51 = vperm.xlu1 %173, %v17_v3   ;;  %41 = vperm.xlu0 %172, %v15_v4   ;;  %v31_v19 = vld [vmem:[%s355_s0 + $0x68] sm:$0xff]  ;;  %v24_v22 = vld [vmem:[%s355_s0 + $0x30] sm:$0xff]  ;;  %v25_v27 = vld [vmem:[%s355_s0 + $0x38] sm:$0xff] }
   0x7   :  { %v32_v28 = vld [vmem:[%s355_s0 + $0x70] sm:$0xff]  ;;  %v33_v29 = vld [vmem:[%s355_s0 + $0x78] sm:$0xff]  ;;  %v102_v43 = vld [vmem:[%s356_s2] sm:$0xff] }
   0x8   :  { %v104_v38 = vld [vmem:[%s356_s2 + $0x10] sm:$0xff]  ;;  %v105_v39 = vld [vmem:[%s356_s2 + $0x18] sm:$0xff]  ;;  %v103_v53 = vld [vmem:[%s356_s2 + $0x8] sm:$0xff] }
   0x9   :  { %v112_v40 = vld [vmem:[%s356_s2 + $0x50] sm:$0xff]  ;;  %v113_v41 = vld [vmem:[%s356_s2 + $0x58] sm:$0xff]  ;;  %v110_v54 = vld [vmem:[%s356_s2 + $0x40] sm:$0xff] }
   0xa   :  { %175 = vset.pattern.permute.xlu1 %v177_v5  ;;  %174 = vset.pattern.permute.xlu0 %v177_v5  ;;  %v111_v55 = vld [vmem:[%s356_s2 + $0x48] sm:$0xff] }
   0xb   :  { %75 = vperm.xlu1 %175, %v15_v4   ;;  %71 = vperm.xlu0 %174, %v14_v2   ;;  %v106_v4 = vld [vmem:[%s356_s2 + $0x20] sm:$0xff] }
   0xf   :  { %79 = vperm.xlu1 %175, %v16_v1   ;;  %83 = vperm.xlu0 %174, %v17_v3  }
  0x81   :  { %v47_v6 = vpop.permute.xlu1 %46  ;;  %v37_v7 = vpop.permute.xlu0 %36 }
  0x82   :  { %v54_v23 = vmul.f32 %v37_v7, %v18_v8  ;;  %v55_v24 = vmul.f32 %v37_v7, %v19_v9  ;;  %v62_v25 = vmul.f32 %v37_v7, %v26_v10  ;;  %v63_v26 = vmul.f32 %v37_v7, %v27_v11  ;;  %v107_v10 = vld [vmem:[%s356_s2 + $0x28] sm:$0xff]  ;;  %v114_v11 = vld [vmem:[%s356_s2 + $0x60] sm:$0xff] }
  0x83   :  { %v58_v30 = vmul.f32 %v47_v6, %v22_v12  ;;  %v59_v31 = vmul.f32 %v47_v6, %v23_v13  ;;  %v66_v32 = vmul.f32 %v47_v6, %v30_v14  ;;  %v67_v33 = vmul.f32 %v47_v6, %v31_v19 }
  0x85   :  { %v52_v15 = vpop.permute.xlu1 %51  ;;  %v42_v16 = vpop.permute.xlu0 %41 }
  0x86   :  { %v56_v34 = vmul.f32 %v42_v16, %v20_v17  ;;  %v57_v35 = vmul.f32 %v42_v16, %v21_v18  ;;  %v64_v36 = vmul.f32 %v42_v16, %v28_v20  ;;  %v65_v37 = vmul.f32 %v42_v16, %v29_v21  ;;  %v115_v17 = vld [vmem:[%s356_s2 + $0x68] sm:$0xff]  ;;  %v108_v18 = vld [vmem:[%s356_s2 + $0x30] sm:$0xff] }
  0x87   :  { %v60_v45 = vmul.f32 %v52_v15, %v24_v22  ;;  %v61_v46 = vmul.f32 %v52_v15, %v25_v27  ;;  %v68_v47 = vmul.f32 %v52_v15, %v32_v28  ;;  %v69_v48 = vmul.f32 %v52_v15, %v33_v29 }
  0x8a   :  { %v76_v42 = vpop.permute.xlu1 %75  ;;  %v72_v44 = vpop.permute.xlu0 %71 }
  0x8b   :  { %v88_v49 = vadd.f32 %v76_v42, %v56_v34  ;;  %v89_v50 = vadd.f32 %v76_v42, %v57_v35  ;;  %v96_v51 = vadd.f32 %v76_v42, %v64_v36  ;;  %v97_v52 = vadd.f32 %v76_v42, %v65_v37 }
  0x8c   :  { %v86_v56 = vadd.f32 %v72_v44, %v54_v23  ;;  %v87_v57 = vadd.f32 %v72_v44, %v55_v24  ;;  %v94_v58 = vadd.f32 %v72_v44, %v62_v25  ;;  %v95_v59 = vadd.f32 %v72_v44, %v63_v26  ;;  %v109_v23 = vld [vmem:[%s356_s2 + $0x38] sm:$0xff]  ;;  %v116_v24 = vld [vmem:[%s356_s2 + $0x70] sm:$0xff] }
  0x8d   :  { %v120_v60 = vadd.f32 %v104_v38, %v88_v49  ;;  %v121_v61 = vadd.f32 %v105_v39, %v89_v50  ;;  %v128_v62 = vadd.f32 %v112_v40, %v96_v51  ;;  %v129_v63 = vadd.f32 %v113_v41, %v97_v52  ;;  %v117_v25 = vld [vmem:[%s356_s2 + $0x78] sm:$0xff] }
  0x8e   :  { %v118_v0 = vadd.f32 %v102_v43, %v86_v56  ;;  %v119_v1 = vadd.f32 %v103_v53, %v87_v57  ;;  %v126_v2 = vadd.f32 %v110_v54, %v94_v58  ;;  %v127_v3 = vadd.f32 %v111_v55, %v95_v59  ;;  %v80_v5 = vpop.permute.xlu1 %79  ;;  %v84_v12 = vpop.permute.xlu0 %83 }
  0x8f   :  { %v136_v6 = vmax.f32 %v120_v60, 0.0  ;;  %v137_v7 = vmax.f32 %v121_v61, 0.0  ;;  %v144_v8 = vmax.f32 %v128_v62, 0.0  ;;  %v145_v9 = vmax.f32 %v129_v63, 0.0 }
  0x90   :  { %v134_v13 = vmax.f32 %v118_v0, 0.0  ;;  %v135_v14 = vmax.f32 %v119_v1, 0.0  ;;  %v142_v15 = vmax.f32 %v126_v2, 0.0  ;;  %v143_v16 = vmax.f32 %v127_v3, 0.0 }
  0x91   :  { %152 = vst [vmem:[%s357_s3 + $0x10] sm:$0xff] %v136_v6  ;;  %153 = vst [vmem:[%s357_s3 + $0x18] sm:$0xff] %v137_v7  ;;  %v90_v19 = vadd.f32 %v80_v5, %v58_v30  ;;  %v91_v20 = vadd.f32 %v80_v5, %v59_v31  ;;  %v98_v21 = vadd.f32 %v80_v5, %v66_v32 }
  0x92   :  { %160 = vst [vmem:[%s357_s3 + $0x50] sm:$0xff] %v144_v8  ;;  %161 = vst [vmem:[%s357_s3 + $0x58] sm:$0xff] %v145_v9  ;;  %v99_v22 = vadd.f32 %v80_v5, %v67_v33  ;;  %v92_v26 = vadd.f32 %v84_v12, %v60_v45  ;;  %v93_v27 = vadd.f32 %v84_v12, %v61_v46 }
  0x93   :  { %150 = vst [vmem:[%s357_s3] sm:$0xff] %v134_v13  ;;  %151 = vst [vmem:[%s357_s3 + $0x8] sm:$0xff] %v135_v14  ;;  %v100_v28 = vadd.f32 %v84_v12, %v68_v47  ;;  %v101_v29 = vadd.f32 %v84_v12, %v69_v48  ;;  %v122_v30 = vadd.f32 %v106_v4, %v90_v19 }
  0x94   :  { %158 = vst [vmem:[%s357_s3 + $0x40] sm:$0xff] %v142_v15  ;;  %159 = vst [vmem:[%s357_s3 + $0x48] sm:$0xff] %v143_v16  ;;  %v123_v31 = vadd.f32 %v107_v10, %v91_v20  ;;  %v130_v32 = vadd.f32 %v114_v11, %v98_v21  ;;  %v131_v33 = vadd.f32 %v115_v17, %v99_v22 }
  0x95   :  { %v124_v34 = vadd.f32 %v108_v18, %v92_v26  ;;  %v125_v35 = vadd.f32 %v109_v23, %v93_v27  ;;  %v132_v36 = vadd.f32 %v116_v24, %v100_v28  ;;  %v133_v37 = vadd.f32 %v117_v25, %v101_v29 }
  0x96   :  { %v138_v38 = vmax.f32 %v122_v30, 0.0  ;;  %v139_v39 = vmax.f32 %v123_v31, 0.0  ;;  %v146_v40 = vmax.f32 %v130_v32, 0.0  ;;  %v147_v41 = vmax.f32 %v131_v33, 0.0 }
  0x97   :  { %v140_v42 = vmax.f32 %v124_v34, 0.0  ;;  %v141_v43 = vmax.f32 %v125_v35, 0.0  ;;  %v148_v44 = vmax.f32 %v132_v36, 0.0  ;;  %v149_v49 = vmax.f32 %v133_v37, 0.0 }
  0x98   :  { %154 = vst [vmem:[%s357_s3 + $0x20] sm:$0xff] %v138_v38  ;;  %155 = vst [vmem:[%s357_s3 + $0x28] sm:$0xff] %v139_v39 }
  0x99   :  { %162 = vst [vmem:[%s357_s3 + $0x60] sm:$0xff] %v146_v40  ;;  %163 = vst [vmem:[%s357_s3 + $0x68] sm:$0xff] %v147_v41 }
  0x9a   :  { %156 = vst [vmem:[%s357_s3 + $0x30] sm:$0xff] %v140_v42  ;;  %157 = vst [vmem:[%s357_s3 + $0x38] sm:$0xff] %v141_v43 }
  0x9b   :  { %164 = vst [vmem:[%s357_s3 + $0x70] sm:$0xff] %v148_v44  ;;  %165 = vst [vmem:[%s357_s3 + $0x78] sm:$0xff] %v149_v49 }

// kernel: bottleneck_forward.2
= control target key start
LH: loop header
LB: loop body
LE: loop exit
PB: predicated region body
PF: predicated region fallthrough
CT: control target
= control target key end

     0   :  { %v2181_v3 = vmov 0.0   ;;  %vm40_vm0 = vcmask 261120   ;;  %v2182_v20 = vmov 2   ;;  %v123_v21 = vlaneseq  ;;  %s2914_s0 = inlined_call_operand.vmem [shape: f32[2,32,256], index: 0, kind: input, shape index: {}]   ;;  %s2915_s1 = inlined_call_operand.vmem [shape: f32[8,32], index: 1, kind: input, shape index: {}]   ;;  %s2916_s5 = inlined_call_operand.vmem [shape: f32[8,3], index: 5, kind: input, shape index: {}]   ;;  %s2917_s4 = inlined_call_operand.vmem [shape: f32[9,1,256], index: 4, kind: input, shape index: {}]   ;;  %s2918_s2 = inlined_call_operand.vmem [shape: f32[8,72], index: 2, kind: input, shape index: {}]   ;;  %s2919_s6 = inlined_call_operand.vmem [shape: f32[8,3], index: 6, kind: input, shape index: {}]   ;;  %s2920_s3 = inlined_call_operand.vmem [shape: f32[32,8], index: 3, kind: input, shape index: {}]   ;;  %s2921_s7 = inlined_call_operand.vmem [shape: f32[2,32,256], index: 7, kind: output, shape index: {0}]   ;;  %s2922_s8 = inlined_call_operand.vmem [shape: f32[1,32,1], index: 8, kind: output, shape index: {1}]   ;;  %s2923_s9 = inlined_call_operand.vmem [shape: f32[1,32,1], index: 9, kind: output, shape index: {2}]  }
   0x1   :  { %v32_v0 = vld [vmem:[%s2914_s0 + $0x8] sm:$0xff]  ;;  %v34_v1 = vld [vmem:[%s2914_s0 + $0x18] sm:$0xff]  ;;  %v31_v2 = vld [vmem:[%s2914_s0] sm:$0xff]  ;;  %108 = vmatprep.mubr.f32.mxu0 %v2181_v3  ;;  %628 = vmatprep.mubr.f32.mxu1 %v2181_v3  ;;  %vm131_vm8 = vcmask 7168  }
   0x2   :  { %v1949_v4 = vpack.c.bf16 %v34_v1, %v32_v0  ;;  %v33_v5 = vld [vmem:[%s2914_s0 + $0x10] sm:$0xff]  ;;  %v36_v6 = vld [vmem:[%s2914_s0 + $0x28] sm:$0xff]  ;;  %v38_v7 = vld [vmem:[%s2914_s0 + $0x38] sm:$0xff]  ;;  %2107 = vset.pattern.permute.xlu0 %v2182_v20  ;;  %v2288_v22 = vshrl.u32 %v123_v21, 7 }
   0x3   :  { %v1951_v8 = vpack.c.bf16 %v33_v5, %v31_v2  ;;  %v1953_v9 = vpack.c.bf16 %v38_v7, %v36_v6  ;;  %v35_v10 = vld [vmem:[%s2914_s0 + $0x20] sm:$0xff]  ;;  %v37_v11 = vld [vmem:[%s2914_s0 + $0x30] sm:$0xff] }
   0x4   :  { %1950 = vmatprep.subr.bf16.mxu0 %v1949_v4  ;;  %v1955_v12 = vpack.c.bf16 %v37_v11, %v35_v10  ;;  %v2272_v13 = vld [vmem:[%s2915_s1] sm:$0xff]  ;;  %vm168_vm1 = vcmp.ge.s32.totalorder %v2288_v22, 2  ;;  %vm169_vm2 = vcmp.lt.s32.totalorder %v2288_v22, 4  ;;  %vm210_vm3 = vcmp.ge.s32.totalorder %v2288_v22, 4 }
   0x5   :  { %1952 = vmatpush1.bf16.msra.mxu0 %v1951_v8  ;;  %vm211_vm4 = vcmp.lt.s32.totalorder %v2288_v22, 6  ;;  %vm170_vm5 = vmand %vm168_vm1, %vm169_vm2  ;;  %vm126_vm6 = vcmp.lt.s32.totalorder %v2288_v22, 2  ;;  %vm252_vm9 = vcmp.ge.s32.totalorder %v2288_v22, 6  ;;  %v2327_v45 = vld [vmem:[%s2916_s5] sm:$0xff] }
   0x6   :  { %1954 = vmatprep.subr.bf16.mxu0 %v1953_v9  ;;  %vm212_vm7 = vmand %vm210_vm3, %vm211_vm4  ;;  %v2296_v23 = vsel %vm170_vm5, 1.0, %v2181_v3  ;;  %v2299_v24 = vsel %vm126_vm6, 1.0, %v2181_v3  ;;  %v2311_v33 = vsel %vm252_vm9, 1.0, %v2181_v3  ;;  %vm560_vm3 = vcmask 588800  }
   0x7   :  { %v2302_v26 = vsel %vm212_vm7, 1.0, %v2181_v3 }
   0x9   :  { %1956 = vmatpush1.bf16.msra.mxu0 %v1955_v12 }
   0xc   :  { %1893 = vmatmul.mubr.msk.f32.vlgmr.msra.gmra.mrb[0].mxu0 %vm40_vm0, %v2272_v13 }
   0xd   :  { %909 = vmatprep.mubr.f32.mxu0 %v2181_v3 }
  0xdf   :  { %v2277_v14 = vpop.f32.mrb[0].mxu0 }
  0xe0   :  { %v2279_v15 = vpop.f32.mrb[1].mxu0  ;;  %v118_v16 = vmul.f32 %v2277_v14, %v2277_v14 }
  0xe1   :  { %v115_v17 = vadd.f32 %v2279_v15, %v2277_v14  ;;  %v119_v18 = vmul.f32 %v2279_v15, %v2279_v15 }
  0xe3   :  { %116 = vadd.xlane.f32.xlu0 %v115_v17  ;;  %v120_v19 = vadd.f32 %v119_v18, %v118_v16 }
  0xe7   :  { %121 = vadd.xlane.f32.xlu0 %v120_v19 }
 0x170   :  { %v117_v25 = vpop.xlane.xlu0 %116 }
 0x171   :  { %v173_v27 = vmul.f32 %v2296_v23, %v117_v25  ;;  %v130_v28 = vmul.f32 %v2299_v24, %v117_v25  ;;  %v215_v31 = vmul.f32 %v2302_v26, %v117_v25  ;;  %v257_v37 = vmul.f32 %v2311_v33, %v117_v25 }
 0x173   :  { %v174_v29 = vsel %vm131_vm8, %v173_v27, 0.0  ;;  %v132_v30 = vsel %vm131_vm8, %v130_v28, 0.0  ;;  %v216_v35 = vsel %vm131_vm8, %v215_v31, 0.0  ;;  %v258_v39 = vsel %vm131_vm8, %v257_v37, 0.0 }
 0x174   :  { %175 = vadd.xlane.f32.xlu0 %v174_v29  ;;  %133 = vadd.xlane.f32.xlu1 %v132_v30  ;;  %v122_v32 = vpop.xlane.xlu0 %121 }
 0x175   :  { %v142_v34 = vmul.f32 %v2299_v24, %v122_v32  ;;  %v184_v38 = vmul.f32 %v2296_v23, %v122_v32  ;;  %v226_v41 = vmul.f32 %v2302_v26, %v122_v32  ;;  %v268_v43 = vmul.f32 %v2311_v33, %v122_v32 }
 0x177   :  { %v143_v36 = vsel %vm131_vm8, %v142_v34, 0.0  ;;  %v185_v40 = vsel %vm131_vm8, %v184_v38, 0.0  ;;  %v227_v42 = vsel %vm131_vm8, %v226_v41, 0.0  ;;  %v269_v44 = vsel %vm131_vm8, %v268_v43, 0.0 }
 0x178   :  { %217 = vadd.xlane.f32.xlu0 %v216_v35  ;;  %144 = vadd.xlane.f32.xlu1 %v143_v36 }
 0x17c   :  { %259 = vadd.xlane.f32.xlu0 %v258_v39  ;;  %186 = vadd.xlane.f32.xlu1 %v185_v40 }
 0x180   :  { %228 = vadd.xlane.f32.xlu1 %v227_v42 }
 0x184   :  { %270 = vadd.xlane.f32.xlu1 %v269_v44 }
 0x192   :  { %297 = vperm.xlu0 %2107, %v2327_v45  }
 0x201   :  { %v134_v46 = vpop.xlane.xlu1 %133  ;;  %v176_v60 = vpop.xlane.xlu0 %175 }
 0x202   :  { %v135_v47 = vrot.slane %v134_v46, 4  ;;  %v177_v62 = vrot.slane %v176_v60, 4 }
 0x204   :  { %v136_v48 = vadd.f32 %v135_v47, %v134_v46  ;;  %v178_v0 = vadd.f32 %v177_v62, %v176_v60 }
 0x205   :  { %v145_v49 = vpop.xlane.xlu1 %144  ;;  %v218_v16 = vpop.xlane.xlu0 %217 }
 0x206   :  { %v137_v50 = vrot.slane %v136_v48, 2  ;;  %v146_v51 = vrot.slane %v145_v49, 4  ;;  %v179_v2 = vrot.slane %v178_v0, 2  ;;  %v219_v18 = vrot.slane %v218_v16, 4 }
 0x208   :  { %v147_v52 = vadd.f32 %v146_v51, %v145_v49  ;;  %v138_v53 = vadd.f32 %v137_v50, %v136_v48  ;;  %v180_v6 = vadd.f32 %v179_v2, %v178_v0  ;;  %v220_v20 = vadd.f32 %v219_v18, %v218_v16 }
 0x209   :  { %v187_v61 = vpop.xlane.xlu1 %186  ;;  %v260_v39 = vpop.xlane.xlu0 %259 }
 0x20a   :  { %v148_v54 = vrot.slane %v147_v52, 2  ;;  %v139_v55 = vrot.slane %v138_v53, 1  ;;  %v188_v63 = vrot.slane %v187_v61, 4  ;;  %v181_v8 = vrot.slane %v180_v6, 1 }
 0x20b   :  { %v221_v27 = vrot.slane %v220_v20, 2  ;;  %v261_v44 = vrot.slane %v260_v39, 4 }
 0x20c   :  { %v149_v56 = vadd.f32 %v148_v54, %v147_v52  ;;  %v140_v57 = vadd.f32 %v139_v55, %v138_v53  ;;  %v189_v1 = vadd.f32 %v188_v63, %v187_v61  ;;  %v182_v11 = vadd.f32 %v181_v8, %v180_v6 }
 0x20d   :  { %v229_v17 = vpop.xlane.xlu1 %228  ;;  %v222_v30 = vadd.f32 %v221_v27, %v220_v20  ;;  %v262_v48 = vadd.f32 %v261_v44, %v260_v39  ;;  %v2397_v39 = vsub.s32 0, %v2288_v22 }
 0x20e   :  { %v150_v58 = vrot.slane %v149_v56, 1  ;;  %1999 = vpush %v140_v57  ;;  %v190_v4 = vrot.slane %v189_v1, 2  ;;  %v230_v19 = vrot.slane %v229_v17, 4 }
 0x20f   :  { %v223_v32 = vrot.slane %v222_v30, 1  ;;  %v263_v50 = vrot.slane %v262_v48, 2 }
 0x210   :  { %v151_v59 = vadd.f32 %v150_v58, %v149_v56  ;;  %v191_v7 = vadd.f32 %v190_v4, %v189_v1  ;;  %v231_v25 = vadd.f32 %v230_v19, %v229_v17 }
 0x211   :  { %v224_v36 = vadd.f32 %v223_v32, %v222_v30  ;;  %v271_v40 = vpop.xlane.xlu1 %270  ;;  %v264_v53 = vadd.f32 %v263_v50, %v262_v48  ;;  %v2342_v8 = vpop.permute.xlu0 %297 }
 0x212   :  { %2001 = vpush %v151_v59  ;;  %v192_v9 = vrot.slane %v191_v7, 1  ;;  %v232_v28 = vrot.slane %v231_v25, 2  ;;  %v272_v46 = vrot.slane %v271_v40, 4  ;;  %v2183_v59 = vmov 0  }
 0x213   :  { %v265_v55 = vrot.slane %v264_v53, 1  ;;  %2108 = vset.pattern.permute.xlu1 %v2183_v59 }
 0x214   :  { %v193_v12 = vadd.f32 %v192_v9, %v191_v7  ;;  %v233_v31 = vadd.f32 %v232_v28, %v231_v25  ;;  %v273_v49 = vadd.f32 %v272_v46, %v271_v40  ;;  %v2184_v7 = vmov 1   ;;  %v1900_v40 = vld [vmem:[%s2917_s4 + $0x2] sm:$0x3] }
 0x215   :  { %v266_v58 = vadd.f32 %v265_v55, %v264_v53  ;;  %v300_v9 = vmul.f32 %v2342_v8, %v2277_v14 }
 0x216   :  { %v234_v34 = vrot.slane %v233_v31, 1  ;;  %v274_v51 = vrot.slane %v273_v49, 2 }
 0x218   :  { %v235_v37 = vadd.f32 %v234_v34, %v233_v31  ;;  %v275_v54 = vadd.f32 %v274_v51, %v273_v49 }
 0x21a   :  { %v276_v56 = vrot.slane %v275_v54, 1 }
 0x21c   :  { %v277_v60 = vadd.f32 %v276_v56, %v275_v54 }
 0x23f   :  { %s2000_s28 = spop %1999 }
 0x240   :  { %s155_s29 = smul.f32 0.001953125, %s2000_s28 }
 0x242   :  { %s156_s30 = smul.f32 %s2000_s28, %s155_s29 }
 0x243   :  { %s2002_s10 = spop %2001 }
 0x244   :  { %s157_s11 = ssub.f32 %s2002_s10, %s156_s30 }
 0x246   :  { %s160_s12 = smul.f32 0.0019569471, %s157_s11 }
 0x248   :  { %s161_s13 = sadd.f32 1e-05, %s160_s12 }
 0x24a   :  { %v162_v5 = vstv %s161_s13 }
 0x24b   :  { %2114 = vrsqrt.f32 %v162_v5 }
 0x255   :  { %v2115_v10 = vpop.eup %2114 }
 0x256   :  { %2003 = vpush %v2115_v10  ;;  %v301_v10 = vmul.f32 %v2342_v8, %v2279_v15 }
 0x257   :  { %2005 = vpush %v182_v11  ;;  %v1898_v11 = vmul.f32 -1.442695, %v300_v9 }
 0x258   :  { %2007 = vpush %v193_v12  ;;  %v1899_v12 = vmul.f32 -1.442695, %v301_v10 }
 0x287   :  { %s2330_s14 = spop %2003 }
 0x288   :  { %s2006_s15 = spop %2005  ;;  %v165_v38 = vstv %s2330_s14 }
 0x289   :  { %s197_s16 = smul.f32 0.001953125, %s2006_s15  ;;  %s2008_s18 = spop %2007  ;;  %v166_v42 = vmul.f32 %v2299_v24, %v165_v38  ;;  %v340_v38 = vld [vmem:[%s2917_s4] sm:$0x3] }
 0x28b   :  { %s198_s17 = smul.f32 %s2006_s15, %s197_s16 }
 0x28d   :  { %s199_s19 = ssub.f32 %s2008_s18, %s198_s17  ;;  %s2185_s17 = smov 1  }
 0x28e   :  { %s2186_s18 = smov 17  }
 0x28f   :  { %s202_s20 = smul.f32 0.0019569471, %s199_s19  ;;  %s2187_s19 = smov 127  }
 0x291   :  { %s203_s21 = sadd.f32 1e-05, %s202_s20  ;;  %s2188_s20 = smov 113  }
 0x293   :  { %v204_v29 = vstv %s203_s21  ;;  %s2189_s21 = smov 16  }
 0x294   :  { %2116 = vrsqrt.f32 %v204_v29 }
 0x29e   :  { %v2117_v35 = vpop.eup %2116 }
 0x29f   :  { %2009 = vpush %v2117_v35 }
 0x2a0   :  { %2011 = vpush %v224_v36  ;;  %v2391_v36 = vand.u32 127, %v123_v21  ;;  %v345_v21 = vrot.slane %v340_v38, %v2397_v39 }
 0x2a1   :  { %2013 = vpush %v235_v37 }
 0x2a2   :  { %vm337_vm10 = vcmp.lt.s32.totalorder %v2391_v36, 17  ;;  %vm360_vm11 = vcmp.lt.s32.totalorder %v2391_v36, 16  ;;  %vm384_vm12 = vcmp.lt.s32.totalorder %v2391_v36, 15  ;;  %vm408_vm13 = vcmp.lt.s32.totalorder %v2391_v36, 1 }
 0x2a3   :  { %vm449_vm14 = vcmp.lt.s32.totalorder %v2391_v36, 127  ;;  %vm473_vm15 = vcmp.lt.s32.totalorder %v2391_v36, 113  ;;  %vm497_vm1 = vcmp.lt.s32.totalorder %v2391_v36, 112  ;;  %vm521_vm2 = vcmp.lt.s32.totalorder %v2391_v36, 111 }
 0x2d0   :  { %s2010_s22 = spop %2009 }
 0x2d1   :  { %v207_v41 = vstv %s2010_s22  ;;  %s2012_s23 = spop %2011  ;;  %s2190_s22 = smov 112  }
 0x2d2   :  { %v208_v43 = vmul.f32 %v2296_v23, %v207_v41  ;;  %s239_s24 = smul.f32 0.001953125, %s2012_s23  ;;  %s2014_s26 = spop %2013  ;;  %v2403_v41 = vsub.s32 1, %v2288_v22 }
 0x2d4   :  { %v209_v47 = vadd.f32 %v208_v43, %v166_v42  ;;  %s240_s25 = smul.f32 %s2012_s23, %s239_s24  ;;  %s2191_s23 = smov 111   ;;  %v369_v43 = vrot.slane %v1900_v40, %v2397_v39  ;;  %v349_v44 = vrot.slane %v340_v38, %v2403_v41  ;;  %v373_v46 = vrot.slane %v1900_v40, %v2403_v41 }
 0x2d5   :  { %s2192_s24 = smov 15  }
 0x2d6   :  { %s241_s1 = ssub.f32 %s2014_s26, %s240_s25 }
 0x2d8   :  { %s244_s27 = smul.f32 0.0019569471, %s241_s1 }
 0x2da   :  { %s245_s28 = sadd.f32 1e-05, %s244_s27 }
 0x2dc   :  { %v246_v52 = vstv %s245_s28 }
 0x2dd   :  { %2118 = vrsqrt.f32 %v246_v52 }
 0x2e7   :  { %v2119_v57 = vpop.eup %2118 }
 0x2e8   :  { %2015 = vpush %v2119_v57 }
 0x2e9   :  { %2017 = vpush %v266_v58 }
 0x2ea   :  { %2019 = vpush %v277_v60  ;;  %v1901_v60 = vld [vmem:[%s2917_s4 + $0x4] sm:$0x3] }
 0x319   :  { %s2016_s29 = spop %2015 }
 0x31a   :  { %v249_v61 = vstv %s2016_s29  ;;  %s2018_s30 = spop %2017 }
 0x31b   :  { %v250_v62 = vmul.f32 %v2302_v26, %v249_v61  ;;  %s281_s10 = smul.f32 0.001953125, %s2018_s30  ;;  %s2020_s12 = spop %2019  ;;  %v1902_v61 = vld [vmem:[%s2917_s4 + $0x6] sm:$0x3] }
 0x31d   :  { %v251_v63 = vadd.f32 %v250_v62, %v209_v47  ;;  %s282_s11 = smul.f32 %s2018_s30, %s281_s10 }
 0x31f   :  { %s283_s13 = ssub.f32 %s2020_s12, %s282_s11 }
 0x321   :  { %s286_s14 = smul.f32 0.0019569471, %s283_s13 }
 0x323   :  { %s287_s15 = sadd.f32 1e-05, %s286_s14 }
 0x325   :  { %v288_v0 = vstv %s287_s15 }
 0x326   :  { %2120 = vrsqrt.f32 %v288_v0  ;;  %v1903_v0 = vld [vmem:[%s2917_s4 + $0x8] sm:$0x3] }
 0x327   :  { %2122 = vpow2.f32 %v1898_v11 }
 0x328   :  { %2124 = vpow2.f32 %v1899_v12  ;;  %v438_v12 = vrot.slane %v1903_v0, %v2403_v41 }
 0x330   :  { %v2121_v1 = vpop.eup %2120 }
 0x331   :  { %2021 = vpush %v2121_v1  ;;  %v2123_v16 = vpop.eup %2122 }
 0x332   :  { %v2125_v17 = vpop.eup %2124  ;;  %v308_v18 = vadd.f32 1.0, %v2123_v16  ;;  %v434_v16 = vrot.slane %v1903_v0, %v2397_v39 }
 0x333   :  { %v309_v19 = vadd.f32 1.0, %v2125_v17 }
 0x334   :  { %2126 = vrcp.f32 %v308_v18 }
 0x335   :  { %2128 = vrcp.f32 %v309_v19 }
 0x362   :  { %s2022_s16 = spop %2021 }
 0x363   :  { %v291_v2 = vstv %s2022_s16 }
 0x364   :  { %v292_v4 = vmul.f32 %v2311_v33, %v291_v2  ;;  %v397_v2 = vrot.slane %v1901_v60, %v2403_v41 }
 0x366   :  { %v293_v5 = vadd.f32 %v292_v4, %v251_v63  ;;  %v393_v63 = vrot.slane %v1901_v60, %v2397_v39  ;;  %v417_v4 = vrot.slane %v1902_v61, %v2397_v39 }
 0x368   :  { %v294_v6 = vmul.f32 %v293_v5, %v2327_v45  ;;  %v421_v5 = vrot.slane %v1902_v61, %v2403_v41 }
 0x36a   :  { %318 = vperm.xlu1 %2108, %v294_v6   ;;  %v1904_v6 = vld [vmem:[%s2917_s4 + $0xa] sm:$0x3] }
 0x36b   :  { %v458_v19 = vrot.slane %v1904_v6, %v2397_v39 }
 0x36e   :  { %2109 = vset.pattern.permute.xlu1 %v2184_v7 }
 0x36f   :  { %324 = vperm.xlu1 %2109, %v2327_v45   ;;  %v2127_v45 = vpop.eup %2126 }
 0x370   :  { %v2129_v25 = vpop.eup %2128  ;;  %v314_v27 = vmul.f32 %v2127_v45, %v2277_v14  ;;  %v462_v45 = vrot.slane %v1904_v6, %v2403_v41  ;;  %v1916_v6 = vld [vmem:[%s2914_s0 + $0x48] sm:$0xff] }
 0x371   :  { %v315_v28 = vmul.f32 %v2129_v25, %v2279_v15 }
 0x373   :  { %2110 = vset.pattern.permute.xlu1 %v2183_v59 }
 0x3e9   :  { %v319_v20 = vpop.permute.xlu1 %318 }
 0x3ea   :  { %v321_v29 = vmul.f32 %v319_v20, %v314_v27  ;;  %v322_v31 = vmul.f32 %v319_v20, %v315_v28 }
 0x3ee   :  { %v2350_v30 = vpop.permute.xlu1 %324 }
 0x3ef   :  { %v327_v32 = vadd.f32 %v2350_v30, %v321_v29  ;;  %v328_v34 = vadd.f32 %v2350_v30, %v322_v31 }
 0x3f1   :  { %v2354_v35 = vmax.f32 %v327_v32, 0.0  ;;  %v2360_v14 = vmax.f32 %v328_v34, 0.0 }
 0x3f3   :  { %404 = vrot.lane.b32.xlu0 %v2354_v35, %s2185_s17  ;;  %331 = vrot.lane.b32.xlu1 %v2354_v35, %s2186_s18 }
 0x3f7   :  { %445 = vrot.lane.b32.xlu0 %v2354_v35, %s2187_s19  ;;  %333 = vrot.lane.b32.xlu1 %v2360_v14, %s2186_s18 }
 0x3fb   :  { %469 = vrot.lane.b32.xlu0 %v2354_v35, %s2188_s20  ;;  %356 = vrot.lane.b32.xlu1 %v2354_v35, %s2189_s21 }
 0x3ff   :  { %493 = vrot.lane.b32.xlu0 %v2354_v35, %s2190_s22  ;;  %358 = vrot.lane.b32.xlu1 %v2360_v14, %s2189_s21 }
 0x403   :  { %517 = vrot.lane.b32.xlu0 %v2354_v35, %s2191_s23  ;;  %380 = vrot.lane.b32.xlu1 %v2354_v35, %s2192_s24 }
 0x407   :  { %382 = vrot.lane.b32.xlu1 %v2360_v14, %s2192_s24 }
 0x40b   :  { %406 = vrot.lane.b32.xlu1 %v2360_v14, %s2185_s17 }
 0x40f   :  { %447 = vrot.lane.b32.xlu1 %v2360_v14, %s2187_s19 }
 0x413   :  { %471 = vrot.lane.b32.xlu1 %v2360_v14, %s2188_s20 }
 0x417   :  { %495 = vrot.lane.b32.xlu1 %v2360_v14, %s2190_s22 }
 0x41b   :  { %519 = vrot.lane.b32.xlu1 %v2360_v14, %s2191_s23 }
 0x465   :  { %v332_v15 = vpop.permute.xlu1 %331  ;;  %v405_v55 = vpop.permute.xlu0 %404 }
 0x469   :  { %v334_v37 = vpop.permute.xlu1 %333  ;;  %v446_v1 = vpop.permute.xlu0 %445 }
 0x46a   :  { %v338_v47 = vsel %vm337_vm10, %v332_v15, %v334_v37  ;;  %v339_v22 = vsel %vm337_vm10, %v334_v37, %v332_v15 }
 0x46b   :  { %v352_v51 = vmul.f32 %v345_v21, %v339_v22  ;;  %v353_v53 = vmul.f32 %v349_v44, %v338_v47  ;;  %v442_v21 = vmul.f32 %v438_v12, %v2360_v14  ;;  %v1906_v44 = vld [vmem:[%s2917_s4 + $0xe] sm:$0x3]  ;;  %v1915_v12 = vld [vmem:[%s2914_s0 + $0x40] sm:$0xff] }
 0x46c   :  { %v510_v14 = vrot.slane %v1906_v44, %v2403_v41 }
 0x46d   :  { %v357_v42 = vpop.permute.xlu1 %356  ;;  %v470_v29 = vpop.permute.xlu0 %469 }
 0x471   :  { %v359_v48 = vpop.permute.xlu1 %358 }
 0x472   :  { %v361_v49 = vsel %vm360_vm11, %v357_v42, %v359_v48  ;;  %v362_v50 = vsel %vm360_vm11, %v359_v48, %v357_v42  ;;  %v1905_v42 = vld [vmem:[%s2917_s4 + $0xc] sm:$0x3] }
 0x473   :  { %v376_v52 = vmul.f32 %v369_v43, %v362_v50  ;;  %v377_v54 = vmul.f32 %v373_v46, %v361_v49  ;;  %v441_v43 = vmul.f32 %v434_v16, %v2354_v35  ;;  %v482_v48 = vrot.slane %v1905_v42, %v2397_v39  ;;  %v494_v49 = vpop.permute.xlu0 %493  ;;  %v1917_v16 = vld [vmem:[%s2914_s0 + $0x50] sm:$0xff] }
 0x474   :  { %v486_v50 = vrot.slane %v1905_v42, %v2403_v41  ;;  %v506_v35 = vrot.slane %v1906_v44, %v2397_v39 }
 0x475   :  { %v381_v56 = vpop.permute.xlu1 %380  ;;  %v1957_v57 = vpack.c.bf16 %v377_v54, %v353_v53  ;;  %v1959_v58 = vpack.c.bf16 %v376_v52, %v352_v51  ;;  %v1907_v51 = vld [vmem:[%s2917_s4 + $0x10] sm:$0x3] }
 0x477   :  { %1958 = vmatprep.subr.bf16.mxu1 %v1957_v57  ;;  %v534_v57 = vrot.slane %v1907_v51, %v2403_v41 }
 0x478   :  { %1960 = vmatpush1.bf16.msra.mxu1 %v1959_v58 }
 0x479   :  { %v383_v62 = vpop.permute.xlu1 %382 }
 0x47a   :  { %v385_v9 = vsel %vm384_vm12, %v381_v56, %v383_v62  ;;  %v386_v10 = vsel %vm384_vm12, %v383_v62, %v381_v56 }
 0x47b   :  { %v400_v20 = vmul.f32 %v393_v63, %v386_v10  ;;  %v401_v25 = vmul.f32 %v397_v2, %v385_v9  ;;  %v518_v63 = vpop.permute.xlu0 %517  ;;  %v1918_v9 = vld [vmem:[%s2914_s0 + $0x58] sm:$0xff] }
 0x47d   :  { %v407_v11 = vpop.permute.xlu1 %406 }
 0x47e   :  { %v409_v17 = vsel %vm408_vm13, %v405_v55, %v407_v11  ;;  %v410_v18 = vsel %vm408_vm13, %v407_v11, %v405_v55 }
 0x47f   :  { %v424_v27 = vmul.f32 %v417_v4, %v410_v18  ;;  %v425_v28 = vmul.f32 %v421_v5, %v409_v17  ;;  %v530_v4 = vrot.slane %v1907_v51, %v2397_v39  ;;  %v1920_v17 = vld [vmem:[%s2914_s0 + $0x68] sm:$0xff]  ;;  %v1922_v18 = vld [vmem:[%s2914_s0 + $0x78] sm:$0xff] }
 0x481   :  { %v448_v31 = vpop.permute.xlu1 %447  ;;  %v1961_v32 = vpack.c.bf16 %v425_v28, %v401_v25  ;;  %v1963_v34 = vpack.c.bf16 %v424_v27, %v400_v20  ;;  %v541_v20 = vld [vmem:[%s2918_s2] sm:$0xff]  ;;  %v1975_v25 = vpack.c.bf16 %v1917_v16, %v1915_v12  ;;  %v1977_v27 = vpack.c.bf16 %v1922_v18, %v1920_v17 }
 0x482   :  { %v450_v15 = vsel %vm449_vm14, %v446_v1, %v448_v31  ;;  %v451_v37 = vsel %vm449_vm14, %v448_v31, %v446_v1  ;;  %v1919_v28 = vld [vmem:[%s2914_s0 + $0x60] sm:$0xff] }
 0x483   :  { %v465_v38 = vmul.f32 %v458_v19, %v450_v15  ;;  %v466_v40 = vmul.f32 %v462_v45, %v451_v37  ;;  %1962 = vmatprep.subr.bf16.mxu1 %v1961_v32  ;;  %v1973_v19 = vpack.c.bf16 %v1918_v9, %v1916_v6 }
 0x484   :  { %1964 = vmatpush1.bf16.msra.mxu1 %v1963_v34 }
 0x485   :  { %v472_v46 = vpop.permute.xlu1 %471  ;;  %v1965_v47 = vpack.c.bf16 %v466_v40, %v442_v21  ;;  %v1967_v22 = vpack.c.bf16 %v465_v38, %v441_v43 }
 0x486   :  { %v474_v52 = vsel %vm473_vm15, %v470_v29, %v472_v46  ;;  %v475_v53 = vsel %vm473_vm15, %v472_v46, %v470_v29  ;;  %v1921_v29 = vld [vmem:[%s2914_s0 + $0x70] sm:$0xff] }
 0x487   :  { %1966 = vmatprep.subr.bf16.mxu1 %v1965_v47  ;;  %v489_v58 = vmul.f32 %v482_v48, %v474_v52  ;;  %v490_v60 = vmul.f32 %v486_v50, %v475_v53  ;;  %v1979_v31 = vpack.c.bf16 %v1921_v29, %v1919_v28 }
 0x488   :  { %1968 = vmatpush1.bf16.msra.mxu1 %v1967_v22 }
 0x489   :  { %v496_v54 = vpop.permute.xlu1 %495 }
 0x48a   :  { %v498_v55 = vsel %vm497_vm1, %v494_v49, %v496_v54  ;;  %v499_v56 = vsel %vm497_vm1, %v496_v54, %v494_v49 }
 0x48b   :  { %v513_v61 = vmul.f32 %v506_v35, %v498_v55  ;;  %v514_v62 = vmul.f32 %v510_v14, %v499_v56 }
 0x48d   :  { %v520_v0 = vpop.permute.xlu1 %519  ;;  %v1969_v1 = vpack.c.bf16 %v514_v62, %v490_v60  ;;  %v1971_v2 = vpack.c.bf16 %v513_v61, %v489_v58 }
 0x48e   :  { %v523_v5 = vsel %vm521_vm2, %v520_v0, %v518_v63  ;;  %v522_v10 = vsel %vm521_vm2, %v518_v63, %v520_v0 }
 0x48f   :  { %v538_v11 = vmul.f32 %v534_v57, %v523_v5  ;;  %1970 = vmatprep.subr.bf16.mxu1 %v1969_v1  ;;  %v537_v45 = vmul.f32 %v530_v4, %v522_v10 }
 0x490   :  { %1972 = vmatpush1.bf16.msra.mxu1 %v1971_v2 }
 0x491   :  { %580 = vmatprep.subr.mxu1 %v538_v11 }
 0x494   :  { %581 = vmatpush1.msra.mxu1 %v537_v45 }
 0x495   :  { %1908 = vmatmul.mubr.msk.f32.vlgmr.msra.gmra.mrb[0].mxu1 %vm560_vm3, %v541_v20  ;;  %1974 = vmatprep.subr.bf16.mxu1 %v1973_v19 }
 0x496   :  { %1976 = vmatpush1.bf16.msra.mxu1 %v1975_v25  ;;  %1059 = vmatprep.mubr.f32.mxu1 %v2181_v3 }
 0x497   :  { %1978 = vmatprep.subr.bf16.mxu1 %v1977_v27 }
 0x49a   :  { %1980 = vmatpush1.bf16.msra.mxu1 %v1979_v31 }
 0x49d   :  { %1923 = vmatmul.mubr.msk.f32.vlgmr.msra.gmra.mrb[2].mxu1 %vm40_vm0, %v2272_v13  ;;  %vm832_vm0 = vcmask 64512  }
 0x49e   :  { %1805 = vmatprep.mubr.f32.mxu1 %v2181_v3 }
 0x568   :  { %v2518_v32 = vpop.f32.mrb[0].mxu1 }
 0x569   :  { %v2520_v34 = vpop.f32.mrb[1].mxu1  ;;  %v638_v15 = vmul.f32 %v2518_v32, %v2518_v32 }
 0x56a   :  { %v635_v37 = vadd.f32 %v2520_v34, %v2518_v32  ;;  %v639_v38 = vmul.f32 %v2520_v34, %v2520_v34 }
 0x56c   :  { %636 = vadd.xlane.f32.xlu0 %v635_v37  ;;  %v640_v40 = vadd.f32 %v639_v38, %v638_v15 }
 0x56e   :  { %641 = vadd.xlane.f32.xlu1 %v640_v40 }
 0x570   :  { %v2528_v42 = vpop.f32.mrb[2].mxu1 }
 0x571   :  { %v2530_v13 = vpop.f32.mrb[3].mxu1  ;;  %v1069_v43 = vmul.f32 %v2528_v42, %v2528_v42 }
 0x572   :  { %v1066_v21 = vadd.f32 %v2530_v13, %v2528_v42  ;;  %v1070_v44 = vmul.f32 %v2530_v13, %v2530_v13 }
 0x574   :  { %v1071_v46 = vadd.f32 %v1070_v44, %v1069_v43 }
 0x5f9   :  { %v637_v47 = vpop.xlane.xlu0 %636 }
 0x5fa   :  { %v680_v22 = vmul.f32 %v2296_v23, %v637_v47  ;;  %v643_v48 = vmul.f32 %v2299_v24, %v637_v47  ;;  %v717_v14 = vmul.f32 %v2302_v26, %v637_v47  ;;  %v754_v58 = vmul.f32 %v2311_v33, %v637_v47 }
 0x5fb   :  { %v642_v49 = vpop.xlane.xlu1 %641 }
 0x5fc   :  { %v681_v50 = vsel %vm131_vm8, %v680_v22, 0.0  ;;  %v644_v35 = vsel %vm131_vm8, %v643_v48, 0.0  ;;  %v654_v51 = vmul.f32 %v2299_v24, %v642_v49  ;;  %v718_v52 = vsel %vm131_vm8, %v717_v14, 0.0 }
 0x5fd   :  { %682 = vadd.xlane.f32.xlu1 %v681_v50  ;;  %645 = vadd.xlane.f32.xlu0 %v644_v35  ;;  %v691_v54 = vmul.f32 %v2296_v23, %v642_v49  ;;  %v728_v56 = vmul.f32 %v2302_v26, %v642_v49  ;;  %v755_v60 = vsel %vm131_vm8, %v754_v58, 0.0  ;;  %v765_v61 = vmul.f32 %v2311_v33, %v642_v49  ;;  %v2575_v50 = vld [vmem:[%s2919_s6] sm:$0xff] }
 0x5fe   :  { %v655_v53 = vsel %vm131_vm8, %v654_v51, 0.0 }
 0x5ff   :  { %v692_v55 = vsel %vm131_vm8, %v691_v54, 0.0  ;;  %v729_v57 = vsel %vm131_vm8, %v728_v56, 0.0  ;;  %v766_v62 = vsel %vm131_vm8, %v765_v61, 0.0 }
 0x601   :  { %719 = vadd.xlane.f32.xlu1 %v718_v52  ;;  %656 = vadd.xlane.f32.xlu0 %v655_v53 }
 0x605   :  { %1067 = vadd.xlane.f32.xlu1 %v1066_v21  ;;  %693 = vadd.xlane.f32.xlu0 %v692_v55 }
 0x609   :  { %1072 = vadd.xlane.f32.xlu1 %v1071_v46  ;;  %730 = vadd.xlane.f32.xlu0 %v729_v57 }
 0x60d   :  { %756 = vadd.xlane.f32.xlu0 %v755_v60 }
 0x611   :  { %767 = vadd.xlane.f32.xlu0 %v766_v62 }
 0x68a   :  { %v683_v63 = vpop.xlane.xlu1 %682  ;;  %v646_v0 = vpop.xlane.xlu0 %645 }
 0x68b   :  { %v647_v1 = vrot.slane %v646_v0, 4  ;;  %v684_v14 = vrot.slane %v683_v63, 4 }
 0x68d   :  { %v648_v2 = vadd.f32 %v647_v1, %v646_v0  ;;  %v685_v52 = vadd.f32 %v684_v14, %v683_v63 }
 0x68e   :  { %v2554_v4 = vpop.xlane.xlu1 %719  ;;  %v657_v5 = vpop.xlane.xlu0 %656 }
 0x68f   :  { %v649_v6 = vrot.slane %v648_v2, 2  ;;  %v658_v9 = vrot.slane %v657_v5, 4  ;;  %v686_v54 = vrot.slane %v685_v52, 2 }
 0x691   :  { %v659_v10 = vadd.f32 %v658_v9, %v657_v5  ;;  %v650_v11 = vadd.f32 %v649_v6, %v648_v2  ;;  %v687_v57 = vadd.f32 %v686_v54, %v685_v52  ;;  %v721_v2 = vrot.slane %v2554_v4, 4 }
 0x692   :  { %v1068_v12 = vpop.xlane.xlu1 %1067  ;;  %v694_v35 = vpop.xlane.xlu0 %693 }
 0x693   :  { %v660_v16 = vrot.slane %v659_v10, 2  ;;  %v651_v17 = vrot.slane %v650_v11, 1  ;;  %v1074_v18 = vmul.f32 %v2299_v24, %v1068_v12  ;;  %v1111_v19 = vmul.f32 %v2296_v23, %v1068_v12 }
 0x694   :  { %v1148_v37 = vmul.f32 %v2302_v26, %v1068_v12  ;;  %v1185_v46 = vmul.f32 %v2311_v33, %v1068_v12  ;;  %v695_v51 = vrot.slane %v694_v35, 4  ;;  %v688_v60 = vrot.slane %v687_v57, 1 }
 0x695   :  { %v652_v45 = vadd.f32 %v651_v17, %v650_v11  ;;  %v661_v20 = vadd.f32 %v660_v16, %v659_v10  ;;  %v1075_v27 = vsel %vm131_vm8, %v1074_v18, 0.0  ;;  %v1112_v15 = vsel %vm131_vm8, %v1111_v19, 0.0 }
 0x696   :  { %v1073_v25 = vpop.xlane.xlu1 %1072  ;;  %1076 = vadd.xlane.f32.xlu1 %v1075_v27  ;;  %v1149_v44 = vsel %vm131_vm8, %v1148_v37, 0.0  ;;  %v1186_v48 = vsel %vm131_vm8, %v1185_v46, 0.0  ;;  %v696_v53 = vadd.f32 %v695_v51, %v694_v35  ;;  %v689_v0 = vadd.f32 %v688_v60, %v687_v57  ;;  %v731_v63 = vpop.xlane.xlu0 %730 }
 0x697   :  { %2023 = vpush %v652_v45  ;;  %v1085_v28 = vmul.f32 %v2299_v24, %v1073_v25  ;;  %v662_v29 = vrot.slane %v661_v20, 1  ;;  %v1122_v31 = vmul.f32 %v2296_v23, %v1073_v25  ;;  %v1159_v43 = vmul.f32 %v2302_v26, %v1073_v25 }
 0x698   :  { %v1196_v22 = vmul.f32 %v2311_v33, %v1073_v25  ;;  %v697_v55 = vrot.slane %v696_v53, 2  ;;  %v732_v5 = vrot.slane %v731_v63, 4  ;;  %v722_v6 = vadd.f32 %v721_v2, %v2554_v4 }
 0x699   :  { %v1086_v38 = vsel %vm131_vm8, %v1085_v28, 0.0  ;;  %v663_v40 = vadd.f32 %v662_v29, %v661_v20  ;;  %v1123_v21 = vsel %vm131_vm8, %v1122_v31, 0.0  ;;  %v1160_v47 = vsel %vm131_vm8, %v1159_v43, 0.0 }
 0x69a   :  { %1087 = vadd.xlane.f32.xlu0 %v1086_v38  ;;  %1113 = vadd.xlane.f32.xlu1 %v1112_v15  ;;  %v1197_v49 = vsel %vm131_vm8, %v1196_v22, 0.0  ;;  %v698_v58 = vadd.f32 %v697_v55, %v696_v53  ;;  %v733_v9 = vadd.f32 %v732_v5, %v731_v63  ;;  %v723_v10 = vrot.slane %v722_v6, 2  ;;  %v757_v27 = vpop.xlane.xlu0 %756 }
 0x69b   :  { %2025 = vpush %v663_v40  ;;  %v758_v37 = vrot.slane %v757_v27, 4 }
 0x69c   :  { %v699_v61 = vrot.slane %v698_v58, 1  ;;  %v734_v11 = vrot.slane %v733_v9, 2  ;;  %v724_v16 = vadd.f32 %v723_v10, %v722_v6 }
 0x69e   :  { %1124 = vadd.xlane.f32.xlu0 %v1123_v21  ;;  %1150 = vadd.xlane.f32.xlu1 %v1149_v44  ;;  %v700_v1 = vadd.f32 %v699_v61, %v698_v58  ;;  %v735_v17 = vadd.f32 %v734_v11, %v733_v9  ;;  %v725_v18 = vrot.slane %v724_v16, 1  ;;  %v768_v28 = vpop.xlane.xlu0 %767  ;;  %v759_v21 = vadd.f32 %v758_v37, %v757_v27 }
 0x69f   :  { %v769_v38 = vrot.slane %v768_v28, 4 }
 0x6a0   :  { %v736_v19 = vrot.slane %v735_v17, 1  ;;  %v726_v20 = vadd.f32 %v725_v18, %v724_v16  ;;  %v760_v44 = vrot.slane %v759_v21, 2 }
 0x6a1   :  { %v770_v43 = vadd.f32 %v769_v38, %v768_v28 }
 0x6a2   :  { %1161 = vadd.xlane.f32.xlu0 %v1160_v47  ;;  %1187 = vadd.xlane.f32.xlu1 %v1186_v48  ;;  %v737_v25 = vadd.f32 %v736_v19, %v735_v17  ;;  %v761_v22 = vadd.f32 %v760_v44, %v759_v21 }
 0x6a3   :  { %v771_v46 = vrot.slane %v770_v43, 2 }
 0x6a5   :  { %v772_v48 = vadd.f32 %v771_v46, %v770_v43 }
 0x6a6   :  { %1198 = vadd.xlane.f32.xlu0 %v1197_v49  ;;  %v762_v49 = vrot.slane %v761_v22, 1 }
 0x6a7   :  { %v773_v35 = vrot.slane %v772_v48, 1 }
 0x6a8   :  { %v763_v51 = vadd.f32 %v762_v49, %v761_v22 }
 0x6a9   :  { %v774_v52 = vadd.f32 %v773_v35, %v772_v48 }
 0x6bc   :  { %794 = vperm.xlu0 %2107, %v2575_v50  }
 0x6c0   :  { %2113 = vset.pattern.permute.xlu0 %v2183_v59 }
 0x6c8   :  { %s2024_s12 = spop %2023 }
 0x6c9   :  { %s667_s13 = smul.f32 0.001953125, %s2024_s12 }
 0x6cb   :  { %s668_s14 = smul.f32 %s2024_s12, %s667_s13 }
 0x6cc   :  { %s2026_s15 = spop %2025 }
 0x6cd   :  { %s669_s16 = ssub.f32 %s2026_s15, %s668_s14 }
 0x6cf   :  { %s672_s25 = smul.f32 0.0019569471, %s669_s16 }
 0x6d1   :  { %s673_s26 = sadd.f32 1e-05, %s672_s25 }
 0x6d3   :  { %v674_v56 = vstv %s673_s26 }
 0x6d4   :  { %2130 = vrsqrt.f32 %v674_v56 }
 0x6de   :  { %v2131_v62 = vpop.eup %2130 }
 0x6df   :  { %2027 = vpush %v2131_v62 }
 0x6e0   :  { %2029 = vpush %v689_v0 }
 0x6e1   :  { %2031 = vpush %v700_v1 }
 0x710   :  { %s2579_s1 = spop %2027 }
 0x711   :  { %s2030_s27 = spop %2029  ;;  %v677_v4 = vstv %s2579_s1 }
 0x712   :  { %s704_s28 = smul.f32 0.001953125, %s2030_s27  ;;  %s2032_s30 = spop %2031  ;;  %v678_v31 = vmul.f32 %v2299_v24, %v677_v4 }
 0x714   :  { %s705_s29 = smul.f32 %s2030_s27, %s704_s28 }
 0x716   :  { %s706_s10 = ssub.f32 %s2032_s30, %s705_s29 }
 0x718   :  { %s709_s0 = smul.f32 0.0019569471, %s706_s10 }
 0x71a   :  { %s710_s11 = sadd.f32 1e-05, %s709_s0 }
 0x71c   :  { %v711_v12 = vstv %s710_s11 }
 0x71d   :  { %2132 = vrsqrt.f32 %v711_v12 }
 0x723   :  { %v1077_v54 = vpop.xlane.xlu1 %1076 }
 0x724   :  { %v1078_v57 = vrot.slane %v1077_v54, 4 }
 0x726   :  { %v1079_v61 = vadd.f32 %v1078_v57, %v1077_v54 }
 0x727   :  { %v2133_v45 = vpop.eup %2132  ;;  %v1088_v56 = vpop.xlane.xlu0 %1087 }
 0x728   :  { %2033 = vpush %v2133_v45  ;;  %v1089_v58 = vrot.slane %v1088_v56, 4  ;;  %v1080_v0 = vrot.slane %v1079_v61, 2  ;;  %v1114_v17 = vpop.xlane.xlu1 %1113 }
 0x729   :  { %2035 = vpush %v726_v20  ;;  %v1115_v45 = vrot.slane %v1114_v17, 4 }
 0x72a   :  { %2037 = vpush %v737_v25  ;;  %v1090_v62 = vadd.f32 %v1089_v58, %v1088_v56  ;;  %v1081_v2 = vadd.f32 %v1080_v0, %v1079_v61 }
 0x72b   :  { %v1125_v19 = vpop.xlane.xlu0 %1124  ;;  %v1116_v27 = vadd.f32 %v1115_v45, %v1114_v17 }
 0x72c   :  { %v1091_v1 = vrot.slane %v1090_v62, 2  ;;  %v1082_v6 = vrot.slane %v1081_v2, 1  ;;  %v1126_v20 = vrot.slane %v1125_v19, 4  ;;  %v1151_v46 = vpop.xlane.xlu1 %1150 }
 0x72d   :  { %v1117_v28 = vrot.slane %v1116_v27, 2  ;;  %v1152_v22 = vrot.slane %v1151_v46, 4 }
 0x72e   :  { %v1092_v5 = vadd.f32 %v1091_v1, %v1090_v62  ;;  %v1083_v11 = vadd.f32 %v1082_v6, %v1081_v2  ;;  %v1127_v4 = vadd.f32 %v1126_v20, %v1125_v19 }
 0x72f   :  { %v1153_v49 = vadd.f32 %v1152_v22, %v1151_v46  ;;  %v1223_v22 = vmul.f32 %v2528_v42, %v2342_v8 }
 0x730   :  { %v1093_v9 = vrot.slane %v1092_v5, 1  ;;  %v1188_v62 = vpop.xlane.xlu1 %1187 }
 0x732   :  { %v1094_v12 = vadd.f32 %v1093_v9, %v1092_v5  ;;  %v1189_v5 = vrot.slane %v1188_v62, 4 }
 0x759   :  { %s2034_s12 = spop %2033 }
 0x75a   :  { %v714_v29 = vstv %s2034_s12  ;;  %s2036_s13 = spop %2035 }
 0x75b   :  { %v715_v15 = vmul.f32 %v2296_v23, %v714_v29  ;;  %s741_s14 = smul.f32 0.001953125, %s2036_s13  ;;  %s2038_s16 = spop %2037  ;;  %v1128_v29 = vrot.slane %v1127_v4, 2 }
 0x75d   :  { %v716_v40 = vadd.f32 %v715_v15, %v678_v31  ;;  %s742_s15 = smul.f32 %s2036_s13, %s741_s14  ;;  %v1118_v15 = vadd.f32 %v1117_v28, %v1116_v27  ;;  %v1129_v37 = vadd.f32 %v1128_v29, %v1127_v4 }
 0x75f   :  { %s743_s25 = ssub.f32 %s2038_s16, %s742_s15  ;;  %v1119_v38 = vrot.slane %v1118_v15, 1 }
 0x761   :  { %s746_s26 = smul.f32 0.0019569471, %s743_s25  ;;  %v1120_v43 = vadd.f32 %v1119_v38, %v1118_v15 }
 0x763   :  { %s747_s27 = sadd.f32 1e-05, %s746_s26 }
 0x765   :  { %v748_v47 = vstv %s747_s27 }
 0x766   :  { %2134 = vrsqrt.f32 %v748_v47  ;;  %v1162_v47 = vpop.xlane.xlu0 %1161 }
 0x767   :  { %v1163_v48 = vrot.slane %v1162_v47, 4 }
 0x769   :  { %v1164_v35 = vadd.f32 %v1163_v48, %v1162_v47  ;;  %v1224_v48 = vmul.f32 %v2530_v13, %v2342_v8 }
 0x76a   :  { %v1199_v2 = vpop.xlane.xlu0 %1198 }
 0x76b   :  { %v1200_v6 = vrot.slane %v1199_v2, 4 }
 0x770   :  { %v2135_v14 = vpop.eup %2134 }
 0x771   :  { %2039 = vpush %v2135_v14  ;;  %v1154_v14 = vrot.slane %v1153_v49, 2 }
 0x772   :  { %2041 = vpush %v763_v51  ;;  %v1165_v51 = vrot.slane %v1164_v35, 2 }
 0x773   :  { %2043 = vpush %v774_v52 }
 0x774   :  { %v1166_v54 = vadd.f32 %v1165_v51, %v1164_v35  ;;  %v2609_v35 = vpop.permute.xlu0 %794 }
 0x776   :  { %v1167_v56 = vrot.slane %v1166_v54, 1 }
 0x7a2   :  { %s2040_s1 = spop %2039 }
 0x7a3   :  { %v751_v53 = vstv %s2040_s1  ;;  %s2042_s28 = spop %2041 }
 0x7a4   :  { %v752_v55 = vmul.f32 %v2302_v26, %v751_v53  ;;  %s778_s29 = smul.f32 0.001953125, %s2042_s28  ;;  %s2044_s10 = spop %2043  ;;  %v1155_v53 = vadd.f32 %v1154_v14, %v1153_v49  ;;  %v1924_v49 = vmul.f32 -1.442695, %v1223_v22  ;;  %v1925_v14 = vmul.f32 -1.442695, %v1224_v48 }
 0x7a6   :  { %v753_v60 = vadd.f32 %v752_v55, %v716_v40  ;;  %s779_s30 = smul.f32 %s2042_s28, %s778_s29  ;;  %v1130_v40 = vrot.slane %v1129_v37, 1  ;;  %v1156_v55 = vrot.slane %v1155_v53, 1 }
 0x7a8   :  { %s780_s0 = ssub.f32 %s2044_s10, %s779_s30  ;;  %v1131_v44 = vadd.f32 %v1130_v40, %v1129_v37  ;;  %v1157_v58 = vadd.f32 %v1156_v55, %v1155_v53 }
 0x7aa   :  { %s783_s11 = smul.f32 0.0019569471, %s780_s0 }
 0x7ac   :  { %s784_s12 = sadd.f32 1e-05, %s783_s11 }
 0x7ae   :  { %v785_v63 = vstv %s784_s12 }
 0x7af   :  { %2136 = vrsqrt.f32 %v785_v63 }
 0x7b9   :  { %v2137_v10 = vpop.eup %2136 }
 0x7ba   :  { %2045 = vpush %v2137_v10  ;;  %v1190_v10 = vadd.f32 %v1189_v5, %v1188_v62 }
 0x7bb   :  { %2047 = vpush %v1083_v11  ;;  %v1201_v11 = vadd.f32 %v1200_v6, %v1199_v2 }
 0x7bc   :  { %2049 = vpush %v1094_v12  ;;  %v1191_v12 = vrot.slane %v1190_v10, 2 }
 0x7eb   :  { %s2046_s13 = spop %2045 }
 0x7ec   :  { %v788_v16 = vstv %s2046_s13  ;;  %s2048_s14 = spop %2047 }
 0x7ed   :  { %v789_v18 = vmul.f32 %v2311_v33, %v788_v16  ;;  %s1098_s15 = smul.f32 0.001953125, %s2048_s14  ;;  %s2050_s25 = spop %2049  ;;  %v1202_v16 = vrot.slane %v1201_v11, 2 }
 0x7ef   :  { %v2588_v25 = vadd.f32 %v789_v18, %v753_v60  ;;  %s1099_s16 = smul.f32 %s2048_s14, %s1098_s15  ;;  %v1168_v60 = vadd.f32 %v1167_v56, %v1166_v54  ;;  %v1192_v18 = vadd.f32 %v1191_v12, %v1190_v10  ;;  %v1203_v19 = vadd.f32 %v1202_v16, %v1201_v11 }
 0x7f1   :  { %s1100_s26 = ssub.f32 %s2050_s25, %s1099_s16  ;;  %v1193_v45 = vrot.slane %v1192_v18, 1  ;;  %v1204_v20 = vrot.slane %v1203_v19, 1  ;;  %v791_v47 = vmul.f32 %v2588_v25, %v2575_v50  ;;  %v797_v25 = vmul.f32 %v2609_v35, %v2518_v32 }
 0x7f3   :  { %s1103_s27 = smul.f32 0.0019569471, %s1100_s26  ;;  %v1194_v4 = vadd.f32 %v1193_v45, %v1192_v18  ;;  %v1205_v28 = vadd.f32 %v1204_v20, %v1203_v19  ;;  %v2640_v45 = vld [vmem:[%s2920_s3] sm:$0xff]  ;;  %v2652_v20 = vld [vmem:[%s2920_s3 + $0x8] sm:$0xff] }
 0x7f5   :  { %s1104_s1 = sadd.f32 1e-05, %s1103_s27 }
 0x7f7   :  { %v1105_v31 = vstv %s1104_s1 }
 0x7f8   :  { %2138 = vrsqrt.f32 %v1105_v31 }
 0x802   :  { %v2139_v21 = vpop.eup %2138 }
 0x803   :  { %2051 = vpush %v2139_v21 }
 0x804   :  { %2053 = vpush %v1120_v43 }
 0x805   :  { %2055 = vpush %v1131_v44  ;;  %v2178_v44 = vld [vmem:[%s2916_s5] sm:$0xff] }
 0x834   :  { %s2590_s28 = spop %2051 }
 0x835   :  { %s2054_s29 = spop %2053  ;;  %v1108_v61 = vstv %s2590_s28 }
 0x836   :  { %s1135_s30 = smul.f32 0.001953125, %s2054_s29  ;;  %s2056_s0 = spop %2055  ;;  %v1109_v1 = vmul.f32 %v2299_v24, %v1108_v61 }
 0x838   :  { %s1136_s10 = smul.f32 %s2054_s29, %s1135_s30 }
 0x83a   :  { %s1137_s11 = ssub.f32 %s2056_s0, %s1136_s10 }
 0x83c   :  { %s1140_s12 = smul.f32 0.0019569471, %s1137_s11 }
 0x83e   :  { %s1141_s13 = sadd.f32 1e-05, %s1140_s12 }
 0x840   :  { %v1142_v52 = vstv %s1141_s13 }
 0x841   :  { %2140 = vrsqrt.f32 %v1142_v52 }
 0x84b   :  { %v2141_v57 = vpop.eup %2140 }
 0x84c   :  { %2057 = vpush %v2141_v57 }
 0x84d   :  { %2059 = vpush %v1157_v58 }
 0x84e   :  { %2061 = vpush %v1168_v60 }
 0x87d   :  { %s2058_s14 = spop %2057 }
 0x87e   :  { %v1145_v0 = vstv %s2058_s14  ;;  %s2060_s15 = spop %2059 }
 0x87f   :  { %v1146_v63 = vmul.f32 %v2296_v23, %v1145_v0  ;;  %s1172_s16 = smul.f32 0.001953125, %s2060_s15  ;;  %s2062_s26 = spop %2061 }
 0x881   :  { %v1147_v9 = vadd.f32 %v1146_v63, %v1109_v1  ;;  %s1173_s25 = smul.f32 %s2060_s15, %s1172_s16 }
 0x883   :  { %s1174_s27 = ssub.f32 %s2062_s26, %s1173_s25 }
 0x885   :  { %s1177_s1 = smul.f32 0.0019569471, %s1174_s27 }
 0x887   :  { %s1178_s28 = sadd.f32 1e-05, %s1177_s1 }
 0x889   :  { %v1179_v17 = vstv %s1178_s28 }
 0x88a   :  { %2142 = vrsqrt.f32 %v1179_v17 }
 0x894   :  { %v2143_v27 = vpop.eup %2142 }
 0x895   :  { %2063 = vpush %v2143_v27  ;;  %v2664_v27 = vld [vmem:[%s2920_s3 + $0x10] sm:$0xff] }
 0x896   :  { %2065 = vpush %v1194_v4  ;;  %v2676_v4 = vld [vmem:[%s2920_s3 + $0x18] sm:$0xff] }
 0x897   :  { %2067 = vpush %v1205_v28  ;;  %v1256_v28 = vld [vmem:[%s2917_s4] sm:$0x3] }
 0x8c6   :  { %s2064_s29 = spop %2063 }
 0x8c7   :  { %v1182_v29 = vstv %s2064_s29  ;;  %s2066_s30 = spop %2065 }
 0x8c8   :  { %v1183_v31 = vmul.f32 %v2302_v26, %v1182_v29  ;;  %s1209_s10 = smul.f32 0.001953125, %s2066_s30  ;;  %s2068_s11 = spop %2067  ;;  %v1926_v29 = vld [vmem:[%s2917_s4 + $0x2] sm:$0x3] }
 0x8ca   :  { %v1184_v15 = vadd.f32 %v1183_v31, %v1147_v9  ;;  %s1210_s0 = smul.f32 %s2066_s30, %s1209_s10 }
 0x8cc   :  { %s1211_s12 = ssub.f32 %s2068_s11, %s1210_s0 }
 0x8ce   :  { %s1214_s13 = smul.f32 0.0019569471, %s1211_s12 }
 0x8d0   :  { %s1215_s14 = sadd.f32 1e-05, %s1214_s13 }
 0x8d2   :  { %v1216_v37 = vstv %s1215_s14 }
 0x8d3   :  { %2144 = vrsqrt.f32 %v1216_v37  ;;  %v1261_v37 = vrot.slane %v1256_v28, %v2397_v39 }
 0x8d4   :  { %2146 = vpow2.f32 %v1924_v49 }
 0x8d5   :  { %2148 = vpow2.f32 %v1925_v14 }
 0x8dd   :  { %v2145_v38 = vpop.eup %2144 }
 0x8de   :  { %2069 = vpush %v2145_v38  ;;  %v2147_v51 = vpop.eup %2146  ;;  %v1265_v38 = vrot.slane %v1256_v28, %v2403_v41 }
 0x8df   :  { %v2149_v52 = vpop.eup %2148  ;;  %v1231_v53 = vadd.f32 1.0, %v2147_v51 }
 0x8e0   :  { %v1232_v8 = vadd.f32 1.0, %v2149_v52 }
 0x90f   :  { %s2070_s15 = spop %2069 }
 0x910   :  { %v1219_v40 = vstv %s2070_s15 }
 0x911   :  { %v1220_v21 = vmul.f32 %v2311_v33, %v1219_v40  ;;  %v1283_v40 = vrot.slane %v1926_v29, %v2397_v39 }
 0x913   :  { %v1221_v43 = vadd.f32 %v1220_v21, %v1184_v15  ;;  %v1287_v21 = vrot.slane %v1926_v29, %v2403_v41 }
 0x915   :  { %v1222_v46 = vmul.f32 %v2178_v44, %v1221_v43 }
 0x917   :  { %1241 = vperm.xlu1 %2110, %v1222_v46  }
 0x91b   :  { %815 = vperm.xlu1 %2110, %v791_v47  }
 0x91f   :  { %2111 = vset.pattern.permute.xlu1 %v2184_v7  ;;  %v798_v7 = vmul.f32 %v2609_v35, %v2520_v34 }
 0x920   :  { %821 = vperm.xlu1 %2111, %v2575_v50   ;;  %v1909_v50 = vmul.f32 -1.442695, %v797_v25 }
 0x922   :  { %2150 = vpow2.f32 %v1909_v50  ;;  %v1927_v50 = vld [vmem:[%s2917_s4 + $0x4] sm:$0x3] }
 0x924   :  { %2112 = vset.pattern.permute.xlu1 %v2183_v59  ;;  %v1910_v59 = vmul.f32 -1.442695, %v798_v7 }
 0x926   :  { %2152 = vpow2.f32 %v1910_v59  ;;  %v1928_v59 = vld [vmem:[%s2917_s4 + $0x6] sm:$0x3] }
 0x927   :  { %2154 = vrcp.f32 %v1231_v53 }
 0x928   :  { %2156 = vrcp.f32 %v1232_v8 }
 0x92c   :  { %v2151_v54 = vpop.eup %2150 }
 0x92d   :  { %v805_v56 = vadd.f32 1.0, %v2151_v54  ;;  %v1929_v54 = vld [vmem:[%s2917_s4 + $0x8] sm:$0x3] }
 0x92f   :  { %2158 = vrcp.f32 %v805_v56  ;;  %v1309_v56 = vrot.slane %v1927_v50, %v2403_v41 }
 0x930   :  { %v2153_v55 = vpop.eup %2152 }
 0x931   :  { %v806_v57 = vadd.f32 1.0, %v2153_v55  ;;  %v2155_v58 = vpop.eup %2154  ;;  %v1305_v55 = vrot.slane %v1927_v50, %v2397_v39 }
 0x932   :  { %v2157_v60 = vpop.eup %2156  ;;  %v1237_v61 = vmul.f32 %v2155_v58, %v2528_v42  ;;  %v1331_v58 = vrot.slane %v1928_v59, %v2403_v41 }
 0x933   :  { %2160 = vrcp.f32 %v806_v57  ;;  %v1238_v62 = vmul.f32 %v2157_v60, %v2530_v13  ;;  %v1327_v57 = vrot.slane %v1928_v59, %v2397_v39  ;;  %v1930_v60 = vld [vmem:[%s2917_s4 + $0xa] sm:$0x3] }
 0x939   :  { %v2159_v2 = vpop.eup %2158 }
 0x93a   :  { %v811_v16 = vmul.f32 %v2159_v2, %v2518_v32  ;;  %v1347_v2 = vrot.slane %v1929_v54, %v2403_v41 }
 0x93d   :  { %v2161_v5 = vpop.eup %2160 }
 0x93e   :  { %v812_v42 = vmul.f32 %v2161_v5, %v2520_v34 }
 0x996   :  { %v1242_v0 = vpop.permute.xlu1 %1241 }
 0x997   :  { %v1244_v1 = vmul.f32 %v1242_v0, %v1237_v61  ;;  %v1245_v63 = vmul.f32 %v1242_v0, %v1238_v62 }
 0x999   :  { %v1246_v6 = vadd.f32 %v1244_v1, %v2350_v30  ;;  %v1247_v9 = vadd.f32 %v1245_v63, %v2350_v30  ;;  %v1343_v63 = vrot.slane %v1929_v54, %v2397_v39 }
 0x99a   :  { %v816_v10 = vpop.permute.xlu1 %815 }
 0x99b   :  { %v2619_v11 = vmax.f32 %v1246_v6, 0.0  ;;  %v2621_v12 = vmax.f32 %v1247_v9, 0.0  ;;  %v818_v13 = vmul.f32 %v816_v10, %v811_v16  ;;  %v819_v17 = vmul.f32 %v816_v10, %v812_v42 }
 0x99c   :  { %v1365_v9 = vrot.slane %v1930_v60, %v2397_v39  ;;  %v1369_v10 = vrot.slane %v1930_v60, %v2403_v41 }
 0x99d   :  { %1252 = vrot.lane.b32.xlu1 %v2621_v12, %s2186_s18  ;;  %1250 = vrot.lane.b32.xlu0 %v2619_v11, %s2186_s18 }
 0x99f   :  { %v2629_v18 = vpop.permute.xlu1 %821 }
 0x9a0   :  { %v824_v30 = vadd.f32 %v2629_v18, %v818_v13  ;;  %v825_v19 = vadd.f32 %v2629_v18, %v819_v17 }
 0x9a1   :  { %1274 = vrot.lane.b32.xlu1 %v2621_v12, %s2189_s21  ;;  %1272 = vrot.lane.b32.xlu0 %v2619_v11, %s2189_s21 }
 0x9a2   :  { %v826_v32 = vmax.f32 %v824_v30, 0.0  ;;  %v827_v34 = vmax.f32 %v825_v19, 0.0 }
 0x9a4   :  { %845 = vmatprep.subr.mxu0 %v827_v34 }
 0x9a5   :  { %1296 = vrot.lane.b32.xlu1 %v2621_v12, %s2192_s24  ;;  %1294 = vrot.lane.b32.xlu0 %v2619_v11, %s2192_s24 }
 0x9a6   :  { %846 = vmatpush1.msra.mxu0 %v826_v32 }
 0x9a7   :  { %1911 = vmatmul.mubr.msk.f32.vlgmr.msra.gmra.mrb[2].mxu0 %vm832_vm0, %v2640_v45 }
 0x9a8   :  { %915 = vmatprep.mubr.f32.mxu0 %v2181_v3 }
 0x9a9   :  { %1318 = vrot.lane.b32.xlu1 %v2621_v12, %s2185_s17  ;;  %1316 = vrot.lane.b32.xlu0 %v2619_v11, %s2185_s17 }
 0x9ab   :  { %1912 = vmatmul.mubr.msk.f32.gmra.mrb[4].mxu0 %vm832_vm0, %v2652_v20 }
 0x9ac   :  { %921 = vmatprep.mubr.f32.mxu0 %v2181_v3 }
 0x9ad   :  { %1356 = vrot.lane.b32.xlu1 %v2621_v12, %s2187_s19  ;;  %1354 = vrot.lane.b32.xlu0 %v2619_v11, %s2187_s19 }
 0x9af   :  { %1913 = vmatmul.mubr.msk.f32.gmra.mrb[6].mxu0 %vm832_vm0, %v2664_v27 }
 0x9b0   :  { %927 = vmatprep.mubr.f32.mxu0 %v2181_v3 }
 0x9b1   :  { %1378 = vrot.lane.b32.xlu1 %v2621_v12, %s2188_s20  ;;  %1376 = vrot.lane.b32.xlu0 %v2619_v11, %s2188_s20 }
 0x9b3   :  { %1914 = vmatmul.mubr.msk.f32.gmra.mrb[8].mxu0 %vm832_vm0, %v2676_v4 }
 0x9b4   :  { %1528 = vmatprep.mubr.f32.mxu0 %v2181_v3 }
 0x9b5   :  { %1400 = vrot.lane.b32.xlu1 %v2621_v12, %s2190_s22  ;;  %1398 = vrot.lane.b32.xlu0 %v2619_v11, %s2190_s22 }
 0x9b9   :  { %1422 = vrot.lane.b32.xlu1 %v2621_v12, %s2191_s23  ;;  %1420 = vrot.lane.b32.xlu0 %v2619_v11, %s2191_s23 }
 0xa0f   :  { %v1253_v31 = vpop.permute.xlu1 %1252  ;;  %v1251_v15 = vpop.permute.xlu0 %1250 }
 0xa10   :  { %v1254_v43 = vsel %vm337_vm10, %v1251_v15, %v1253_v31  ;;  %v1255_v44 = vsel %vm337_vm10, %v1253_v31, %v1251_v15  ;;  %v1350_v31 = vmul.f32 %v1343_v63, %v2619_v11  ;;  %v2179_v63 = vld [vmem:[%s2918_s2] sm:$0xff] }
 0xa11   :  { %v1268_v49 = vmul.f32 %v1261_v37, %v1255_v44  ;;  %v1269_v14 = vmul.f32 %v1265_v38, %v1254_v43  ;;  %v1351_v38 = vmul.f32 %v1347_v2, %v2621_v12 }
 0xa13   :  { %v1275_v46 = vpop.permute.xlu1 %1274  ;;  %v1273_v47 = vpop.permute.xlu0 %1272 }
 0xa14   :  { %v1276_v22 = vsel %vm360_vm11, %v1273_v47, %v1275_v46  ;;  %v1277_v48 = vsel %vm360_vm11, %v1275_v46, %v1273_v47 }
 0xa15   :  { %v1290_v25 = vmul.f32 %v1283_v40, %v1277_v48  ;;  %v1291_v7 = vmul.f32 %v1287_v21, %v1276_v22  ;;  %v1931_v40 = vld [vmem:[%s2917_s4 + $0xc] sm:$0x3]  ;;  %v1932_v21 = vld [vmem:[%s2917_s4 + $0xe] sm:$0x3] }
 0xa16   :  { %v1387_v11 = vrot.slane %v1931_v40, %v2397_v39  ;;  %v1391_v22 = vrot.slane %v1931_v40, %v2403_v41  ;;  %v1409_v12 = vrot.slane %v1932_v21, %v2397_v39  ;;  %v1413_v48 = vrot.slane %v1932_v21, %v2403_v41 }
 0xa17   :  { %v1983_v51 = vpack.c.bf16 %v1290_v25, %v1268_v49  ;;  %v1297_v52 = vpop.permute.xlu1 %1296  ;;  %v1295_v53 = vpop.permute.xlu0 %1294  ;;  %v1981_v8 = vpack.c.bf16 %v1291_v7, %v1269_v14  ;;  %v1933_v49 = vld [vmem:[%s2917_s4 + $0x10] sm:$0x3] }
 0xa18   :  { %v1298_v61 = vsel %vm384_vm12, %v1295_v53, %v1297_v52  ;;  %v1299_v62 = vsel %vm384_vm12, %v1297_v52, %v1295_v53  ;;  %v1435_v52 = vrot.slane %v1933_v49, %v2403_v41 }
 0xa19   :  { %1982 = vmatprep.subr.bf16.mxu0 %v1981_v8  ;;  %v1312_v16 = vmul.f32 %v1305_v55, %v1299_v62  ;;  %v1313_v42 = vmul.f32 %v1309_v56, %v1298_v61  ;;  %v1431_v61 = vrot.slane %v1933_v49, %v2397_v39 }
 0xa1a   :  { %1984 = vmatpush1.bf16.msra.mxu0 %v1983_v51 }
 0xa1b   :  { %v1319_v0 = vpop.permute.xlu1 %1318  ;;  %v1317_v1 = vpop.permute.xlu0 %1316 }
 0xa1c   :  { %v1320_v5 = vsel %vm408_vm13, %v1317_v1, %v1319_v0  ;;  %v1321_v6 = vsel %vm408_vm13, %v1319_v0, %v1317_v1 }
 0xa1d   :  { %v1334_v13 = vmul.f32 %v1327_v57, %v1321_v6  ;;  %v1335_v17 = vmul.f32 %v1331_v58, %v1320_v5 }
 0xa1f   :  { %v1987_v30 = vpack.c.bf16 %v1334_v13, %v1312_v16  ;;  %v1357_v19 = vpop.permute.xlu1 %1356  ;;  %v1355_v32 = vpop.permute.xlu0 %1354  ;;  %v1985_v34 = vpack.c.bf16 %v1335_v17, %v1313_v42 }
 0xa20   :  { %v1358_v28 = vsel %vm449_vm14, %v1355_v32, %v1357_v19  ;;  %v1359_v29 = vsel %vm449_vm14, %v1357_v19, %v1355_v32 }
 0xa21   :  { %v1372_v15 = vmul.f32 %v1365_v9, %v1358_v28  ;;  %v1373_v37 = vmul.f32 %v1369_v10, %v1359_v29  ;;  %1986 = vmatprep.subr.bf16.mxu0 %v1985_v34 }
 0xa22   :  { %1988 = vmatpush1.bf16.msra.mxu0 %v1987_v30 }
 0xa23   :  { %v1991_v43 = vpack.c.bf16 %v1372_v15, %v1350_v31  ;;  %v1379_v44 = vpop.permute.xlu1 %1378  ;;  %v1377_v46 = vpop.permute.xlu0 %1376  ;;  %v1989_v47 = vpack.c.bf16 %v1373_v37, %v1351_v38 }
 0xa24   :  { %v1380_v14 = vsel %vm473_vm15, %v1377_v46, %v1379_v44  ;;  %v1381_v25 = vsel %vm473_vm15, %v1379_v44, %v1377_v46 }
 0xa25   :  { %1990 = vmatprep.subr.bf16.mxu0 %v1989_v47  ;;  %v1394_v53 = vmul.f32 %v1387_v11, %v1380_v14  ;;  %v1395_v8 = vmul.f32 %v1391_v22, %v1381_v25 }
 0xa26   :  { %1992 = vmatpush1.bf16.msra.mxu0 %v1991_v43 }
 0xa27   :  { %v1401_v7 = vpop.permute.xlu1 %1400  ;;  %v1399_v50 = vpop.permute.xlu0 %1398 }
 0xa28   :  { %v1402_v59 = vsel %vm497_vm1, %v1399_v50, %v1401_v7  ;;  %v1403_v51 = vsel %vm497_vm1, %v1401_v7, %v1399_v50 }
 0xa29   :  { %v1416_v54 = vmul.f32 %v1409_v12, %v1402_v59  ;;  %v1417_v55 = vmul.f32 %v1413_v48, %v1403_v51 }
 0xa2b   :  { %v1995_v56 = vpack.c.bf16 %v1416_v54, %v1394_v53  ;;  %v1423_v57 = vpop.permute.xlu1 %1422  ;;  %v1421_v58 = vpop.permute.xlu0 %1420  ;;  %v1993_v60 = vpack.c.bf16 %v1417_v55, %v1395_v8 }
 0xa2c   :  { %v1425_v62 = vsel %vm521_vm2, %v1423_v57, %v1421_v58  ;;  %v1424_v0 = vsel %vm521_vm2, %v1421_v58, %v1423_v57 }
 0xa2d   :  { %v1439_v1 = vmul.f32 %v1435_v52, %v1425_v62  ;;  %1994 = vmatprep.subr.bf16.mxu0 %v1993_v60  ;;  %v1438_v41 = vmul.f32 %v1431_v61, %v1424_v0 }
 0xa2e   :  { %1996 = vmatpush1.bf16.msra.mxu0 %v1995_v56 }
 0xa2f   :  { %1480 = vmatprep.subr.mxu0 %v1439_v1 }
 0xa32   :  { %1481 = vmatpush1.msra.mxu0 %v1438_v41 }
 0xa33   :  { %1934 = vmatmul.mubr.msk.f32.vlgmr.msra.gmra.mrb[10].mxu0 %vm560_vm3, %v2179_v63 }
 0xa34   :  { %1799 = vmatprep.mubr.f32.mxu0 %v2181_v3 }
 0xa7a   :  { %v911_v39 = vpop.f32.mrb[2].mxu0 }
 0xa7b   :  { %934 = vst [vmem:[%s2921_s7] sm:$0xff] %v911_v39  ;;  %v913_v36 = vpop.f32.mrb[3].mxu0  ;;  %v958_v2 = vmul.f32 %v911_v39, %v911_v39 }
 0xa7c   :  { %935 = vst [vmem:[%s2921_s7 + $0x8] sm:$0xff] %v913_v36  ;;  %v942_v5 = vadd.f32 %v913_v36, %v911_v39  ;;  %v959_v6 = vmul.f32 %v913_v36, %v913_v36 }
 0xa7e   :  { %v917_v9 = vpop.f32.mrb[4].mxu0  ;;  %v2783_v10 = vadd.f32 %v959_v6, %v958_v2 }
 0xa7f   :  { %936 = vst [vmem:[%s2921_s7 + $0x10] sm:$0xff] %v917_v9  ;;  %v919_v16 = vpop.f32.mrb[5].mxu0  ;;  %v960_v42 = vmul.f32 %v917_v9, %v917_v9 }
 0xa80   :  { %937 = vst [vmem:[%s2921_s7 + $0x18] sm:$0xff] %v919_v16  ;;  %v945_v13 = vadd.f32 %v919_v16, %v917_v9  ;;  %v961_v17 = vmul.f32 %v919_v16, %v919_v16 }
 0xa82   :  { %v923_v30 = vpop.f32.mrb[6].mxu0  ;;  %v969_v19 = vadd.f32 %v961_v17, %v960_v42 }
 0xa83   :  { %938 = vst [vmem:[%s2921_s7 + $0x20] sm:$0xff] %v923_v30  ;;  %v925_v32 = vpop.f32.mrb[7].mxu0  ;;  %v962_v34 = vmul.f32 %v923_v30, %v923_v30 }
 0xa84   :  { %939 = vst [vmem:[%s2921_s7 + $0x28] sm:$0xff] %v925_v32  ;;  %v948_v28 = vadd.f32 %v925_v32, %v923_v30  ;;  %v963_v29 = vmul.f32 %v925_v32, %v925_v32 }
 0xa86   :  { %v929_v31 = vpop.f32.mrb[8].mxu0  ;;  %v972_v15 = vadd.f32 %v963_v29, %v962_v34 }
 0xa87   :  { %940 = vst [vmem:[%s2921_s7 + $0x30] sm:$0xff] %v929_v31  ;;  %v931_v37 = vpop.f32.mrb[9].mxu0  ;;  %v964_v38 = vmul.f32 %v929_v31, %v929_v31 }
 0xa88   :  { %941 = vst [vmem:[%s2921_s7 + $0x38] sm:$0xff] %v931_v37  ;;  %v951_v40 = vadd.f32 %v931_v37, %v929_v31  ;;  %v965_v21 = vmul.f32 %v931_v37, %v931_v37 }
 0xa8a   :  { %v975_v43 = vadd.f32 %v965_v21, %v964_v38 }
 0xb06   :  { %v2803_v44 = vpop.f32.mrb[10].mxu0 }
 0xb07   :  { %v2805_v46 = vpop.f32.mrb[11].mxu0  ;;  %v1538_v47 = vmul.f32 %v2803_v44, %v2803_v44 }
 0xb08   :  { %v1535_v11 = vadd.f32 %v2805_v46, %v2803_v44  ;;  %v1539_v22 = vmul.f32 %v2805_v46, %v2805_v46 }
 0xb0a   :  { %1536 = vadd.xlane.f32.xlu0 %v1535_v11  ;;  %v1540_v12 = vadd.f32 %v1539_v22, %v1538_v47 }
 0xb0c   :  { %1541 = vadd.xlane.f32.xlu1 %v1540_v12 }
 0xb97   :  { %v1537_v48 = vpop.xlane.xlu0 %1536 }
 0xb98   :  { %v1580_v49 = vmul.f32 %v2296_v23, %v1537_v48  ;;  %v1543_v14 = vmul.f32 %v2299_v24, %v1537_v48  ;;  %v1617_v59 = vmul.f32 %v2302_v26, %v1537_v48  ;;  %v1654_v8 = vmul.f32 %v2311_v33, %v1537_v48 }
 0xb99   :  { %v1542_v25 = vpop.xlane.xlu1 %1541 }
 0xb9a   :  { %v1581_v7 = vsel %vm131_vm8, %v1580_v49, 0.0  ;;  %v1544_v50 = vsel %vm131_vm8, %v1543_v14, 0.0  ;;  %v1554_v51 = vmul.f32 %v2299_v24, %v1542_v25  ;;  %v1618_v52 = vsel %vm131_vm8, %v1617_v59, 0.0 }
 0xb9b   :  { %1582 = vadd.xlane.f32.xlu1 %v1581_v7  ;;  %1545 = vadd.xlane.f32.xlu0 %v1544_v50  ;;  %v1591_v54 = vmul.f32 %v2296_v23, %v1542_v25  ;;  %v1655_v55 = vsel %vm131_vm8, %v1654_v8, 0.0  ;;  %v1628_v57 = vmul.f32 %v2302_v26, %v1542_v25  ;;  %v1665_v60 = vmul.f32 %v2311_v33, %v1542_v25 }
 0xb9c   :  { %v1555_v53 = vsel %vm131_vm8, %v1554_v51, 0.0 }
 0xb9d   :  { %v1592_v56 = vsel %vm131_vm8, %v1591_v54, 0.0  ;;  %v1629_v58 = vsel %vm131_vm8, %v1628_v57, 0.0  ;;  %v1666_v61 = vsel %vm131_vm8, %v1665_v60, 0.0 }
 0xb9f   :  { %1619 = vadd.xlane.f32.xlu1 %v1618_v52  ;;  %1556 = vadd.xlane.f32.xlu0 %v1555_v53 }
 0xba3   :  { %1656 = vadd.xlane.f32.xlu1 %v1655_v55  ;;  %1593 = vadd.xlane.f32.xlu0 %v1592_v56 }
 0xba7   :  { %1630 = vadd.xlane.f32.xlu0 %v1629_v58 }
 0xbab   :  { %1667 = vadd.xlane.f32.xlu0 %v1666_v61 }
 0xbaf   :  { %943 = vadd.xlane.f32.xlu0 %v942_v5 }
 0xbb3   :  { %946 = vadd.xlane.f32.xlu0 %v945_v13 }
 0xbb7   :  { %949 = vadd.xlane.f32.xlu0 %v948_v28 }
 0xbbb   :  { %952 = vadd.xlane.f32.xlu0 %v951_v40 }
 0xbbf   :  { %970 = vadd.xlane.f32.xlu0 %v969_v19 }
 0xbc3   :  { %973 = vadd.xlane.f32.xlu0 %v972_v15 }
 0xbc7   :  { %976 = vadd.xlane.f32.xlu0 %v975_v43 }
 0xc28   :  { %v1546_v62 = vpop.xlane.xlu0 %1545  ;;  %v1583_v13 = vpop.xlane.xlu1 %1582 }
 0xc29   :  { %v1547_v0 = vrot.slane %v1546_v62, 4  ;;  %v1584_v19 = vrot.slane %v1583_v13, 4 }
 0xc2b   :  { %v1548_v1 = vadd.f32 %v1547_v0, %v1546_v62  ;;  %v1585_v34 = vadd.f32 %v1584_v19, %v1583_v13 }
 0xc2c   :  { %v1557_v41 = vpop.xlane.xlu0 %1556  ;;  %v1620_v22 = vpop.xlane.xlu1 %1619 }
 0xc2d   :  { %v1549_v63 = vrot.slane %v1548_v1, 2  ;;  %v1558_v39 = vrot.slane %v1557_v41, 4  ;;  %v1586_v29 = vrot.slane %v1585_v34, 2  ;;  %v1621_v48 = vrot.slane %v1620_v22, 4 }
 0xc2f   :  { %v1559_v36 = vadd.f32 %v1558_v39, %v1557_v41  ;;  %v1550_v2 = vadd.f32 %v1549_v63, %v1548_v1  ;;  %v1587_v37 = vadd.f32 %v1586_v29, %v1585_v34  ;;  %v1622_v14 = vadd.f32 %v1621_v48, %v1620_v22 }
 0xc30   :  { %v1594_v30 = vpop.xlane.xlu0 %1593  ;;  %v1657_v58 = vpop.xlane.xlu1 %1656 }
 0xc31   :  { %v1560_v6 = vrot.slane %v1559_v36, 2  ;;  %v1551_v9 = vrot.slane %v1550_v2, 1  ;;  %v1595_v32 = vrot.slane %v1594_v30, 4  ;;  %v1588_v40 = vrot.slane %v1587_v37, 1 }
 0xc32   :  { %v1623_v7 = vrot.slane %v1622_v14, 2  ;;  %v1658_v1 = vrot.slane %v1657_v58, 4 }
 0xc33   :  { %v1561_v16 = vadd.f32 %v1560_v6, %v1559_v36  ;;  %v1552_v42 = vadd.f32 %v1551_v9, %v1550_v2  ;;  %v1596_v28 = vadd.f32 %v1595_v32, %v1594_v30  ;;  %v1589_v47 = vadd.f32 %v1588_v40, %v1587_v37 }
 0xc34   :  { %v1631_v12 = vpop.xlane.xlu0 %1630  ;;  %v1624_v51 = vadd.f32 %v1623_v7, %v1622_v14  ;;  %v1659_v39 = vadd.f32 %v1658_v1, %v1657_v58  ;;  %v1693_v40 = vmul.f32 %v2805_v46, %v2609_v35 }
 0xc35   :  { %v1562_v17 = vrot.slane %v1561_v16, 1  ;;  %2071 = vpush %v1552_v42  ;;  %v1597_v31 = vrot.slane %v1596_v28, 2  ;;  %v1632_v49 = vrot.slane %v1631_v12, 4 }
 0xc36   :  { %v1625_v53 = vrot.slane %v1624_v51, 1  ;;  %v1660_v2 = vrot.slane %v1659_v39, 2 }
 0xc37   :  { %v1563_v5 = vadd.f32 %v1562_v17, %v1561_v16  ;;  %v1598_v38 = vadd.f32 %v1597_v31, %v1596_v28  ;;  %v1633_v25 = vadd.f32 %v1632_v49, %v1631_v12 }
 0xc38   :  { %v1626_v55 = vadd.f32 %v1625_v53, %v1624_v51  ;;  %v1668_v60 = vpop.xlane.xlu0 %1667  ;;  %v1661_v16 = vadd.f32 %v1660_v2, %v1659_v39 }
 0xc39   :  { %2073 = vpush %v1563_v5  ;;  %v1599_v21 = vrot.slane %v1598_v38, 1  ;;  %v1634_v50 = vrot.slane %v1633_v25, 2  ;;  %v1669_v41 = vrot.slane %v1668_v60, 4 }
 0xc3b   :  { %v1600_v11 = vadd.f32 %v1599_v21, %v1598_v38  ;;  %v1635_v52 = vadd.f32 %v1634_v50, %v1633_v25  ;;  %v1670_v36 = vadd.f32 %v1669_v41, %v1668_v60  ;;  %v1692_v38 = vmul.f32 %v2803_v44, %v2609_v35 }
 0xc3d   :  { %v1636_v8 = vrot.slane %v1635_v52, 1  ;;  %v1671_v6 = vrot.slane %v1670_v36, 2  ;;  %v1935_v21 = vmul.f32 -1.442695, %v1692_v38 }
 0xc3f   :  { %v1637_v56 = vadd.f32 %v1636_v8, %v1635_v52  ;;  %v1672_v42 = vadd.f32 %v1671_v6, %v1670_v36  ;;  %v944_v36 = vpop.xlane.xlu0 %943 }
 0xc41   :  { %v1673_v17 = vrot.slane %v1672_v42, 1 }
 0xc43   :  { %v1674_v13 = vadd.f32 %v1673_v17, %v1672_v42  ;;  %v947_v2 = vpop.xlane.xlu0 %946 }
 0xc47   :  { %v950_v6 = vpop.xlane.xlu0 %949 }
 0xc66   :  { %s2072_s0 = spop %2071 }
 0xc67   :  { %s1567_s11 = smul.f32 0.001953125, %s2072_s0 }
 0xc69   :  { %s1568_s12 = smul.f32 %s2072_s0, %s1567_s11 }
 0xc6a   :  { %s2074_s13 = spop %2073 }
 0xc6b   :  { %s1569_s14 = ssub.f32 %s2074_s13, %s1568_s12 }
 0xc6d   :  { %s1572_s15 = smul.f32 0.0019569471, %s1569_s14 }
 0xc6f   :  { %s1573_s16 = sadd.f32 1e-05, %s1572_s15 }
 0xc71   :  { %v1574_v15 = vstv %s1573_s16 }
 0xc72   :  { %2162 = vrsqrt.f32 %v1574_v15 }
 0xc7c   :  { %v2163_v43 = vpop.eup %2162 }
 0xc7d   :  { %2075 = vpush %v2163_v43  ;;  %v1936_v43 = vmul.f32 -1.442695, %v1693_v40 }
 0xc7e   :  { %2077 = vpush %v1589_v47 }
 0xc7f   :  { %2079 = vpush %v1600_v11 }
 0xcae   :  { %s2829_s25 = spop %2075 }
 0xcaf   :  { %s2078_s5 = spop %2077  ;;  %v1577_v57 = vstv %s2829_s25 }
 0xcb0   :  { %s1604_s4 = smul.f32 0.001953125, %s2078_s5  ;;  %s2080_s18 = spop %2079  ;;  %v1578_v62 = vmul.f32 %v2299_v24, %v1577_v57  ;;  %v1662_v24 = vrot.slane %v1661_v16, 1 }
 0xcb2   :  { %s1605_s26 = smul.f32 %s2078_s5, %s1604_s4  ;;  %v1663_v5 = vadd.f32 %v1662_v24, %v1661_v16 }
 0xcb4   :  { %s1606_s21 = ssub.f32 %s2080_s18, %s1605_s26 }
 0xcb6   :  { %s1609_s24 = smul.f32 0.0019569471, %s1606_s21 }
 0xcb8   :  { %s1610_s27 = sadd.f32 1e-05, %s1609_s24 }
 0xcba   :  { %v1611_v59 = vstv %s1610_s27 }
 0xcbb   :  { %2164 = vrsqrt.f32 %v1611_v59 }
 0xcc5   :  { %v2165_v54 = vpop.eup %2164 }
 0xcc6   :  { %2081 = vpush %v2165_v54 }
 0xcc7   :  { %2083 = vpush %v1626_v55 }
 0xcc8   :  { %2085 = vpush %v1637_v56 }
 0xcf7   :  { %s2082_s2 = spop %2081 }
 0xcf8   :  { %v1614_v61 = vstv %s2082_s2  ;;  %s2084_s17 = spop %2083 }
 0xcf9   :  { %v1615_v0 = vmul.f32 %v2296_v23, %v1614_v61  ;;  %s1641_s1 = smul.f32 0.001953125, %s2084_s17  ;;  %s2086_s19 = spop %2085 }
 0xcfb   :  { %v1616_v63 = vadd.f32 %v1615_v0, %v1578_v62  ;;  %s1642_s3 = smul.f32 %s2084_s17, %s1641_s1 }
 0xcfd   :  { %s1643_s20 = ssub.f32 %s2086_s19, %s1642_s3 }
 0xcff   :  { %s1646_s28 = smul.f32 0.0019569471, %s1643_s20 }
 0xd01   :  { %s1647_s22 = sadd.f32 1e-05, %s1646_s28 }
 0xd03   :  { %v1648_v9 = vstv %s1647_s22 }
 0xd04   :  { %2166 = vrsqrt.f32 %v1648_v9  ;;  %v953_v9 = vpop.xlane.xlu0 %952 }
 0xd08   :  { %v971_v16 = vpop.xlane.xlu0 %970 }
 0xd0c   :  { %v974_v42 = vpop.xlane.xlu0 %973 }
 0xd0e   :  { %v2167_v23 = vpop.eup %2166 }
 0xd0f   :  { %2087 = vpush %v2167_v23 }
 0xd10   :  { %2089 = vpush %v1663_v5  ;;  %v977_v24 = vpop.xlane.xlu0 %976 }
 0xd11   :  { %2091 = vpush %v1674_v13 }
 0xd40   :  { %s2088_s23 = spop %2087 }
 0xd41   :  { %v1651_v30 = vstv %s2088_s23  ;;  %s2090_s29 = spop %2089 }
 0xd42   :  { %v1652_v19 = vmul.f32 %v2302_v26, %v1651_v30  ;;  %s1678_s30 = smul.f32 0.001953125, %s2090_s29  ;;  %s2092_s0 = spop %2091  ;;  %v2180_v26 = vld [vmem:[%s2919_s6] sm:$0xff] }
 0xd44   :  { %v1653_v32 = vadd.f32 %v1652_v19, %v1616_v63  ;;  %s1679_s10 = smul.f32 %s2090_s29, %s1678_s30 }
 0xd46   :  { %s1680_s11 = ssub.f32 %s2092_s0, %s1679_s10 }
 0xd48   :  { %s1683_s12 = smul.f32 0.0019569471, %s1680_s11 }
 0xd4a   :  { %s1684_s13 = sadd.f32 1e-05, %s1683_s12 }
 0xd4c   :  { %v1685_v34 = vstv %s1684_s13 }
 0xd4d   :  { %2168 = vrsqrt.f32 %v1685_v34 }
 0xd4e   :  { %2170 = vpow2.f32 %v1935_v21 }
 0xd4f   :  { %2172 = vpow2.f32 %v1936_v43 }
 0xd57   :  { %v2169_v28 = vpop.eup %2168 }
 0xd58   :  { %2093 = vpush %v2169_v28 }
 0xd89   :  { %s2094_s14 = spop %2093 }
 0xd8a   :  { %v1688_v29 = vstv %s2094_s14 }
 0xd8b   :  { %v1689_v31 = vmul.f32 %v2311_v33, %v1688_v29  ;;  %v2171_v33 = vpop.eup %2170 }
 0xd8c   :  { %v2173_v47 = vpop.eup %2172  ;;  %v1700_v11 = vadd.f32 1.0, %v2171_v33 }
 0xd8d   :  { %v1690_v15 = vadd.f32 %v1689_v31, %v1653_v32  ;;  %v1701_v22 = vadd.f32 1.0, %v2173_v47 }
 0xd8e   :  { %2174 = vrcp.f32 %v1700_v11 }
 0xd8f   :  { %v1691_v37 = vmul.f32 %v2180_v26, %v1690_v15  ;;  %2176 = vrcp.f32 %v1701_v22 }
 0xd91   :  { %1710 = vperm.xlu1 %2112, %v1691_v37  }
 0xd98   :  { %v2175_v12 = vpop.eup %2174 }
 0xd99   :  { %v2177_v48 = vpop.eup %2176 }
 0xd9a   :  { %v1707_v49 = vmul.f32 %v2177_v48, %v2805_v46 }
 0xdb5   :  { %967 = vadd.xlane.f32.xlu1 %v2783_v10  ;;  %v1706_v10 = vmul.f32 %v2175_v12, %v2803_v44 }
 0xe10   :  { %v1711_v14 = vpop.permute.xlu1 %1710 }
 0xe11   :  { %v1713_v25 = vmul.f32 %v1711_v14, %v1706_v10  ;;  %v1714_v7 = vmul.f32 %v1711_v14, %v1707_v49 }
 0xe13   :  { %v1715_v35 = vadd.f32 %v1713_v25, %v2629_v18  ;;  %v1716_v50 = vadd.f32 %v1714_v7, %v2629_v18 }
 0xe15   :  { %v1717_v59 = vmax.f32 %v1715_v35, 0.0  ;;  %v1718_v51 = vmax.f32 %v1716_v50, 0.0 }
 0xe17   :  { %1735 = vmatprep.subr.mxu0 %v1718_v51  ;;  %1997 = vmatprep.subr.mxu1 %v1718_v51 }
 0xe18   :  { %1736 = vmatpush1.msra.mxu0 %v1717_v59  ;;  %1998 = vmatpush1.msra.mxu1 %v1717_v59 }
 0xe19   :  { %1937 = vmatmul.mubr.msk.f32.vlgmr.msra.gmra.mrb[12].mxu0 %vm832_vm0, %v2640_v45  ;;  %1938 = vmatmul.mubr.msk.f32.vlgmr.msra.gmra.mrb[4].mxu1 %vm832_vm0, %v2652_v20 }
 0xe1a   :  { %1811 = vmatprep.mubr.f32.mxu1 %v2181_v3 }
 0xe1d   :  { %1939 = vmatmul.mubr.msk.f32.gmra.mrb[6].mxu1 %vm832_vm0, %v2664_v27 }
 0xe1e   :  { %1817 = vmatprep.mubr.f32.mxu1 %v2181_v3 }
 0xe21   :  { %1940 = vmatmul.mubr.msk.f32.gmra.mrb[8].mxu1 %vm832_vm0, %v2676_v4 }
 0xe42   :  { %v968_v5 = vpop.xlane.xlu1 %967 }
 0xeec   :  { %v1801_v18 = vpop.f32.mrb[12].mxu0  ;;  %v1807_v44 = vpop.f32.mrb[4].mxu1 }
 0xeed   :  { %1941 = vst [vmem:[%s2921_s7 + $0x40] sm:$0xff] %v1801_v18  ;;  %v1803_v45 = vpop.f32.mrb[13].mxu0  ;;  %1943 = vst [vmem:[%s2921_s7 + $0x50] sm:$0xff] %v1807_v44  ;;  %v1809_v20 = vpop.f32.mrb[5].mxu1  ;;  %v1849_v46 = vmul.f32 %v1801_v18, %v1801_v18  ;;  %v1851_v52 = vmul.f32 %v1807_v44, %v1807_v44 }
 0xeee   :  { %1942 = vst [vmem:[%s2921_s7 + $0x48] sm:$0xff] %v1803_v45  ;;  %v1850_v3 = vmul.f32 %v1803_v45, %v1803_v45  ;;  %1944 = vst [vmem:[%s2921_s7 + $0x58] sm:$0xff] %v1809_v20  ;;  %v1833_v27 = vadd.f32 %v1803_v45, %v1801_v18  ;;  %v1836_v4 = vadd.f32 %v1809_v20, %v1807_v44 }
 0xeef   :  { %v1852_v53 = vmul.f32 %v1809_v20, %v1809_v20 }
 0xef0   :  { %v1813_v8 = vpop.f32.mrb[6].mxu1  ;;  %1834 = vadd.xlane.f32.xlu0 %v1833_v27  ;;  %v1857_v54 = vadd.f32 %v1850_v3, %v1849_v46 }
 0xef1   :  { %v1860_v55 = vadd.f32 %v1852_v53, %v1851_v52  ;;  %1945 = vst [vmem:[%s2921_s7 + $0x60] sm:$0xff] %v1813_v8  ;;  %v1815_v56 = vpop.f32.mrb[7].mxu1  ;;  %v1853_v57 = vmul.f32 %v1813_v8, %v1813_v8 }
 0xef2   :  { %1946 = vst [vmem:[%s2921_s7 + $0x68] sm:$0xff] %v1815_v56  ;;  %v1854_v58 = vmul.f32 %v1815_v56, %v1815_v56  ;;  %v1839_v60 = vadd.f32 %v1815_v56, %v1813_v8 }
 0xef4   :  { %1837 = vadd.xlane.f32.xlu0 %v1836_v4  ;;  %v1863_v61 = vadd.f32 %v1854_v58, %v1853_v57  ;;  %v1819_v62 = vpop.f32.mrb[8].mxu1 }
 0xef5   :  { %1947 = vst [vmem:[%s2921_s7 + $0x70] sm:$0xff] %v1819_v62  ;;  %v1855_v0 = vmul.f32 %v1819_v62, %v1819_v62  ;;  %v1821_v1 = vpop.f32.mrb[9].mxu1 }
 0xef6   :  { %1864 = vadd.xlane.f32.xlu1 %v1863_v61  ;;  %1948 = vst [vmem:[%s2921_s7 + $0x78] sm:$0xff] %v1821_v1  ;;  %v1842_v41 = vadd.f32 %v1821_v1, %v1819_v62  ;;  %v1856_v63 = vmul.f32 %v1821_v1, %v1821_v1 }
 0xef8   :  { %1858 = vadd.xlane.f32.xlu0 %v1857_v54  ;;  %v1866_v39 = vadd.f32 %v1856_v63, %v1855_v0 }
 0xefc   :  { %1861 = vadd.xlane.f32.xlu0 %v1860_v55 }
 0xf00   :  { %1840 = vadd.xlane.f32.xlu0 %v1839_v60 }
 0xf04   :  { %1843 = vadd.xlane.f32.xlu0 %v1842_v41 }
 0xf08   :  { %1867 = vadd.xlane.f32.xlu0 %v1866_v39 }
 0xf7d   :  { %v1835_v17 = vpop.xlane.xlu0 %1834 }
 0xf7e   :  { %v1845_v23 = vadd.f32 %v1835_v17, %v944_v36 }
 0xf80   :  { %1873 = vst.msk [vmem:[%s2922_s8] sm:$0xff] %vm131_vm8, %v1845_v23 }
 0xf81   :  { %v1838_v13 = vpop.xlane.xlu0 %1837 }
 0xf82   :  { %v1846_v30 = vadd.f32 %v1838_v13, %v947_v2 }
 0xf83   :  { %v1865_v19 = vpop.xlane.xlu1 %1864 }
 0xf84   :  { %1874 = vst.msk [vmem:[%s2922_s8 + $0x8] sm:$0xff] %vm131_vm8, %v1846_v30  ;;  %v1871_v32 = vadd.f32 %v1865_v19, %v974_v42 }
 0xf85   :  { %v1859_v34 = vpop.xlane.xlu0 %1858 }
 0xf86   :  { %1879 = vst.msk [vmem:[%s2923_s9 + $0x10] sm:$0xff] %vm131_vm8, %v1871_v32  ;;  %v1869_v28 = vadd.f32 %v1859_v34, %v968_v5 }
 0xf88   :  { %1877 = vst.msk [vmem:[%s2923_s9] sm:$0xff] %vm131_vm8, %v1869_v28 }
 0xf89   :  { %v1862_v29 = vpop.xlane.xlu0 %1861 }
 0xf8a   :  { %v1870_v31 = vadd.f32 %v1862_v29, %v971_v16 }
 0xf8c   :  { %1878 = vst.msk [vmem:[%s2923_s9 + $0x8] sm:$0xff] %vm131_vm8, %v1870_v31 }
 0xf8d   :  { %v1841_v15 = vpop.xlane.xlu0 %1840 }
 0xf8e   :  { %v1847_v26 = vadd.f32 %v1841_v15, %v950_v6 }
 0xf90   :  { %1875 = vst.msk [vmem:[%s2922_s8 + $0x10] sm:$0xff] %vm131_vm8, %v1847_v26 }
 0xf91   :  { %v1844_v37 = vpop.xlane.xlu0 %1843 }
 0xf92   :  { %v1848_v38 = vadd.f32 %v1844_v37, %v953_v9 }
 0xf94   :  { %1876 = vst.msk [vmem:[%s2922_s8 + $0x18] sm:$0xff] %vm131_vm8, %v1848_v38 }
 0xf95   :  { %v1868_v40 = vpop.xlane.xlu0 %1867 }
 0xf96   :  { %v1872_v21 = vadd.f32 %v1868_v40, %v977_v24 }
 0xf98   :  { %1880 = vst.msk [vmem:[%s2923_s9 + $0x18] sm:$0xff] %vm131_vm8, %v1872_v21 }

</bundles_post_ra>
